<compile_context>
chip_gen: v7x
topology: tpu7x:2x2x1
jax: 0.10.0
libtpu: 0.0.40
codegen_flags: <defaults>
</compile_context>

<pallas_src>
import jax
import jax.numpy as jnp
from jax import lax
from jax.experimental import pallas as pl
from jax.experimental.pallas import tpu as pltpu

EPS = 1e-5


def resnet_block_kernel(x_ref, w1_ref, w2_ref, o_ref, pad_ref):
    """One batch element: x_ref/o_ref (1,H,W,C) f32, w*_ref (3,3C,C) bf16,
    pad_ref (H+2,W+2,C) f32 VMEM scratch reused for both reflect-padded maps."""
    H, W, C = o_ref.shape[1], o_ref.shape[2], o_ref.shape[3]

    def fill_reflect_pad(interior):
        # interior: (H, W, C) f32.  Reflect pad of 1 built in VMEM.
        pad_ref[1:H + 1, 1:W + 1, :] = interior
        # reflect columns (full height; rows 0 / H+1 are fixed by the row
        # copies below, which also produce the correct corners)
        pad_ref[:, 0:1, :] = pad_ref[:, 2:3, :]
        pad_ref[:, W + 1:W + 2, :] = pad_ref[:, W - 1:W, :]
        # reflect rows (full width, corners included)
        pad_ref[0:1, :, :] = pad_ref[2:3, :, :]
        pad_ref[H + 1:H + 2, :, :] = pad_ref[H - 1:H, :, :]

    def conv3x3_instancenorm(w_ref):
        # Reads the padded map from pad_ref; returns IN(conv(.)) as (H*W, C) f32.
        xp = pad_ref[...].astype(jnp.bfloat16)            # (H+2, W+2, C)
        # kx-im2col: stack the 3 horizontal taps along channels -> (H+2, W, 3C)
        cols = jnp.concatenate([xp[:, kx:kx + W, :] for kx in range(3)], axis=-1)
        acc = jnp.zeros((H * W, C), jnp.float32)
        for ky in range(3):                               # 3 MXU dots, K = 3C
            patch = cols[ky:ky + H].reshape(H * W, 3 * C)  # bf16
            acc = acc + jnp.dot(patch, w_ref[ky],
                                preferred_element_type=jnp.float32)
        # NOTE: conv bias intentionally omitted — cancelled exactly by the
        # mean subtraction of InstanceNorm2d(affine=False).
        mean = jnp.mean(acc, axis=0, keepdims=True)        # (1, C)
        mean_sq = jnp.mean(acc * acc, axis=0, keepdims=True)
        var = mean_sq - mean * mean                        # biased variance
        return (acc - mean) * lax.rsqrt(var + EPS)

    x = x_ref[0]                                           # (H, W, C) f32

    # conv1 -> InstanceNorm -> ReLU
    fill_reflect_pad(x)
    y1 = jnp.maximum(conv3x3_instancenorm(w1_ref), 0.0)    # (H*W, C) f32

    # conv2 -> InstanceNorm -> residual add (y1 halo rebuilt in VMEM, no HBM)
    fill_reflect_pad(y1.reshape(H, W, C))
    y2 = conv3x3_instancenorm(w2_ref)

    o_ref[0] = x + y2.reshape(H, W, C)


def resnet_block_forward(x_nchw, w1, b1, w2, b2):
    """x_nchw: (B, C, H, W) f32.  w*: (3, 3, Cin, Cout) HWIO, b*: (C,).
    b1/b2 are accepted for API parity but are mathematically a no-op under
    InstanceNorm2d(affine=False), so they are not passed to the kernel."""
    del b1, b2
    x = jnp.transpose(x_nchw, (0, 2, 3, 1))                # NCHW -> NHWC
    B, H, W, C = x.shape

    # (ky, kx, Cin, Cout) -> (ky, kx*Cin, Cout), bf16 for the MXU.
    w1r = w1.reshape(3, 3 * C, C).astype(jnp.bfloat16)
    w2r = w2.reshape(3, 3 * C, C).astype(jnp.bfloat16)

    x_spec = pl.BlockSpec((1, H, W, C), lambda b: (b, 0, 0, 0))
    w_spec = pl.BlockSpec((3, 3 * C, C), lambda b: (0, 0, 0))
    out_spec = pl.BlockSpec((1, H, W, C), lambda b: (b, 0, 0, 0))

    cost = pl.CostEstimate(
        flops=2 * B * (2 * H * W * 9 * C * C),             # two 3x3 convs
        transcendentals=2 * B * C,                         # rsqrt per IN
        bytes_accessed=2 * B * H * W * C * 4 + 2 * 3 * 3 * C * C * 2,
    )

    # Production note (v7x, C=256, H=W>=64): tile H into strips with a second
    # "parallel" grid axis and a two-sweep instance norm to fit 64 MiB VMEM
    # and feed both TensorCores; whole-image blocks are fine at demo sizes.
    out = pl.pallas_call(
        resnet_block_kernel,
        out_shape=jax.ShapeDtypeStruct((B, H, W, C), jnp.float32),
        grid=(B,),
        in_specs=[x_spec, w_spec, w_spec],
        out_specs=out_spec,
        scratch_shapes=[pltpu.VMEM((H + 2, W + 2, C), jnp.float32)],
        compiler_params=pltpu.CompilerParams(
            dimension_semantics=("parallel",),
            vmem_limit_bytes=32 * 1024 * 1024,
        ),
        cost_estimate=cost,
    )(x, w1r, w2r)

    return jnp.transpose(out, (0, 3, 1, 2))                # NHWC -> NCHW


# ----------------------------- reference (pure JAX) -------------------------
def _ref_conv_in(x_nhwc, w, b):
    xp = jnp.pad(x_nhwc, ((0, 0), (1, 1), (1, 1), (0, 0)), mode='reflect')
    y = lax.conv_general_dilated(
        xp, w, window_strides=(1, 1), padding='VALID',
        dimension_numbers=('NHWC', 'HWIO', 'NHWC'),
        precision=lax.Precision.HIGHEST) + b
    mean = jnp.mean(y, axis=(1, 2), keepdims=True)
    var = jnp.mean((y - mean) ** 2, axis=(1, 2), keepdims=True)
    return (y - mean) * lax.rsqrt(var + EPS)


def resnet_block_ref(x_nchw, w1, b1, w2, b2):
    x = jnp.transpose(x_nchw, (0, 2, 3, 1))
    y1 = jnp.maximum(_ref_conv_in(x, w1, b1), 0.0)
    out = x + _ref_conv_in(y1, w2, b2)
    return jnp.transpose(out, (0, 3, 1, 2))


if __name__ == "__main__":
    B, C, H, W = 2, 128, 16, 16
    key = jax.random.PRNGKey(0)
    kx_, kw1, kb1, kw2, kb2 = jax.random.split(key, 5)

    x = jax.random.normal(kx_, (B, C, H, W), dtype=jnp.float32)
    # Deterministic synthetic params (HWIO layout for the 3x3 convs).
    w1 = 0.1 * jax.random.normal(kw1, (3, 3, C, C), dtype=jnp.float32)
    b1 = 0.05 * jax.random.normal(kb1, (C,), dtype=jnp.float32)
    w2 = 0.1 * jax.random.normal(kw2, (3, 3, C, C), dtype=jnp.float32)
    b2 = 0.05 * jax.random.normal(kb2, (C,), dtype=jnp.float32)

    out = jax.block_until_ready(resnet_block_forward(x, w1, b1, w2, b2))
    ref = resnet_block_ref(x, w1, b1, w2, b2)

    assert out.shape == (B, C, H, W)
    # bf16 MXU operands with f32 accumulation -> ~1e-2 max deviation vs the
    # f32 reference; tolerance chosen accordingly.
    assert jnp.allclose(out, ref, atol=5e-2, rtol=5e-2), "mismatch vs reference"
    print("KERNEL_OK")
</pallas_src>

<mosaic_0001>
module attributes {stable_mosaic.version = 11 : i64} {
  func.func @resnet_block_kernel(%arg0: i32, %arg1: memref<1x16x16x128xf32, #tpu.memory_space<vmem>>, %arg2: memref<3x384x128xbf16, #tpu.memory_space<vmem>>, %arg3: memref<3x384x128xbf16, #tpu.memory_space<vmem>>, %arg4: memref<1x16x16x128xf32, #tpu.memory_space<vmem>>, %arg5: memref<18x18x128xf32, #tpu.memory_space<vmem>>) attributes {dimension_semantics = [#tpu.dimension_semantics<parallel>], iteration_bounds = array<i64: 2>, scalar_prefetch = 0 : i64, scratch_operands = 1 : i64, tpu.core_type = #tpu.core_type<tc>, window_params = [{transform_indices = @transform_0, window_bounds = array<i64: 1, 16, 16, 128>}, {pipeline_mode = #tpu.pipeline_mode<synchronous>, transform_indices = @transform_1, window_bounds = array<i64: 3, 384, 128>}, {pipeline_mode = #tpu.pipeline_mode<synchronous>, transform_indices = @transform_2, window_bounds = array<i64: 3, 384, 128>}, {transform_indices = @transform_3, window_bounds = array<i64: 1, 16, 16, 128>}]} {
    %c0 = arith.constant 0 : index
    %c0_0 = arith.constant 0 : index
    %c0_1 = arith.constant 0 : index
    %c0_2 = arith.constant 0 : index
    %0 = vector.load %arg1[%c0, %c0_0, %c0_1, %c0_2] : memref<1x16x16x128xf32, #tpu.memory_space<vmem>>, vector<1x16x16x128xf32>
    %1 = vector.shape_cast %0 : vector<1x16x16x128xf32> to vector<16x16x128xf32>
    %c1 = arith.constant 1 : index
    %c1_3 = arith.constant 1 : index
    %c0_4 = arith.constant 0 : index
    %2 = vector.load %arg5[%c1, %c1_3, %c0_4] : memref<18x18x128xf32, #tpu.memory_space<vmem>>, vector<16x16x128xf32>
    tpu.vector_store %arg5[%c1, %c1_3, %c0_4], %1 {strides = array<i32>} : memref<18x18x128xf32, #tpu.memory_space<vmem>>, vector<16x16x128xf32>,
    %c0_5 = arith.constant 0 : index
    %c2 = arith.constant 2 : index
    %c0_6 = arith.constant 0 : index
    %3 = vector.load %arg5[%c0_5, %c2, %c0_6] : memref<18x18x128xf32, #tpu.memory_space<vmem>>, vector<18x1x128xf32>
    %c0_7 = arith.constant 0 : index
    %c0_8 = arith.constant 0 : index
    %c0_9 = arith.constant 0 : index
    %4 = vector.load %arg5[%c0_7, %c0_8, %c0_9] : memref<18x18x128xf32, #tpu.memory_space<vmem>>, vector<18x1x128xf32>
    tpu.vector_store %arg5[%c0_7, %c0_8, %c0_9], %3 {strides = array<i32>} : memref<18x18x128xf32, #tpu.memory_space<vmem>>, vector<18x1x128xf32>,
    %c0_10 = arith.constant 0 : index
    %c15 = arith.constant 15 : index
    %c0_11 = arith.constant 0 : index
    %5 = vector.load %arg5[%c0_10, %c15, %c0_11] : memref<18x18x128xf32, #tpu.memory_space<vmem>>, vector<18x1x128xf32>
    %c0_12 = arith.constant 0 : index
    %c17 = arith.constant 17 : index
    %c0_13 = arith.constant 0 : index
    %6 = vector.load %arg5[%c0_12, %c17, %c0_13] : memref<18x18x128xf32, #tpu.memory_space<vmem>>, vector<18x1x128xf32>
    tpu.vector_store %arg5[%c0_12, %c17, %c0_13], %5 {strides = array<i32>} : memref<18x18x128xf32, #tpu.memory_space<vmem>>, vector<18x1x128xf32>,
    %c2_14 = arith.constant 2 : index
    %c0_15 = arith.constant 0 : index
    %c0_16 = arith.constant 0 : index
    %7 = vector.load %arg5[%c2_14, %c0_15, %c0_16] : memref<18x18x128xf32, #tpu.memory_space<vmem>>, vector<1x18x128xf32>
    %c0_17 = arith.constant 0 : index
    %c0_18 = arith.constant 0 : index
    %c0_19 = arith.constant 0 : index
    %8 = vector.load %arg5[%c0_17, %c0_18, %c0_19] : memref<18x18x128xf32, #tpu.memory_space<vmem>>, vector<1x18x128xf32>
    tpu.vector_store %arg5[%c0_17, %c0_18, %c0_19], %7 {strides = array<i32>} : memref<18x18x128xf32, #tpu.memory_space<vmem>>, vector<1x18x128xf32>,
    %c15_20 = arith.constant 15 : index
    %c0_21 = arith.constant 0 : index
    %c0_22 = arith.constant 0 : index
    %9 = vector.load %arg5[%c15_20, %c0_21, %c0_22] : memref<18x18x128xf32, #tpu.memory_space<vmem>>, vector<1x18x128xf32>
    %c17_23 = arith.constant 17 : index
    %c0_24 = arith.constant 0 : index
    %c0_25 = arith.constant 0 : index
    %10 = vector.load %arg5[%c17_23, %c0_24, %c0_25] : memref<18x18x128xf32, #tpu.memory_space<vmem>>, vector<1x18x128xf32>
    tpu.vector_store %arg5[%c17_23, %c0_24, %c0_25], %9 {strides = array<i32>} : memref<18x18x128xf32, #tpu.memory_space<vmem>>, vector<1x18x128xf32>,
    %c0_26 = arith.constant 0 : index
    %c0_27 = arith.constant 0 : index
    %c0_28 = arith.constant 0 : index
    %11 = vector.load %arg5[%c0_26, %c0_27, %c0_28] : memref<18x18x128xf32, #tpu.memory_space<vmem>>, vector<18x18x128xf32>
    %12 = arith.truncf %11 : vector<18x18x128xf32> to vector<18x18x128xbf16>
    %13 = vector.extract_strided_slice %12 {offsets = [0, 0, 0], sizes = [18, 16, 128], strides = [1, 1, 1]} : vector<18x18x128xbf16> to vector<18x16x128xbf16>
    %14 = vector.extract_strided_slice %12 {offsets = [0, 1, 0], sizes = [18, 16, 128], strides = [1, 1, 1]} : vector<18x18x128xbf16> to vector<18x16x128xbf16>
    %15 = vector.extract_strided_slice %12 {offsets = [0, 2, 0], sizes = [18, 16, 128], strides = [1, 1, 1]} : vector<18x18x128xbf16> to vector<18x16x128xbf16>
    %16 = tpu.concatenate %13, %14, %15 in 2 : vector<18x16x128xbf16>, vector<18x16x128xbf16>, vector<18x16x128xbf16> -> vector<18x16x384xbf16>
    %cst = arith.constant 0.000000e+00 : f32
    %17 = vector.broadcast %cst : f32 to vector<256x128xf32>
    %18 = vector.extract_strided_slice %16 {offsets = [0, 0, 0], sizes = [16, 16, 384], strides = [1, 1, 1]} : vector<18x16x384xbf16> to vector<16x16x384xbf16>
    %19 = vector.shape_cast %18 : vector<16x16x384xbf16> to vector<256x384xbf16>
    %c0_29 = arith.constant 0 : index
    %c0_30 = arith.constant 0 : index
    %c0_31 = arith.constant 0 : index
    %20 = vector.load %arg2[%c0_29, %c0_30, %c0_31] : memref<3x384x128xbf16, #tpu.memory_space<vmem>>, vector<1x384x128xbf16>
    %21 = vector.shape_cast %20 : vector<1x384x128xbf16> to vector<384x128xbf16>
    %cst_32 = arith.constant dense<0.000000e+00> : vector<256x128xf32>
    %22 = tpu.matmul %19, %21, %cst_32 {dimension_numbers = #tpu.dot_dimension_numbers<[1], [0], [0], [1], [0, 0, 1, 1], [], []>} : vector<256x384xbf16>, vector<384x128xbf16>, vector<256x128xf32> -> vector<256x128xf32>
    %23 = arith.addf %17, %22 : vector<256x128xf32>
    %24 = vector.extract_strided_slice %16 {offsets = [1, 0, 0], sizes = [16, 16, 384], strides = [1, 1, 1]} : vector<18x16x384xbf16> to vector<16x16x384xbf16>
    %25 = vector.shape_cast %24 : vector<16x16x384xbf16> to vector<256x384xbf16>
    %c1_33 = arith.constant 1 : index
    %c0_34 = arith.constant 0 : index
    %c0_35 = arith.constant 0 : index
    %26 = vector.load %arg2[%c1_33, %c0_34, %c0_35] : memref<3x384x128xbf16, #tpu.memory_space<vmem>>, vector<1x384x128xbf16>
    %27 = vector.shape_cast %26 : vector<1x384x128xbf16> to vector<384x128xbf16>
    %cst_36 = arith.constant dense<0.000000e+00> : vector<256x128xf32>
    %28 = tpu.matmul %25, %27, %cst_36 {dimension_numbers = #tpu.dot_dimension_numbers<[1], [0], [0], [1], [0, 0, 1, 1], [], []>} : vector<256x384xbf16>, vector<384x128xbf16>, vector<256x128xf32> -> vector<256x128xf32>
    %29 = arith.addf %23, %28 : vector<256x128xf32>
    %30 = vector.extract_strided_slice %16 {offsets = [2, 0, 0], sizes = [16, 16, 384], strides = [1, 1, 1]} : vector<18x16x384xbf16> to vector<16x16x384xbf16>
    %31 = vector.shape_cast %30 : vector<16x16x384xbf16> to vector<256x384xbf16>
    %c2_37 = arith.constant 2 : index
    %c0_38 = arith.constant 0 : index
    %c0_39 = arith.constant 0 : index
    %32 = vector.load %arg2[%c2_37, %c0_38, %c0_39] : memref<3x384x128xbf16, #tpu.memory_space<vmem>>, vector<1x384x128xbf16>
    %33 = vector.shape_cast %32 : vector<1x384x128xbf16> to vector<384x128xbf16>
    %cst_40 = arith.constant dense<0.000000e+00> : vector<256x128xf32>
    %34 = tpu.matmul %31, %33, %cst_40 {dimension_numbers = #tpu.dot_dimension_numbers<[1], [0], [0], [1], [0, 0, 1, 1], [], []>} : vector<256x384xbf16>, vector<384x128xbf16>, vector<256x128xf32> -> vector<256x128xf32>
    %35 = arith.addf %29, %34 : vector<256x128xf32>
    %cst_41 = arith.constant dense<0.000000e+00> : vector<128xf32>
    %36 = vector.multi_reduction <add>, %35, %cst_41 [0] : vector<256x128xf32> to vector<128xf32>
    %37 = vector.shape_cast %36 : vector<128xf32> to vector<1x128xf32>
    %cst_42 = arith.constant 2.560000e+02 : f32
    %38 = vector.broadcast %cst_42 : f32 to vector<1x128xf32>
    %39 = arith.divf %37, %38 : vector<1x128xf32>
    %40 = arith.mulf %35, %35 : vector<256x128xf32>
    %cst_43 = arith.constant dense<0.000000e+00> : vector<128xf32>
    %41 = vector.multi_reduction <add>, %40, %cst_43 [0] : vector<256x128xf32> to vector<128xf32>
    %42 = vector.shape_cast %41 : vector<128xf32> to vector<1x128xf32>
    %cst_44 = arith.constant 2.560000e+02 : f32
    %43 = vector.broadcast %cst_44 : f32 to vector<1x128xf32>
    %44 = arith.divf %42, %43 : vector<1x128xf32>
    %45 = arith.mulf %39, %39 : vector<1x128xf32>
    %46 = arith.subf %44, %45 : vector<1x128xf32>
    %47 = vector.broadcast %39 : vector<1x128xf32> to vector<256x128xf32>
    %48 = arith.subf %35, %47 : vector<256x128xf32>
    %cst_45 = arith.constant 9.99999974E-6 : f32
    %49 = vector.broadcast %cst_45 : f32 to vector<1x128xf32>
    %50 = arith.addf %46, %49 : vector<1x128xf32>
    %51 = math.rsqrt %50 : vector<1x128xf32>
    %52 = vector.broadcast %51 : vector<1x128xf32> to vector<256x128xf32>
    %53 = arith.mulf %48, %52 : vector<256x128xf32>
    %cst_46 = arith.constant 0.000000e+00 : f32
    %54 = vector.broadcast %cst_46 : f32 to vector<256x128xf32>
    %55 = arith.maximumf %53, %54 : vector<256x128xf32>
    %56 = vector.shape_cast %55 : vector<256x128xf32> to vector<16x16x128xf32>
    %c1_47 = arith.constant 1 : index
    %c1_48 = arith.constant 1 : index
    %c0_49 = arith.constant 0 : index
    %57 = vector.load %arg5[%c1_47, %c1_48, %c0_49] : memref<18x18x128xf32, #tpu.memory_space<vmem>>, vector<16x16x128xf32>
    tpu.vector_store %arg5[%c1_47, %c1_48, %c0_49], %56 {strides = array<i32>} : memref<18x18x128xf32, #tpu.memory_space<vmem>>, vector<16x16x128xf32>,
    %c0_50 = arith.constant 0 : index
    %c2_51 = arith.constant 2 : index
    %c0_52 = arith.constant 0 : index
    %58 = vector.load %arg5[%c0_50, %c2_51, %c0_52] : memref<18x18x128xf32, #tpu.memory_space<vmem>>, vector<18x1x128xf32>
    %c0_53 = arith.constant 0 : index
    %c0_54 = arith.constant 0 : index
    %c0_55 = arith.constant 0 : index
    %59 = vector.load %arg5[%c0_53, %c0_54, %c0_55] : memref<18x18x128xf32, #tpu.memory_space<vmem>>, vector<18x1x128xf32>
    tpu.vector_store %arg5[%c0_53, %c0_54, %c0_55], %58 {strides = array<i32>} : memref<18x18x128xf32, #tpu.memory_space<vmem>>, vector<18x1x128xf32>,
    %c0_56 = arith.constant 0 : index
    %c15_57 = arith.constant 15 : index
    %c0_58 = arith.constant 0 : index
    %60 = vector.load %arg5[%c0_56, %c15_57, %c0_58] : memref<18x18x128xf32, #tpu.memory_space<vmem>>, vector<18x1x128xf32>
    %c0_59 = arith.constant 0 : index
    %c17_60 = arith.constant 17 : index
    %c0_61 = arith.constant 0 : index
    %61 = vector.load %arg5[%c0_59, %c17_60, %c0_61] : memref<18x18x128xf32, #tpu.memory_space<vmem>>, vector<18x1x128xf32>
    tpu.vector_store %arg5[%c0_59, %c17_60, %c0_61], %60 {strides = array<i32>} : memref<18x18x128xf32, #tpu.memory_space<vmem>>, vector<18x1x128xf32>,
    %c2_62 = arith.constant 2 : index
    %c0_63 = arith.constant 0 : index
    %c0_64 = arith.constant 0 : index
    %62 = vector.load %arg5[%c2_62, %c0_63, %c0_64] : memref<18x18x128xf32, #tpu.memory_space<vmem>>, vector<1x18x128xf32>
    %c0_65 = arith.constant 0 : index
    %c0_66 = arith.constant 0 : index
    %c0_67 = arith.constant 0 : index
    %63 = vector.load %arg5[%c0_65, %c0_66, %c0_67] : memref<18x18x128xf32, #tpu.memory_space<vmem>>, vector<1x18x128xf32>
    tpu.vector_store %arg5[%c0_65, %c0_66, %c0_67], %62 {strides = array<i32>} : memref<18x18x128xf32, #tpu.memory_space<vmem>>, vector<1x18x128xf32>,
    %c15_68 = arith.constant 15 : index
    %c0_69 = arith.constant 0 : index
    %c0_70 = arith.constant 0 : index
    %64 = vector.load %arg5[%c15_68, %c0_69, %c0_70] : memref<18x18x128xf32, #tpu.memory_space<vmem>>, vector<1x18x128xf32>
    %c17_71 = arith.constant 17 : index
    %c0_72 = arith.constant 0 : index
    %c0_73 = arith.constant 0 : index
    %65 = vector.load %arg5[%c17_71, %c0_72, %c0_73] : memref<18x18x128xf32, #tpu.memory_space<vmem>>, vector<1x18x128xf32>
    tpu.vector_store %arg5[%c17_71, %c0_72, %c0_73], %64 {strides = array<i32>} : memref<18x18x128xf32, #tpu.memory_space<vmem>>, vector<1x18x128xf32>,
    %c0_74 = arith.constant 0 : index
    %c0_75 = arith.constant 0 : index
    %c0_76 = arith.constant 0 : index
    %66 = vector.load %arg5[%c0_74, %c0_75, %c0_76] : memref<18x18x128xf32, #tpu.memory_space<vmem>>, vector<18x18x128xf32>
    %67 = arith.truncf %66 : vector<18x18x128xf32> to vector<18x18x128xbf16>
    %68 = vector.extract_strided_slice %67 {offsets = [0, 0, 0], sizes = [18, 16, 128], strides = [1, 1, 1]} : vector<18x18x128xbf16> to vector<18x16x128xbf16>
    %69 = vector.extract_strided_slice %67 {offsets = [0, 1, 0], sizes = [18, 16, 128], strides = [1, 1, 1]} : vector<18x18x128xbf16> to vector<18x16x128xbf16>
    %70 = vector.extract_strided_slice %67 {offsets = [0, 2, 0], sizes = [18, 16, 128], strides = [1, 1, 1]} : vector<18x18x128xbf16> to vector<18x16x128xbf16>
    %71 = tpu.concatenate %68, %69, %70 in 2 : vector<18x16x128xbf16>, vector<18x16x128xbf16>, vector<18x16x128xbf16> -> vector<18x16x384xbf16>
    %cst_77 = arith.constant 0.000000e+00 : f32
    %72 = vector.broadcast %cst_77 : f32 to vector<256x128xf32>
    %73 = vector.extract_strided_slice %71 {offsets = [0, 0, 0], sizes = [16, 16, 384], strides = [1, 1, 1]} : vector<18x16x384xbf16> to vector<16x16x384xbf16>
    %74 = vector.shape_cast %73 : vector<16x16x384xbf16> to vector<256x384xbf16>
    %c0_78 = arith.constant 0 : index
    %c0_79 = arith.constant 0 : index
    %c0_80 = arith.constant 0 : index
    %75 = vector.load %arg3[%c0_78, %c0_79, %c0_80] : memref<3x384x128xbf16, #tpu.memory_space<vmem>>, vector<1x384x128xbf16>
    %76 = vector.shape_cast %75 : vector<1x384x128xbf16> to vector<384x128xbf16>
    %cst_81 = arith.constant dense<0.000000e+00> : vector<256x128xf32>
    %77 = tpu.matmul %74, %76, %cst_81 {dimension_numbers = #tpu.dot_dimension_numbers<[1], [0], [0], [1], [0, 0, 1, 1], [], []>} : vector<256x384xbf16>, vector<384x128xbf16>, vector<256x128xf32> -> vector<256x128xf32>
    %78 = arith.addf %72, %77 : vector<256x128xf32>
    %79 = vector.extract_strided_slice %71 {offsets = [1, 0, 0], sizes = [16, 16, 384], strides = [1, 1, 1]} : vector<18x16x384xbf16> to vector<16x16x384xbf16>
    %80 = vector.shape_cast %79 : vector<16x16x384xbf16> to vector<256x384xbf16>
    %c1_82 = arith.constant 1 : index
    %c0_83 = arith.constant 0 : index
    %c0_84 = arith.constant 0 : index
    %81 = vector.load %arg3[%c1_82, %c0_83, %c0_84] : memref<3x384x128xbf16, #tpu.memory_space<vmem>>, vector<1x384x128xbf16>
    %82 = vector.shape_cast %81 : vector<1x384x128xbf16> to vector<384x128xbf16>
    %cst_85 = arith.constant dense<0.000000e+00> : vector<256x128xf32>
    %83 = tpu.matmul %80, %82, %cst_85 {dimension_numbers = #tpu.dot_dimension_numbers<[1], [0], [0], [1], [0, 0, 1, 1], [], []>} : vector<256x384xbf16>, vector<384x128xbf16>, vector<256x128xf32> -> vector<256x128xf32>
    %84 = arith.addf %78, %83 : vector<256x128xf32>
    %85 = vector.extract_strided_slice %71 {offsets = [2, 0, 0], sizes = [16, 16, 384], strides = [1, 1, 1]} : vector<18x16x384xbf16> to vector<16x16x384xbf16>
    %86 = vector.shape_cast %85 : vector<16x16x384xbf16> to vector<256x384xbf16>
    %c2_86 = arith.constant 2 : index
    %c0_87 = arith.constant 0 : index
    %c0_88 = arith.constant 0 : index
    %87 = vector.load %arg3[%c2_86, %c0_87, %c0_88] : memref<3x384x128xbf16, #tpu.memory_space<vmem>>, vector<1x384x128xbf16>
    %88 = vector.shape_cast %87 : vector<1x384x128xbf16> to vector<384x128xbf16>
    %cst_89 = arith.constant dense<0.000000e+00> : vector<256x128xf32>
    %89 = tpu.matmul %86, %88, %cst_89 {dimension_numbers = #tpu.dot_dimension_numbers<[1], [0], [0], [1], [0, 0, 1, 1], [], []>} : vector<256x384xbf16>, vector<384x128xbf16>, vector<256x128xf32> -> vector<256x128xf32>
    %90 = arith.addf %84, %89 : vector<256x128xf32>
    %cst_90 = arith.constant dense<0.000000e+00> : vector<128xf32>
    %91 = vector.multi_reduction <add>, %90, %cst_90 [0] : vector<256x128xf32> to vector<128xf32>
    %92 = vector.shape_cast %91 : vector<128xf32> to vector<1x128xf32>
    %cst_91 = arith.constant 2.560000e+02 : f32
    %93 = vector.broadcast %cst_91 : f32 to vector<1x128xf32>
    %94 = arith.divf %92, %93 : vector<1x128xf32>
    %95 = arith.mulf %90, %90 : vector<256x128xf32>
    %cst_92 = arith.constant dense<0.000000e+00> : vector<128xf32>
    %96 = vector.multi_reduction <add>, %95, %cst_92 [0] : vector<256x128xf32> to vector<128xf32>
    %97 = vector.shape_cast %96 : vector<128xf32> to vector<1x128xf32>
    %cst_93 = arith.constant 2.560000e+02 : f32
    %98 = vector.broadcast %cst_93 : f32 to vector<1x128xf32>
    %99 = arith.divf %97, %98 : vector<1x128xf32>
    %100 = arith.mulf %94, %94 : vector<1x128xf32>
    %101 = arith.subf %99, %100 : vector<1x128xf32>
    %102 = vector.broadcast %94 : vector<1x128xf32> to vector<256x128xf32>
    %103 = arith.subf %90, %102 : vector<256x128xf32>
    %cst_94 = arith.constant 9.99999974E-6 : f32
    %104 = vector.broadcast %cst_94 : f32 to vector<1x128xf32>
    %105 = arith.addf %101, %104 : vector<1x128xf32>
    %106 = math.rsqrt %105 : vector<1x128xf32>
    %107 = vector.broadcast %106 : vector<1x128xf32> to vector<256x128xf32>
    %108 = arith.mulf %103, %107 : vector<256x128xf32>
    %109 = vector.shape_cast %108 : vector<256x128xf32> to vector<16x16x128xf32>
    %110 = arith.addf %1, %109 : vector<16x16x128xf32>
    %c0_95 = arith.constant 0 : index
    %c0_96 = arith.constant 0 : index
    %c0_97 = arith.constant 0 : index
    %c0_98 = arith.constant 0 : index
    %111 = vector.load %arg4[%c0_95, %c0_96, %c0_97, %c0_98] : memref<1x16x16x128xf32, #tpu.memory_space<vmem>>, vector<1x16x16x128xf32>
    %112 = vector.shape_cast %111 : vector<1x16x16x128xf32> to vector<16x16x128xf32>
    %113 = vector.shape_cast %110 : vector<16x16x128xf32> to vector<1x16x16x128xf32>
    tpu.vector_store %arg4[%c0_95, %c0_96, %c0_97, %c0_98], %113 {strides = array<i32>} : memref<1x16x16x128xf32, #tpu.memory_space<vmem>>, vector<1x16x16x128xf32>,
    return
  }
  func.func @transform_0(%arg0: i32) -> (i32, i32, i32, i32) {
    %c0_i32 = arith.constant 0 : i32
    %c0_i32_0 = arith.constant 0 : i32
    %c0_i32_1 = arith.constant 0 : i32
    %c0_i32_2 = arith.constant 0 : i32
    return %arg0, %c0_i32, %c0_i32_0, %c0_i32_1 : i32, i32, i32, i32
  }
  func.func @transform_1(%arg0: i32) -> (i32, i32, i32) {
    %c0_i32 = arith.constant 0 : i32
    %c0_i32_0 = arith.constant 0 : i32
    %c0_i32_1 = arith.constant 0 : i32
    %c0_i32_2 = arith.constant 0 : i32
    return %c0_i32, %c0_i32_0, %c0_i32_1 : i32, i32, i32
  }
  func.func @transform_2(%arg0: i32) -> (i32, i32, i32) {
    %c0_i32 = arith.constant 0 : i32
    %c0_i32_0 = arith.constant 0 : i32
    %c0_i32_1 = arith.constant 0 : i32
    %c0_i32_2 = arith.constant 0 : i32
    return %c0_i32, %c0_i32_0, %c0_i32_1 : i32, i32, i32
  }
  func.func @transform_3(%arg0: i32) -> (i32, i32, i32, i32) {
    %c0_i32 = arith.constant 0 : i32
    %c0_i32_0 = arith.constant 0 : i32
    %c0_i32_1 = arith.constant 0 : i32
    %c0_i32_2 = arith.constant 0 : i32
    return %arg0, %c0_i32, %c0_i32_0, %c0_i32_1 : i32, i32, i32, i32
  }
}

</mosaic_0001>

<bundles_post_ra>
// kernel: tpu_custom_call.1
= control target key start
LH: loop header
LB: loop body
LE: loop exit
PB: predicated region body
PF: predicated region fallthrough
CT: control target
= control target key end

     0   :  { %8 = vsyncpa [#allocation4], 0  ;;  %s9365_s0 = inlined_call_operand.hbm [shape: f32[2,16,16,128], index: 0, kind: input, shape index: {}]   ;;  %s9366_s1 = inlined_call_operand.hbm [shape: bf16[3,384,128], index: 1, kind: input, shape index: {}]   ;;  %s9367_s2 = inlined_call_operand.hbm [shape: bf16[3,384,128], index: 2, kind: input, shape index: {}]   ;;  %s9368_s3 = inlined_call_operand.hbm [shape: f32[2,16,16,128], index: 3, kind: output, shape index: {}]  }
   0x1   :  { %10 = vsyncpa [#allocation4 + $0x1], 0 }
   0x2   :  { %11 = vsyncpa [#allocation7], 0 }
   0x3   :  { %12 = vsyncpa [#allocation5], 0 }
   0x4   :  { %14 = vsyncpa [#allocation5 + $0x1], 0  ;;  %s7057_s12 = smov 0   ;;  %s7059_s13 = smov 0  }
   0x5   :  { %s7061_s14 = smov 0   ;;  %s7063_s15 = smov 0  }
   0x6 LB: > { %s7078_s16 = sadd.s32 4294967295, %s7025_s15   ;;  %s5060_s17 = sadd.s32 4294967294, %s7025_s15   ;;  %s7025_s15 = sphi %s7063_s15, %s9546_s15   ;;  %s7021_s14 = sphi %s7061_s14, %s9545_s14   ;;  %s7017_s13 = sphi %s7059_s13, %s9544_s13   ;;  %s7013_s12 = sphi %s7057_s12, %s9543_s12  }
   0x7   : > { %p40_p0 = scmp.ne.s32.totalorder %s7017_s13, %s7013_s12  ;;  %p9369_p1 = scmp.eq.s32.totalorder %s7078_s16, 0 }
   0x8   : > { %p112_p3 = scmp.eq.s32.totalorder %s5060_s17, 1  ;;  %p5061_p5 = scmp.ge.s32.totalorder %s7025_s15, 1 }
   0x9   : > { %p7087_p4 = por %p9369_p1, %p40_p0  ;;  %p119_p7 = scmp.lt.s32.totalorder %s7025_s15, 3 }
   0xa   : > { %p7092_p6 = por %p112_p3, %p40_p0  ;;  %s7027_s21 = smov [#allocation6]  }
   0xb   : > { %s9415_s18 = scalar_select %p7087_p4, 1, 0 }
   0xc   : > { %s9416_s19 = scalar_select %p7092_p6, 1, 0 }
   0xd   : > { %p7097_p8 = pnand %p5061_p5, %p119_p7  ;;  %s131_s22 = sshll.u32 %s7027_s21, 4  ;;  %s7101_s22 = int_to_ptr.vmem [resolvable:$true] %s131_s22 }
   0xe   : > { %s7028_s24 = smov [#allocation8]   ;;  %s6869_s28 = scalar_lea.hbm %s9366_s1, 9216 }
   0xf   : > { %p6660_p9 = pneg %p7097_p8  ;;  %s144_s25 = sshll.u32 %s7028_s24, 4  ;;  %s7112_s25 = int_to_ptr.vmem [resolvable:$true] %s144_s25 }
  0x10   : > { %p6870_p12 = scmp.ne.s32.totalorder %s9366_s1, %s6869_s28  ;;  %p6876_p5 = scmp.lt.u32.totalorder %s6869_s28, %s9366_s1 }
  0x11   : > { %p7108_p11 = pnand %p6660_p9, %p9369_p1 }
  0x13   : > { %p6871_p13 = pneg %p7108_p11 }
  0x15   : > { %p6872_p0 = pnand %p6871_p13, %p6870_p12 }
  0x17   : > { %p6873_p3 = pneg %p6872_p0 }
  0x19   : > { %p6878_p7 = pnand %p6876_p5, %p6873_p3 }
  0x1b   : > { %6881 = shalt.err (!%p6878_p7)
}
  0x1c   : > { %s6882_s6 = scalar_lea.vmem %s7101_s22, 9216  ;;  %p6890_p2 = scmp.lt.s32.totalorder %s7101_s22, %s7101_s22 }
  0x1d   : > { %p6883_p9 = scmp.ne.s32.totalorder %s7101_s22, %s6882_s6  ;;  %p6891_p12 = scmp.lt.s32.totalorder %s6882_s6, %s6882_s6 }
  0x1f   : > { %p6885_p10 = pnand %p6883_p9, %p6871_p13  ;;  %p6892_p0 = por %p6891_p12, %p6890_p2 }
  0x21   : > { %p6886_p1 = pneg %p6885_p10 }
  0x23   : > { %p6893_p6 = pnand %p6892_p0, %p6886_p1 }
  0x25   : > { %6896 = shalt.err (!%p6893_p6)
}
  0x26   : > { %s7029_s7 = smov 64   ;;  %s7030_s8 = smov 4  }
  0x27   : > { %6663 = dma.hbm_to_vmem [thread:$0]  (!%p7108_p11), %s9366_s1, 9216, %s7101_s22, [#allocation7], %s7029_s7, %s7029_s7, %s7030_s8  }
  0x28   : > { %s6897_s21 = scalar_lea.hbm %s9367_s2, 9216 }
  0x29   : > { %p6898_p2 = scmp.ne.s32.totalorder %s9367_s2, %s6897_s21  ;;  %p6904_p10 = scmp.lt.u32.totalorder %s6897_s21, %s9367_s2 }
  0x2b   : > { %p6900_p1 = pnand %p6898_p2, %p6871_p13 }
  0x2d   : > { %p6901_p6 = pneg %p6900_p1 }
  0x2f   : > { %p6906_p3 = pnand %p6904_p10, %p6901_p6 }
  0x31   : > { %6909 = shalt.err (!%p6906_p3)
}
  0x32   : > { %s6910_s22 = scalar_lea.vmem %s7112_s25, 9216  ;;  %p6918_p12 = scmp.lt.s32.totalorder %s7112_s25, %s7112_s25 }
  0x33   : > { %p6911_p5 = scmp.ne.s32.totalorder %s7112_s25, %s6910_s22  ;;  %p6919_p0 = scmp.lt.s32.totalorder %s6910_s22, %s6910_s22 }
  0x35   : > { %p6913_p7 = pnand %p6911_p5, %p6871_p13  ;;  %p6920_p2 = por %p6919_p0, %p6918_p12 }
  0x37   : > { %p6914_p9 = pneg %p6913_p7 }
  0x39   : > { %p6921_p1 = pnand %p6920_p2, %p6914_p9 }
  0x3b   : > { %6924 = shalt.err (!%p6921_p1)
}
  0x3c   : > { %6666 = dma.hbm_to_vmem [thread:$0]  (!%p7108_p11), %s9367_s2, 9216, %s7112_s25, [#allocation7], %s7029_s7, %s7029_s7, %s7030_s8  }
  0x3d   : > { %s7167_s4 = sadd.s32 1, %s7025_s15   ;;  %s27_s23 = sadd.s32 1, %s7021_s14 }
  0x3e   : > { %s24_s5 = ssub.s32 %s7025_s15, %s7167_s4  ;;  %p34_p13 = scmp.ne.s32.totalorder %s7021_s14, %s7017_s13 }
  0x3f   : > { %p25_p6 = scmp.eq.s32.totalorder %s24_s5, 0  ;;  %p35_p10 = scmp.eq.s32.totalorder %s7025_s15, 0 }
  0x40   : > { %p9419_p3 = scmp.eq.s32.totalorder %s7078_s16, 1  ;;  %p6677_p7 = scmp.lt.s32.totalorder %s7025_s15, 2 }
  0x41   : > { %s7183_s9 = scalar_select %p25_p6, %s7021_s14, %s27_s23  }
  0x42   : > { %p7177_p5 = por %p9419_p3, %p34_p13  ;;  %p36_p9 = por %p35_p10, %p34_p13 }
  0x43   : > { %s158_s10 = sand.u32 1, %s7021_s14   ;;  %s5222_s25 = sshll.u32 %s7025_s15, 12 }
  0x44   : > { %s9420_s6 = scalar_select %p7177_p5, 1, 0 }
  0x45   : > { %s5065_s11 = sshll.u32 %s158_s10, 8  ;;  %s7190_s17 = scalar_lea.hbm %s9365_s0, %s5222_s25 }
  0x46   : > { %s162_s21 = scalar_lea.vmem [#allocation3], %s5065_s11  ;;  %p7194_p11 = pnand %p6677_p7, %p36_p9 }
  0x47   : > { %s169_s24 = sshll.u32 %s162_s21, 4  ;;  %s7198_s27 = scalar_lea.sflag [#allocation4], %s158_s10  ;;  %s7192_s24 = int_to_ptr.vmem [resolvable:$true] %s169_s24 }
  0x48   : > { %s6925_s28 = scalar_lea.hbm %s7190_s17, 4096  ;;  %p6927_p0 = pneg %p7194_p11 }
  0x49   : > { %p6926_p12 = scmp.ne.s32.totalorder %s7190_s17, %s6925_s28  ;;  %s6930_s30 = scalar_lea.hbm %s9365_s0, 8192 }
  0x4a   : > { %p6931_p13 = scmp.lt.u32.totalorder %s7190_s17, %s9365_s0  ;;  %p6932_p6 = scmp.lt.u32.totalorder %s6930_s30, %s6925_s28 }
  0x4b   : > { %p6928_p2 = pnand %p6927_p0, %p6926_p12  ;;  %p6934_p3 = scmp.lt.u32.totalorder %s6925_s28, %s7190_s17 }
  0x4c   : > { %p6933_p10 = por %p6932_p6, %p6931_p13 }
  0x4d   : > { %p6929_p1 = pneg %p6928_p2 }
  0x4e   : > { %p6935_p7 = por %p6934_p3, %p6933_p10 }
  0x50   : > { %p6936_p9 = pnand %p6935_p7, %p6929_p1 }
  0x52   : > { %6939 = shalt.err (!%p6936_p9)
}
  0x53   : > { %s6940_s10 = scalar_lea.vmem %s7192_s24, 4096  ;;  %s7031_s11 = smov [#allocation3]  }
  0x54   : > { %p6941_p12 = scmp.ne.s32.totalorder %s7192_s24, %s6940_s10  ;;  %s6945_s25 = sshll.u32 %s7031_s11, 4  ;;  %s6946_s25 = int_to_ptr.vmem [resolvable:$false] %s6945_s25 }
  0x55   : > { %s6947_s7 = scalar_lea.vmem %s6946_s25, 8192  ;;  %p6948_p4 = scmp.lt.s32.totalorder %s7192_s24, %s6946_s25 }
  0x56   : > { %p6943_p2 = pnand %p6941_p12, %p6927_p0  ;;  %p6949_p13 = scmp.lt.s32.totalorder %s6947_s7, %s6940_s10 }
  0x58   : > { %p6944_p5 = pneg %p6943_p2  ;;  %p6950_p6 = por %p6949_p13, %p6948_p4 }
  0x5a   : > { %p6951_p10 = pnand %p6950_p6, %p6944_p5 }
  0x5c   : > { %6954 = shalt.err (!%p6951_p10)
}
  0x5d   : > { %s7032_s8 = smov 128   ;;  %s7033_s21 = smov 8  }
  0x5e   : > { %6670 = dma.hbm_to_vmem [thread:$0]  (!%p7194_p11), %s7190_s17, 4096, %s7192_s24, %s7198_s27, %s7032_s8, %s7032_s8, %s7033_s21  }
  0x5f   : > { %181 = sbr.rel (%p7097_p8) target bundleno = 1366 (0x556), region = 32 }
  0x66   : > { %s7229_s28 = sand.u32 1, %s7017_s13   ;;  %p9422_p4 = scmp.ne.s32.totalorder %s9415_s18, 0 }
  0x67   : > { %s5069_s22 = sshll.u32 %s7229_s28, 8  ;;  %s184_s29 = scalar_lea.sflag [#allocation4], %s7229_s28 }
  0x68   : > { %s7235_s30 = scalar_lea.vmem [#allocation3], %s5069_s22 }
  0x69   : > { %7000 = dma.done.wait (%p9422_p4), %s184_s29, 4096  }
  0x6a   : > { %7002 = vsyncadd (%p9422_p4), %s184_s29, 4294963200  ;;  %p9423_p5 = scmp.eq.s32.totalorder %s7078_s16, 0 }
  0x6c   : > { %7004 = dma.done.wait (%p9423_p5), [#allocation7], 18432   ;;  %p9424_p8 = pmov %p9423_p5 }
  0x6d   : > { %v6721_v0 = vld [vmem:[#allocation6 + $0x100] sm:$0xff]   ;;  %v6725_v4 = vld [vmem:[#allocation6 + $0x108] sm:$0xff]   ;;  %v6729_v8 = vld [vmem:[#allocation6 + $0x110] sm:$0xff]   ;;  %vm461_vm0 = vsmask.f32 7424  ;;  %vm732_vm1 = vcmask 1046528  }
  0x6e   : > { %7006 = vsyncadd (%p9424_p8), [#allocation7], 4294948864  ;;  %v6722_v1 = vld [vmem:[#allocation6 + $0x40] sm:$0xff]   ;;  %5224 = vmatprep.subr.bf16.mxu0 %v6721_v0  ;;  %v6726_v5 = vld [vmem:[#allocation6 + $0x48] sm:$0xff]   ;;  %s9249_s18 = scalar_lea.vmem [#allocation9], %s5069_s22  ;;  %s5223_s20 = sshll.u32 %s7078_s16, 12 }
  0x6f   : > { %v6723_v2 = vld [vmem:[#allocation6 + $0xc0] sm:$0xff]   ;;  %5360 = vmatprep.subr.bf16.mxu1 %v6722_v1  ;;  %v6727_v6 = vld [vmem:[#allocation6 + $0xc8] sm:$0xff]   ;;  %v6730_v9 = vld [vmem:[#allocation6 + $0x50] sm:$0xff]   ;;  %s4968_s17 = sshll.u32 %s9249_s18, 4  ;;  %s9303_s26 = scalar_lea.hbm %s9368_s3, %s5223_s20  ;;  %s9305_s17 = int_to_ptr.vmem [resolvable:$true] %s4968_s17 }
  0x70   : > { %v6724_v3 = vld [vmem:[#allocation6] sm:$0xff]   ;;  %5225 = vmatpush3.bf16.msra.mxu0 %v6723_v2  ;;  %v6728_v7 = vld [vmem:[#allocation6 + $0x8] sm:$0xff]   ;;  %v6731_v10 = vld [vmem:[#allocation6 + $0xd0] sm:$0xff]   ;;  %s4955_s27 = scalar_lea.sflag [#allocation5], %s7229_s28  ;;  %s6955_s23 = scalar_lea.vmem %s9305_s17, 4096 }
  0x71   : > { %5361 = vmatpush3.bf16.msra.mxu1 %v6724_v3  ;;  %5226 = vmatprep.subr.bf16.mxu0 %v6725_v4  ;;  %v6732_v11 = vld [vmem:[#allocation6 + $0x10] sm:$0xff]   ;;  %v6733_v12 = vld [vmem:[#allocation6 + $0x118] sm:$0xff]   ;;  %v6737_v16 = vld [vmem:[#allocation6 + $0x120] sm:$0xff]   ;;  %p6956_p11 = scmp.ne.s32.totalorder %s9305_s17, %s6955_s23  ;;  %p9540_p0 = scmp.ne.s32.totalorder %s9420_s6, 0 }
  0x72   : > { %5362 = vmatprep.subr.bf16.mxu1 %v6726_v5  ;;  %v6734_v13 = vld [vmem:[#allocation6 + $0x58] sm:$0xff]   ;;  %v6738_v17 = vld [vmem:[#allocation6 + $0x60] sm:$0xff]   ;;  %v6741_v20 = vld [vmem:[#allocation6 + $0x128] sm:$0xff]   ;;  %s7034_s5 = smov [#allocation9]  }
  0x73   : > { %v6735_v14 = vld [vmem:[#allocation6 + $0xd8] sm:$0xff]   ;;  %v6739_v18 = vld [vmem:[#allocation6 + $0xe0] sm:$0xff]   ;;  %v6742_v21 = vld [vmem:[#allocation6 + $0x68] sm:$0xff]   ;;  %p6957_p1 = pnand %p6956_p11, %p9540_p0  ;;  %s6959_s10 = sshll.u32 %s7034_s5, 4  ;;  %s6960_s10 = int_to_ptr.vmem [resolvable:$false] %s6959_s10 }
  0x74   : > { %5227 = vmatpush3.bf16.msra.mxu0 %v6727_v6  ;;  %v6736_v15 = vld [vmem:[#allocation6 + $0x18] sm:$0xff]   ;;  %v6740_v19 = vld [vmem:[#allocation6 + $0x20] sm:$0xff]   ;;  %v6743_v22 = vld [vmem:[#allocation6 + $0xe8] sm:$0xff]   ;;  %s6961_s11 = scalar_lea.vmem %s6960_s10, 8192  ;;  %p6962_p7 = scmp.lt.s32.totalorder %s9305_s17, %s6960_s10 }
  0x75   : > { %5363 = vmatpush3.bf16.msra.mxu1 %v6728_v7  ;;  %5228 = vmatprep.subr.bf16.mxu0 %v6729_v8  ;;  %v6744_v23 = vld [vmem:[#allocation6 + $0x28] sm:$0xff]   ;;  %v6745_v24 = vld [vmem:[#allocation6 + $0x130] sm:$0xff]   ;;  %v6749_v28 = vld [vmem:[#allocation6 + $0x138] sm:$0xff]   ;;  %p6958_p3 = pneg %p6957_p1  ;;  %p6963_p9 = scmp.lt.s32.totalorder %s6961_s11, %s6955_s23 }
  0x76   : > { %5364 = vmatprep.subr.bf16.mxu1 %v6730_v9  ;;  %v6746_v25 = vld [vmem:[#allocation6 + $0x70] sm:$0xff]   ;;  %v6750_v29 = vld [vmem:[#allocation6 + $0x78] sm:$0xff]   ;;  %v7246_v32 = vld [vmem:[%s7235_s30] sm:$0xff] }
  0x77   : > { %v6747_v26 = vld [vmem:[#allocation6 + $0xf0] sm:$0xff]   ;;  %v6751_v30 = vld [vmem:[#allocation6 + $0xf8] sm:$0xff]   ;;  %9425 = vst [vmem:[#allocation13_spill] sm:$0xff] %v7246_v32  ;;  %v7249_v33 = vld [vmem:[%s7235_s30 + $0x8] sm:$0xff]  ;;  %p6964_p12 = por %p6963_p9, %p6962_p7 }
  0x78   : > { %5229 = vmatpush3.bf16.msra.mxu0 %v6731_v10  ;;  %v6748_v27 = vld [vmem:[#allocation6 + $0x30] sm:$0xff]   ;;  %v6752_v31 = vld [vmem:[#allocation6 + $0x38] sm:$0xff]   ;;  %9426 = vst [vmem:[#allocation14_spill] sm:$0xff] %v7249_v33  ;;  %252 = vst [vmem:[#allocation2 + $0x19] sm:$0xff] %v7246_v32 }
  0x79   : > { %5365 = vmatpush3.bf16.msra.mxu1 %v6732_v11  ;;  %5230 = vmatprep.subr.bf16.mxu0 %v6733_v12  ;;  %v7252_v34 = vld [vmem:[%s7235_s30 + $0x10] sm:$0xff]  ;;  %253 = vst [vmem:[#allocation2 + $0x21] sm:$0xff] %v7249_v33  ;;  %v7257_v35 = vld [vmem:[%s7235_s30 + $0x18] sm:$0xff]  ;;  %v7261_v37 = vld [vmem:[#allocation6 + $0x140] sm:$0xff]   ;;  %p6965_p2 = pnand %p6964_p12, %p6958_p3 }
  0x7a   : > { %5366 = vmatprep.subr.bf16.mxu1 %v6734_v13  ;;  %9427 = vst [vmem:[#allocation15_spill] sm:$0xff] %v7252_v34  ;;  %9428 = vst [vmem:[#allocation16_spill] sm:$0xff] %v7257_v35  ;;  %v320_v36 = vld [vmem:[#allocation2 + $0xf] sm:$0x1]  ;;  %v7264_v38 = vld [vmem:[%s7235_s30 + $0x20] sm:$0xff] }
  0x7b   : > { %254 = vst [vmem:[#allocation2 + $0x31] sm:$0xff] %v7252_v34  ;;  %255 = vst [vmem:[#allocation2 + $0x39] sm:$0xff] %v7257_v35  ;;  %v7267_v39 = vld [vmem:[%s7235_s30 + $0x28] sm:$0xff]  ;;  %v7273_v40 = vld [vmem:[%s7235_s30 + $0x30] sm:$0xff] }
  0x7c   : > { %5231 = vmatpush3.bf16.msra.mxu0 %v6735_v14  ;;  %338 = vst [vmem:[#allocation2 + $0x11] sm:$0x1] %v320_v36  ;;  %9429 = vst [vmem:[#allocation17_spill] sm:$0xff] %v7264_v38  ;;  %v7276_v41 = vld [vmem:[%s7235_s30 + $0x38] sm:$0xff]  ;;  %v7280_v42 = vld [vmem:[%s7235_s30 + $0x40] sm:$0xff] }
  0x7d   : > { %5367 = vmatpush3.bf16.msra.mxu1 %v6736_v15  ;;  %5232 = vmatprep.subr.bf16.mxu0 %v6737_v16  ;;  %9430 = vst [vmem:[#allocation18_spill] sm:$0xff] %v7267_v39  ;;  %256 = vst [vmem:[#allocation2 + $0x49] sm:$0xff] %v7264_v38  ;;  %v7283_v43 = vld [vmem:[%s7235_s30 + $0x48] sm:$0xff]  ;;  %v7289_v44 = vld [vmem:[%s7235_s30 + $0x50] sm:$0xff] }
  0x7e   : > { %5368 = vmatprep.subr.bf16.mxu1 %v6738_v17  ;;  %257 = vst [vmem:[#allocation2 + $0x51] sm:$0xff] %v7267_v39  ;;  %9431 = vst [vmem:[#allocation19_spill] sm:$0xff] %v7273_v40  ;;  %v7292_v45 = vld [vmem:[%s7235_s30 + $0x58] sm:$0xff]  ;;  %v7295_v46 = vld [vmem:[%s7235_s30 + $0x60] sm:$0xff] }
  0x7f   : > { %9432 = vst [vmem:[#allocation20_spill] sm:$0xff] %v7276_v41  ;;  %258 = vst [vmem:[#allocation2 + $0x61] sm:$0xff] %v7273_v40  ;;  %v285_v47 = vld [vmem:[#allocation2 + $0x1a] sm:$0x1]  ;;  %v7305_v56 = vld [vmem:[%s7235_s30 + $0x70] sm:$0xff] }
  0x80   : > { %5233 = vmatpush3.bf16.msra.mxu0 %v6739_v18  ;;  %9433 = vst [vmem:[#allocation21_spill] sm:$0xff] %v7280_v42  ;;  %9434 = vst [vmem:[#allocation22_spill] sm:$0xff] %v7283_v43  ;;  %v321_v48 = vld [vmem:[#allocation2 + $0x27] sm:$0x1]  ;;  %v7301_v52 = vld [vmem:[%s7235_s30 + $0x68] sm:$0xff] }
  0x81   : > { %5369 = vmatpush3.bf16.msra.mxu1 %v6740_v19  ;;  %5234 = vmatprep.subr.bf16.mxu0 %v6741_v20  ;;  %259 = vst [vmem:[#allocation2 + $0x69] sm:$0xff] %v7276_v41  ;;  %260 = vst [vmem:[#allocation2 + $0x79] sm:$0xff] %v7280_v42  ;;  %v375_v59 = vld [vmem:[#allocation2 + $0x20] sm:$0xff]  ;;  %v7309_v61 = vld [vmem:[%s7235_s30 + $0x78] sm:$0xff] }
  0x82   : > { %5370 = vmatprep.subr.bf16.mxu1 %v6742_v21  ;;  %261 = vst [vmem:[#allocation2 + $0x81] sm:$0xff] %v7283_v43  ;;  %9435 = vst [vmem:[#allocation23_spill] sm:$0xff] %v7289_v44  ;;  %v286_v49 = vld [vmem:[#allocation2 + $0x32] sm:$0x1]  ;;  %v322_v50 = vld [vmem:[#allocation2 + $0x3f] sm:$0x1] }
  0x83   : > { %9436 = vst [vmem:[#allocation24_spill] sm:$0xff] %v7292_v45  ;;  %9437 = vst [vmem:[#allocation25_spill] sm:$0xff] %v7295_v46  ;;  %v358_v51 = vld [vmem:[#allocation2 + $0x38] sm:$0xff]  ;;  %v7513_v43 = vld [vmem:[#allocation6 + $0x200] sm:$0xff]  }
  0x84   : > { %5235 = vmatpush3.bf16.msra.mxu0 %v6743_v22  ;;  %262 = vst [vmem:[#allocation2 + $0x91] sm:$0xff] %v7289_v44  ;;  %263 = vst [vmem:[#allocation2 + $0x99] sm:$0xff] %v7292_v45  ;;  %v287_v53 = vld [vmem:[#allocation2 + $0x4a] sm:$0x1]  ;;  %v7330_v22 = vld [vmem:[%s7235_s30 + $0x80] sm:$0xff] }
  0x85   : > { %5371 = vmatpush3.bf16.msra.mxu1 %v6744_v23  ;;  %5236 = vmatprep.subr.bf16.mxu0 %v6745_v24  ;;  %264 = vst [vmem:[#allocation2 + $0xa9] sm:$0xff] %v7295_v46  ;;  %303 = vst [vmem:[#allocation2 + $0x18] sm:$0x1] %v285_v47  ;;  %v323_v54 = vld [vmem:[#allocation2 + $0x57] sm:$0x1]  ;;  %v6754_v36 = vld [vmem:[#allocation6 + $0x148] sm:$0xff]  }
  0x86   : > { %5372 = vmatprep.subr.bf16.mxu1 %v6746_v25  ;;  %339 = vst [vmem:[#allocation2 + $0x29] sm:$0x1] %v321_v48  ;;  %304 = vst [vmem:[#allocation2 + $0x30] sm:$0x1] %v286_v49  ;;  %v288_v55 = vld [vmem:[#allocation2 + $0x62] sm:$0x1] }
  0x87   : > { %340 = vst [vmem:[#allocation2 + $0x41] sm:$0x1] %v322_v50  ;;  %361 = vst [vmem:[#allocation2 + $0x8] sm:$0xff] %v358_v51  ;;  %v381_v7 = vld [vmem:[#allocation2 + $0x50] sm:$0xff] }
  0x88   : > { %5237 = vmatpush3.bf16.msra.mxu0 %v6747_v26  ;;  %9438 = vst [vmem:[#allocation26_spill] sm:$0xff] %v7301_v52  ;;  %265 = vst [vmem:[#allocation2 + $0xb1] sm:$0xff] %v7301_v52  ;;  %v324_v57 = vld [vmem:[#allocation2 + $0x6f] sm:$0x1]  ;;  %v289_v58 = vld [vmem:[#allocation2 + $0x7a] sm:$0x1] }
  0x89   : > { %5373 = vmatpush3.bf16.msra.mxu1 %v6748_v27  ;;  %5238 = vmatprep.subr.bf16.mxu0 %v6749_v28  ;;  %305 = vst [vmem:[#allocation2 + $0x48] sm:$0x1] %v287_v53  ;;  %341 = vst [vmem:[#allocation2 + $0x59] sm:$0x1] %v323_v54  ;;  %v325_v60 = vld [vmem:[#allocation2 + $0x87] sm:$0x1] }
  0x8a   : > { %5374 = vmatprep.subr.bf16.mxu1 %v6750_v29  ;;  %9439 = vst [vmem:[#allocation27_spill] sm:$0xff] %v7305_v56  ;;  %306 = vst [vmem:[#allocation2 + $0x60] sm:$0x1] %v288_v55  ;;  %v384_v29 = vld [vmem:[#allocation2 + $0x68] sm:$0xff] }
  0x8b   : > { %266 = vst [vmem:[#allocation2 + $0xc1] sm:$0xff] %v7305_v56  ;;  %342 = vst [vmem:[#allocation2 + $0x71] sm:$0x1] %v324_v57  ;;  %v290_v62 = vld [vmem:[#allocation2 + $0x92] sm:$0x1] }
  0x8c   : > { %5239 = vmatpush3.bf16.msra.mxu0 %v6751_v30  ;;  %307 = vst [vmem:[#allocation2 + $0x78] sm:$0x1] %v289_v58  ;;  %9440 = vst [vmem:[#allocation28_spill] sm:$0xff] %v7309_v61  ;;  %v326_v63 = vld [vmem:[#allocation2 + $0x9f] sm:$0x1] }
  0x8d   : > { %5375 = vmatpush3.bf16.msra.mxu1 %v6752_v31  ;;  %6040 = vmatprep.subr.bf16.mxu0 %v7261_v37  ;;  %343 = vst [vmem:[#allocation2 + $0x89] sm:$0x1] %v325_v60  ;;  %267 = vst [vmem:[#allocation2 + $0xc9] sm:$0xff] %v7309_v61  ;;  %v374_v0 = vld [vmem:[#allocation2 + $0x18] sm:$0xff]  ;;  %v376_v1 = vld [vmem:[#allocation2 + $0x28] sm:$0x3] }
  0x8e   : > { %308 = vst [vmem:[#allocation2 + $0x90] sm:$0x1] %v290_v62  ;;  %344 = vst [vmem:[#allocation2 + $0xa1] sm:$0x1] %v326_v63  ;;  %v291_v2 = vld [vmem:[#allocation2 + $0xaa] sm:$0x1]  ;;  %v7312_v3 = vpack.c.bf16 %v375_v59, %v374_v0  ;;  %v7314_v4 = vpack.c.bf16 %v376_v1, %v376_v1 }
  0x8f   : > { %v357_v5 = vld [vmem:[#allocation2 + $0x30] sm:$0xff]  ;;  %v359_v6 = vld [vmem:[#allocation2 + $0x40] sm:$0x3]  ;;  %309 = vst [vmem:[#allocation2 + $0xa8] sm:$0x1] %v291_v2  ;;  %9441 = vst [vmem:[#allocation29_spill] sm:$0xff] %v7330_v22 }
  0x90   : > { %360 = vst [vmem:[#allocation2] sm:$0xff] %v357_v5  ;;  %362 = vst [vmem:[#allocation2 + $0x10] sm:$0x3] %v359_v6  ;;  %v7316_v8 = vpack.c.bf16 %v358_v51, %v357_v5  ;;  %v379_v9 = vld [vmem:[#allocation2 + $0x40] sm:$0x3]  ;;  %v475_v11 = vshrl.u32 %v7312_v3, 16 }
  0x91   : > { %v327_v10 = vld [vmem:[#allocation2 + $0xb7] sm:$0x1]  ;;  %v477_v12 = vshll.u32 %v7312_v3, 16  ;;  %v482_v13 = vshll.u32 %v7314_v4, 16  ;;  %v7321_v14 = vpack.c.bf16 %v379_v9, %v379_v9  ;;  %v380_v15 = vld [vmem:[#allocation2 + $0x48] sm:$0xff]  ;;  %268 = vst [vmem:[#allocation2 + $0xd9] sm:$0xff] %v7330_v22 }
  0x92   : > { %v382_v16 = vld [vmem:[#allocation2 + $0x58] sm:$0x3]  ;;  %345 = vst [vmem:[#allocation2 + $0xb9] sm:$0x1] %v327_v10  ;;  %v463_v17 = vshrl.u32 %v7316_v8, 16  ;;  %v465_v18 = vshll.u32 %v7316_v8, 16  ;;  %v7325_v19 = vpack.c.bf16 %v381_v7, %v380_v15 }
  0x93   : > { %v7327_v20 = vpack.c.bf16 %v382_v16, %v382_v16  ;;  %v292_v21 = vld [vmem:[#allocation2 + $0xc2] sm:$0x1]  ;;  %v479_v23 = vrot.slane %v477_v12, 1  ;;  %v484_v24 = vrot.slane %v482_v13, 1  ;;  %v494_v25 = vshll.u32 %v7321_v14, 16  ;;  %v7341_v58 = vld [vmem:[%s7235_s30 + $0x88] sm:$0xff] }
  0x94   : > { %310 = vst [vmem:[#allocation2 + $0xc0] sm:$0x1] %v292_v21  ;;  %v467_v26 = vrot.slane %v465_v18, 1  ;;  %v501_v27 = vshll.u32 %v7325_v19, 16  ;;  %v383_v28 = vld [vmem:[#allocation2 + $0x60] sm:$0xff]  ;;  %v499_v49 = vshrl.u32 %v7325_v19, 16 }
  0x95   : > { %v480_v30 = vor.u32 %v479_v23, %v475_v11  ;;  %v496_v31 = vrot.slane %v494_v25, 1  ;;  %v2658_v48 = vld [vmem:[#allocation2 + $0xf] sm:$0x1]  ;;  %v506_v50 = vshll.u32 %v7327_v20, 16  ;;  %v7338_v57 = vpack.c.bf16 %v384_v29, %v383_v28  ;;  %9442 = vst [vmem:[#allocation30_spill] sm:$0xff] %v7341_v58  ;;  %269 = vst [vmem:[#allocation2 + $0xe1] sm:$0xff] %v7341_v58 }
  0x96   : > { %v468_v47 = vor.u32 %v467_v26, %v463_v17  ;;  %v328_v51 = vld [vmem:[#allocation2 + $0xcf] sm:$0x1]  ;;  %v503_v55 = vrot.slane %v501_v27, 1  ;;  %v385_v62 = vld [vmem:[#allocation2 + $0x70] sm:$0x3]  ;;  %v6755_v63 = vld [vmem:[#allocation6 + $0x150] sm:$0xff]  }
  0x97   : > { %v485_v53 = vsel %vm461_vm0, %v480_v30, %v484_v24  ;;  %v373_v54 = vld [vmem:[#allocation2 + $0x10] sm:$0x3]  ;;  %346 = vst [vmem:[#allocation2 + $0xd1] sm:$0x1] %v328_v51  ;;  %v386_v1 = vld [vmem:[#allocation2 + $0x78] sm:$0xff]  ;;  %v387_v2 = vld [vmem:[#allocation2 + $0x80] sm:$0xff]  ;;  %v7353_v9 = vpack.c.bf16 %v385_v62, %v385_v62 }
  0x98   : > { %1078 = vmatprep.mubr.bf16.mxu0 %v485_v53  ;;  %v7343_v59 = vpack.c.bf16 %v373_v54, %v373_v54  ;;  %2676 = vst [vmem:[#allocation2 + $0x11] sm:$0x1] %v2658_v48  ;;  %v7346_v60 = vsel %vm461_vm0, %v468_v47, %v496_v31  ;;  %v293_v5 = vld [vmem:[#allocation2 + $0xda] sm:$0x1]  ;;  %v504_v6 = vor.u32 %v503_v55, %v499_v49  ;;  %v508_v7 = vrot.slane %v506_v50, 1  ;;  %v6758_v11 = vld [vmem:[#allocation6 + $0x80] sm:$0xff]  }
  0x99   : > { %1079 = vmatmul.mubr.bf16.vlgmr.msra.gmra.mrb[0].mxu0 %v7312_v3  ;;  %v513_v10 = vshll.u32 %v7338_v57, 16  ;;  %311 = vst [vmem:[#allocation2 + $0xd8] sm:$0x1] %v293_v5  ;;  %v7357_v12 = vld [vmem:[%s7235_s30 + $0x90] sm:$0xff]  ;;  %v7364_v15 = vld [vmem:[%s7235_s30 + $0xa0] sm:$0xff]  ;;  %v7367_v16 = vld [vmem:[%s7235_s30 + $0xa8] sm:$0xff]  ;;  %6088 = vmatprep.subr.bf16.mxu1 %v6758_v11  ;;  %v7378_v26 = vpack.c.bf16 %v387_v2, %v386_v1 }
  0x9a   : > { %v470_v0 = vshll.u32 %v7343_v59, 16  ;;  %6041 = vmatpush3.bf16.msra.mxu0 %v7261_v37  ;;  %1086 = vmatprep.mubr.bf16.mxu0 %v7346_v60  ;;  %9443 = vst [vmem:[#allocation31_spill] sm:$0xff] %v7357_v12  ;;  %v7360_v37 = vld [vmem:[%s7235_s30 + $0x98] sm:$0xff]  ;;  %270 = vst [vmem:[#allocation2 + $0xf1] sm:$0xff] %v7357_v12  ;;  %v511_v18 = vshrl.u32 %v7338_v57, 16  ;;  %v7375_v23 = vsel %vm461_vm0, %v504_v6, %v508_v7  ;;  %v518_v25 = vshll.u32 %v7353_v9, 16 }
  0x9b   : > { %6042 = vmatprep.subr.bf16.mxu0 %v6754_v36  ;;  %9444 = vst [vmem:[#allocation32_spill] sm:$0xff] %v7360_v37  ;;  %9445 = vst [vmem:[#allocation33_spill] sm:$0xff] %v7364_v15  ;;  %v388_v21 = vld [vmem:[#allocation2 + $0x88] sm:$0x3]  ;;  %v515_v24 = vrot.slane %v513_v10, 1  ;;  %v7381_v29 = vld [vmem:[%s7235_s30 + $0xb0] sm:$0xff] }
  0x9c   : > { %v472_v13 = vrot.slane %v470_v0, 1  ;;  %9446 = vst [vmem:[#allocation34_spill] sm:$0xff] %v7367_v16  ;;  %271 = vst [vmem:[#allocation2 + $0xf9] sm:$0xff] %v7360_v37  ;;  %v6756_v27 = vld [vmem:[#allocation6 + $0x158] sm:$0xff]   ;;  %v329_v28 = vld [vmem:[#allocation2 + $0xe7] sm:$0x1] }
  0x9d   : > { %272 = vst [vmem:[#allocation2 + $0x109] sm:$0xff] %v7364_v15  ;;  %273 = vst [vmem:[#allocation2 + $0x111] sm:$0xff] %v7367_v16  ;;  %v6760_v30 = vld [vmem:[#allocation6 + $0x88] sm:$0xff]   ;;  %v7385_v31 = vld [vmem:[%s7235_s30 + $0xb8] sm:$0xff]  ;;  %v516_v51 = vor.u32 %v515_v24, %v511_v18  ;;  %v525_v54 = vshll.u32 %v7378_v26, 16  ;;  %v523_v18 = vshrl.u32 %v7378_v26, 16 }
  0x9e   : > { %v473_v17 = vsel %vm461_vm0, %v468_v47, %v472_v13  ;;  %6043 = vmatpush3.bf16.msra.mxu0 %v6754_v36  ;;  %9447 = vst [vmem:[#allocation35_spill] sm:$0xff] %v7375_v23  ;;  %9448 = vst [vmem:[#allocation36_spill] sm:$0xff] %v7381_v29  ;;  %v7389_v36 = vpack.c.bf16 %v388_v21, %v388_v21  ;;  %v7393_v47 = vld [vmem:[%s7235_s30 + $0xc0] sm:$0xff]  ;;  %v7396_v48 = vld [vmem:[%s7235_s30 + $0xc8] sm:$0xff]  ;;  %v737_v13 = vrot.slane %v7314_v4, 1 }
  0x9f   : > { %1544 = vmatprep.mubr.bf16.mxu1 %v473_v17  ;;  %6044 = vmatprep.subr.bf16.mxu0 %v6755_v63  ;;  %347 = vst [vmem:[#allocation2 + $0xe9] sm:$0x1] %v329_v28  ;;  %9449 = vst [vmem:[#allocation37_spill] sm:$0xff] %v7385_v31  ;;  %v390_v49 = vld [vmem:[#allocation2 + $0x98] sm:$0xff]  ;;  %v6757_v50 = vld [vmem:[#allocation6 + $0x160] sm:$0xff]   ;;  %v527_v21 = vrot.slane %v525_v54, 1 }
  0xa0   : > { %1545 = vmatmul.mubr.bf16.vlgmr.msra.gmra.mrb[0].mxu1 %v7316_v8  ;;  %274 = vst [vmem:[#allocation2 + $0x121] sm:$0xff] %v7381_v29  ;;  %275 = vst [vmem:[#allocation2 + $0x129] sm:$0xff] %v7385_v31  ;;  %v389_v62 = vld [vmem:[#allocation2 + $0x90] sm:$0xff]  ;;  %v6762_v5 = vld [vmem:[#allocation6 + $0x90] sm:$0xff]  }
  0xa1   : > { %1552 = vmatprep.mubr.bf16.mxu1 %v485_v53  ;;  %1087 = vmatmul.mubr.bf16.gmra.mrb[4].mxu0 %v7316_v8  ;;  %9450 = vst [vmem:[#allocation38_spill] sm:$0xff] %v7393_v47  ;;  %9451 = vst [vmem:[#allocation39_spill] sm:$0xff] %v7396_v48  ;;  %v520_v53 = vrot.slane %v518_v25, 1  ;;  %v294_v55 = vld [vmem:[#allocation2 + $0xf2] sm:$0x1]  ;;  %v7404_v7 = vld [vmem:[%s7235_s30 + $0xd0] sm:$0xff]  ;;  %v7415_v24 = vpack.c.bf16 %v390_v49, %v389_v62 }
  0xa2   : > { %1094 = vmatprep.mubr.bf16.mxu0 %v7375_v23  ;;  %6045 = vmatpush3.bf16.msra.mxu0 %v6755_v63  ;;  %276 = vst [vmem:[#allocation2 + $0x139] sm:$0xff] %v7393_v47  ;;  %277 = vst [vmem:[#allocation2 + $0x141] sm:$0xff] %v7396_v48  ;;  %v530_v63 = vshll.u32 %v7389_v36, 16  ;;  %v391_v6 = vld [vmem:[#allocation2 + $0xa0] sm:$0x3]  ;;  %v7407_v10 = vld [vmem:[%s7235_s30 + $0xd8] sm:$0xff] }
  0xa3   : > { %6046 = vmatprep.subr.bf16.mxu0 %v6756_v27  ;;  %6089 = vmatpush3.bf16.msra.mxu1 %v6758_v11  ;;  %312 = vst [vmem:[#allocation2 + $0xf0] sm:$0x1] %v294_v55  ;;  %v330_v0 = vld [vmem:[#allocation2 + $0xff] sm:$0x1]  ;;  %9452 = vst [vmem:[#allocation40_spill] sm:$0xff] %v7404_v7  ;;  %v736_v11 = vrot.slane %v7312_v3, 1  ;;  %v7412_v17 = vsel %vm461_vm0, %v516_v51, %v520_v53 }
  0xa4   : > { %v295_v1 = vld [vmem:[#allocation2 + $0x10a] sm:$0x1]  ;;  %6090 = vmatprep.subr.bf16.mxu1 %v6760_v30  ;;  %348 = vst [vmem:[#allocation2 + $0x101] sm:$0x1] %v330_v0  ;;  %v331_v2 = vld [vmem:[#allocation2 + $0x117] sm:$0x1]  ;;  %v528_v0 = vor.u32 %v527_v21, %v523_v18 }
  0xa5   : > { %313 = vst [vmem:[#allocation2 + $0x108] sm:$0x1] %v295_v1  ;;  %349 = vst [vmem:[#allocation2 + $0x119] sm:$0x1] %v331_v2  ;;  %v6759_v25 = vld [vmem:[#allocation6 + $0x168] sm:$0xff]   ;;  %v6763_v28 = vld [vmem:[#allocation6 + $0x98] sm:$0xff]   ;;  %v7421_v51 = vsel %vm732_vm1, %v736_v11, %v737_v13  ;;  %v7432_v1 = vpack.c.bf16 %v391_v6, %v391_v6 }
  0xa6   : > { %6047 = vmatpush3.bf16.msra.mxu0 %v6756_v27  ;;  %9453 = vst [vmem:[#allocation41_spill] sm:$0xff] %v7407_v10  ;;  %9454 = vst [vmem:[#allocation42_spill] sm:$0xff] %v7412_v17  ;;  %v393_v49 = vld [vmem:[#allocation2 + $0xb0] sm:$0xff]  ;;  %v7430_v62 = vld [vmem:[%s7235_s30 + $0xe8] sm:$0xff]  ;;  %v537_v2 = vshll.u32 %v7415_v24, 16  ;;  %v535_v6 = vshrl.u32 %v7415_v24, 16 }
  0xa7   : > { %6048 = vmatprep.subr.bf16.mxu0 %v6757_v50  ;;  %6091 = vmatpush3.bf16.msra.mxu1 %v6760_v30  ;;  %v296_v27 = vld [vmem:[#allocation2 + $0x122] sm:$0x1]  ;;  %278 = vst [vmem:[#allocation2 + $0x151] sm:$0xff] %v7404_v7  ;;  %279 = vst [vmem:[#allocation2 + $0x159] sm:$0xff] %v7407_v10  ;;  %v332_v4 = vld [vmem:[#allocation2 + $0x12f] sm:$0x1] }
  0xa8   : > { %1553 = vmatmul.mubr.bf16.gmra.mrb[4].mxu1 %v7312_v3  ;;  %314 = vst [vmem:[#allocation2 + $0x120] sm:$0x1] %v296_v27  ;;  %6092 = vmatprep.subr.bf16.mxu1 %v6762_v5  ;;  %v392_v30 = vld [vmem:[#allocation2 + $0xa8] sm:$0xff]  ;;  %350 = vst [vmem:[#allocation2 + $0x131] sm:$0x1] %v332_v4  ;;  %v532_v3 = vrot.slane %v530_v63, 1 }
  0xa9   : > { %1560 = vmatprep.mubr.bf16.mxu1 %v7346_v60  ;;  %1095 = vmatmul.mubr.bf16.gmra.mrb[8].mxu0 %v7325_v19  ;;  %v297_v53 = vld [vmem:[#allocation2 + $0x13a] sm:$0x1]  ;;  %v333_v54 = vld [vmem:[#allocation2 + $0x147] sm:$0x1]  ;;  %v7427_v55 = vld [vmem:[%s7235_s30 + $0xe0] sm:$0xff]  ;;  %9456 = vst [vmem:[#allocation44_spill] sm:$0xff] %v7430_v62  ;;  %v7437_v63 = vpack.c.bf16 %v393_v49, %v392_v30 }
  0xaa   : > { %1102 = vmatprep.mubr.bf16.mxu0 %v7412_v17  ;;  %6049 = vmatpush3.bf16.msra.mxu0 %v6757_v50  ;;  %315 = vst [vmem:[#allocation2 + $0x138] sm:$0x1] %v297_v53  ;;  %351 = vst [vmem:[#allocation2 + $0x149] sm:$0x1] %v333_v54  ;;  %v6761_v11 = vld [vmem:[#allocation6 + $0x170] sm:$0xff]   ;;  %v7440_v18 = vsel %vm461_vm0, %v528_v0, %v532_v3  ;;  %v539_v21 = vrot.slane %v537_v2, 1 }
  0xab   : > { %9455 = vst [vmem:[#allocation43_spill] sm:$0xff] %v7427_v55  ;;  %6050 = vmatprep.subr.bf16.mxu0 %v6759_v25  ;;  %6093 = vmatpush3.bf16.msra.mxu1 %v6762_v5  ;;  %280 = vst [vmem:[#allocation2 + $0x169] sm:$0xff] %v7427_v55  ;;  %v394_v50 = vld [vmem:[#allocation2 + $0xb8] sm:$0x3]  ;;  %v542_v4 = vshll.u32 %v7432_v1, 16  ;;  %v6764_v5 = vld [vmem:[#allocation6 + $0x178] sm:$0xff]  }
  0xac   : > { %281 = vst [vmem:[#allocation2 + $0x171] sm:$0xff] %v7430_v62  ;;  %6094 = vmatprep.subr.bf16.mxu1 %v6763_v28  ;;  %9457 = vst [vmem:[#allocation45_spill] sm:$0xff] %v7440_v18  ;;  %v6765_v53 = vld [vmem:[#allocation6 + $0xa0] sm:$0xff]   ;;  %v395_v30 = vld [vmem:[#allocation2 + $0xc0] sm:$0xff]  ;;  %v7448_v0 = vpack.c.bf16 %v394_v50, %v394_v50  ;;  %v540_v55 = vor.u32 %v539_v21, %v535_v6  ;;  %v547_v31 = vshrl.u32 %v7437_v63, 16 }
  0xad   : > { %v397_v49 = vld [vmem:[#allocation2 + $0xd0] sm:$0x3]  ;;  %v399_v54 = vld [vmem:[#allocation2 + $0xe0] sm:$0xff]  ;;  %v6766_v3 = vld [vmem:[#allocation6 + $0xa8] sm:$0xff]   ;;  %v544_v10 = vrot.slane %v542_v4, 1 }
  0xae   : > { %6051 = vmatpush3.bf16.msra.mxu0 %v6759_v25  ;;  %v298_v13 = vld [vmem:[#allocation2 + $0x152] sm:$0x1]  ;;  %v334_v27 = vld [vmem:[#allocation2 + $0x15f] sm:$0x1]  ;;  %v396_v25 = vld [vmem:[#allocation2 + $0xc8] sm:$0xff]  ;;  %v554_v21 = vshll.u32 %v7448_v0, 16 }
  0xaf   : > { %6052 = vmatprep.subr.bf16.mxu0 %v6761_v11  ;;  %316 = vst [vmem:[#allocation2 + $0x150] sm:$0x1] %v298_v13  ;;  %352 = vst [vmem:[#allocation2 + $0x161] sm:$0x1] %v334_v27  ;;  %6095 = vmatpush3.bf16.msra.mxu1 %v6763_v28  ;;  %v549_v28 = vshll.u32 %v7437_v63, 16  ;;  %v398_v2 = vld [vmem:[#allocation2 + $0xd8] sm:$0xff]  ;;  %v7454_v47 = vpack.c.bf16 %v396_v25, %v395_v30  ;;  %v7470_v25 = vsel %vm461_vm0, %v540_v55, %v544_v10 }
  0xb0   : > { %1561 = vmatmul.mubr.bf16.gmra.mrb[8].mxu1 %v7316_v8  ;;  %v400_v13 = vld [vmem:[#allocation2 + $0xe8] sm:$0x3]  ;;  %6096 = vmatprep.subr.bf16.mxu1 %v6765_v53  ;;  %v7452_v48 = vld [vmem:[%s7235_s30 + $0xf0] sm:$0xff]  ;;  %v7463_v6 = vpack.c.bf16 %v399_v54, %v398_v2  ;;  %v401_v30 = vld [vmem:[#allocation2 + $0xf0] sm:$0xff]  ;;  %9460 = vst [vmem:[#allocation48_spill] sm:$0xff] %v7470_v25  ;;  %v556_v16 = vrot.slane %v554_v21, 1 }
  0xb1   : > { %1568 = vmatprep.mubr.bf16.mxu1 %v7375_v23  ;;  %1103 = vmatmul.mubr.bf16.gmra.mrb[12].mxu0 %v7338_v57  ;;  %9458 = vst [vmem:[#allocation46_spill] sm:$0xff] %v7452_v48  ;;  %v7457_v50 = vld [vmem:[%s7235_s30 + $0xf8] sm:$0xff]  ;;  %282 = vst [vmem:[#allocation2 + $0x181] sm:$0xff] %v7452_v48  ;;  %v7467_v4 = vpack.c.bf16 %v400_v13, %v400_v13  ;;  %v6767_v48 = vld [vmem:[#allocation6 + $0xb0] sm:$0xff]   ;;  %v559_v61 = vshrl.u32 %v7454_v47, 16 }
  0xb2   : > { %1110 = vmatprep.mubr.bf16.mxu0 %v7440_v18  ;;  %6053 = vmatpush3.bf16.msra.mxu0 %v6761_v11  ;;  %v299_v27 = vld [vmem:[#allocation2 + $0x16a] sm:$0x1]  ;;  %9459 = vst [vmem:[#allocation47_spill] sm:$0xff] %v7457_v50  ;;  %v7461_v11 = vpack.c.bf16 %v397_v49, %v397_v49  ;;  %283 = vst [vmem:[#allocation2 + $0x189] sm:$0xff] %v7457_v50  ;;  %v561_v49 = vshll.u32 %v7454_v47, 16  ;;  %v6769_v54 = vld [vmem:[#allocation6 + $0x1c0] sm:$0xff]  }
  0xb3   : > { %317 = vst [vmem:[#allocation2 + $0x168] sm:$0x1] %v299_v27  ;;  %v335_v7 = vld [vmem:[#allocation2 + $0x177] sm:$0x1]  ;;  %6054 = vmatprep.subr.bf16.mxu0 %v6764_v5  ;;  %6097 = vmatpush3.bf16.msra.mxu1 %v6765_v53  ;;  %v403_v53 = vld [vmem:[#allocation2 + $0x100] sm:$0x3] }
  0xb4   : > { %353 = vst [vmem:[#allocation2 + $0x179] sm:$0x1] %v335_v7  ;;  %6098 = vmatprep.subr.bf16.mxu1 %v6766_v3  ;;  %v402_v7 = vld [vmem:[#allocation2 + $0xf8] sm:$0xff]  ;;  %v551_v27 = vrot.slane %v549_v28, 1  ;;  %v566_v2 = vshll.u32 %v7461_v11, 16  ;;  %v573_v13 = vshll.u32 %v7463_v6, 16  ;;  %v7482_v37 = vpack.c.bf16 %v403_v53, %v403_v53 }
  0xb5   : > { %v404_v50 = vld [vmem:[#allocation2 + $0x108] sm:$0xff]  ;;  %v578_v10 = vshll.u32 %v7467_v4, 16  ;;  %v406_v55 = vld [vmem:[#allocation2 + $0x118] sm:$0x3]  ;;  %v7480_v15 = vpack.c.bf16 %v402_v7, %v401_v30  ;;  %v407_v12 = vld [vmem:[#allocation2 + $0x120] sm:$0xff]  ;;  %v563_v56 = vrot.slane %v561_v49, 1 }
  0xb6   : > { %6055 = vmatpush3.bf16.msra.mxu0 %v6764_v5  ;;  %v405_v5 = vld [vmem:[#allocation2 + $0x110] sm:$0xff]  ;;  %v408_v28 = vld [vmem:[#allocation2 + $0x128] sm:$0xff]  ;;  %v552_v29 = vor.u32 %v551_v27, %v547_v31  ;;  %v568_v45 = vrot.slane %v566_v2, 1  ;;  %v571_v31 = vshrl.u32 %v7463_v6, 16  ;;  %v575_v21 = vrot.slane %v573_v13, 1  ;;  %v411_v27 = vld [vmem:[#allocation2 + $0x140] sm:$0xff] }
  0xb7   : > { %6099 = vmatpush3.bf16.msra.mxu1 %v6766_v3  ;;  %v6768_v22 = vld [vmem:[#allocation6 + $0xb8] sm:$0xff]   ;;  %5496 = vmatprep.subr.bf16.mxu0 %v6769_v54  ;;  %v7485_v52 = vpack.c.bf16 %v405_v5, %v404_v50  ;;  %v409_v3 = vld [vmem:[#allocation2 + $0x130] sm:$0x3]  ;;  %v7488_v30 = vrot.slane %v578_v10, 1  ;;  %v7490_v7 = vpack.c.bf16 %v406_v55, %v406_v55  ;;  %v7492_v53 = vpack.c.bf16 %v408_v28, %v407_v12  ;;  %v410_v13 = vld [vmem:[#allocation2 + $0x138] sm:$0xff] }
  0xb8   : > { %1569 = vmatmul.mubr.bf16.gmra.mrb[12].mxu1 %v7325_v19  ;;  %v300_v58 = vld [vmem:[#allocation2 + $0x182] sm:$0x1]  ;;  %6100 = vmatprep.subr.bf16.mxu1 %v6767_v48  ;;  %v7495_v49 = vsel %vm461_vm0, %v552_v29, %v556_v16  ;;  %v590_v50 = vshll.u32 %v7482_v37, 16  ;;  %v7503_v12 = vpack.c.bf16 %v409_v3, %v409_v3  ;;  %v412_v16 = vld [vmem:[#allocation2 + $0x148] sm:$0x3]  ;;  %v564_v5 = vor.u32 %v563_v56, %v559_v61  ;;  %v413_v3 = vld [vmem:[#allocation2 + $0x150] sm:$0xff] }
  0xb9   : > { %1576 = vmatprep.mubr.bf16.mxu1 %v7412_v17  ;;  %1111 = vmatmul.mubr.bf16.gmra.mrb[16].mxu0 %v7378_v26  ;;  %318 = vst [vmem:[#allocation2 + $0x180] sm:$0x1] %v300_v58  ;;  %v336_v46 = vld [vmem:[#allocation2 + $0x18f] sm:$0x1]  ;;  %9461 = vst [vmem:[#allocation49_spill] sm:$0xff] %v7495_v49  ;;  %v585_v58 = vshll.u32 %v7480_v15, 16  ;;  %v7510_v28 = vpack.c.bf16 %v411_v27, %v410_v13  ;;  %v7515_v42 = vpack.c.bf16 %v412_v16, %v412_v16 }
  0xba   : > { %1118 = vmatprep.mubr.bf16.mxu0 %v7470_v25  ;;  %354 = vst [vmem:[#allocation2 + $0x191] sm:$0x1] %v336_v46  ;;  %v597_v2 = vshll.u32 %v7485_v52, 16  ;;  %v602_v29 = vshll.u32 %v7490_v7, 16  ;;  %v592_v55 = vrot.slane %v590_v50, 1  ;;  %v414_v54 = vld [vmem:[#allocation2 + $0x158] sm:$0xff]  ;;  %v7520_v56 = vsel %vm461_vm0, %v564_v5, %v568_v45 }
  0xbb   : > { %6101 = vmatpush3.bf16.msra.mxu1 %v6767_v48  ;;  %v609_v48 = vshll.u32 %v7492_v53, 16  ;;  %v587_v10 = vrot.slane %v585_v58, 1  ;;  %v614_v46 = vshll.u32 %v7503_v12, 16  ;;  %v415_v44 = vld [vmem:[#allocation2 + $0x160] sm:$0x3]  ;;  %v607_v39 = vshrl.u32 %v7492_v53, 16 }
  0xbc   : > { %6102 = vmatprep.subr.bf16.mxu1 %v6768_v22  ;;  %v599_v41 = vrot.slane %v597_v2, 1  ;;  %v604_v40 = vrot.slane %v602_v29, 1  ;;  %v621_v61 = vshll.u32 %v7510_v28, 16  ;;  %v7525_v27 = vld [vmem:[#allocation2 + $0x170] sm:$0xff]  ;;  %v7528_v50 = vpack.c.bf16 %v414_v54, %v413_v3  ;;  %v418_v13 = vld [vmem:[#allocation2 + $0x178] sm:$0x3] }
  0xbd   : > { %v611_v38 = vrot.slane %v609_v48, 1  ;;  %v616_v58 = vrot.slane %v614_v46, 1  ;;  %v7530_v2 = vpack.c.bf16 %v415_v44, %v415_v44  ;;  %v420_v16 = vld [vmem:[#allocation2 + $0x188] sm:$0xff]  ;;  %v626_v45 = vshll.u32 %v7515_v42, 16 }
  0xbe   : > { %v576_v5 = vor.u32 %v575_v21, %v571_v31  ;;  %v619_v35 = vshrl.u32 %v7510_v28, 16  ;;  %v623_v46 = vrot.slane %v621_v61, 1  ;;  %v633_v54 = vshll.u32 %v7528_v50, 16 }
  0xbf   : > { %6103 = vmatpush3.bf16.msra.mxu1 %v6768_v22  ;;  %v7523_v22 = vld [vmem:[#allocation2 + $0x168] sm:$0xff]  ;;  %v638_v44 = vshll.u32 %v7530_v2, 16  ;;  %v7543_v34 = vpack.c.bf16 %v418_v13, %v418_v13  ;;  %v628_v62 = vrot.slane %v626_v45, 1  ;;  %v631_v31 = vshrl.u32 %v7528_v50, 16 }
  0xc0   : > { %1577 = vmatmul.mubr.bf16.gmra.mrb[16].mxu1 %v7338_v57  ;;  %6136 = vmatprep.subr.bf16.mxu1 %v7513_v43  ;;  %v419_v29 = vld [vmem:[#allocation2 + $0x180] sm:$0xff]  ;;  %v7541_v3 = vpack.c.bf16 %v7525_v27, %v7523_v22  ;;  %v7552_v21 = vsel %vm461_vm0, %v576_v5, %v7488_v30  ;;  %v635_v61 = vrot.slane %v633_v54, 1  ;;  %v9462_v30 = vshrl.u32 %v7480_v15, 16  ;;  %368 = vst [vmem:[#allocation2 + $0x198] sm:$0xff] %v7523_v22 }
  0xc1   : > { %1584 = vmatprep.mubr.bf16.mxu1 %v7440_v18  ;;  %1119 = vmatmul.mubr.bf16.gmra.mrb[20].mxu0 %v7415_v24  ;;  %v421_v48 = vld [vmem:[#allocation2 + $0x190] sm:$0x3]  ;;  %v7545_v33 = vpack.c.bf16 %v420_v16, %v419_v29  ;;  %v650_v13 = vshll.u32 %v7543_v34, 16  ;;  %v746_v22 = vrot.slane %v7353_v9, 1  ;;  %v6780_v9 = vld [vmem:[#allocation6 + $0x208] sm:$0xff]  }
  0xc2   : > { %1126 = vmatprep.mubr.bf16.mxu0 %v7495_v49  ;;  %v7547_v32 = vpack.c.bf16 %v421_v48, %v421_v48  ;;  %v645_v18 = vshll.u32 %v7541_v3, 16  ;;  %v588_v29 = vor.u32 %v587_v10, %v9462_v30  ;;  %v643_v48 = vshrl.u32 %v7541_v3, 16 }
  0xc3   : > { %v657_v16 = vshll.u32 %v7545_v33, 16  ;;  %v9463_v10 = vshrl.u32 %v7485_v52, 16 }
  0xc4   : > { %v662_v45 = vshll.u32 %v7547_v32, 16  ;;  %v647_v5 = vrot.slane %v645_v18, 1  ;;  %v7566_v54 = vsel %vm461_vm0, %v588_v29, %v592_v55  ;;  %v612_v55 = vor.u32 %v611_v38, %v607_v39  ;;  %v6770_v29 = vld [vmem:[#allocation6 + $0x180] sm:$0xff]  }
  0xc5   : > { %v659_v17 = vrot.slane %v657_v16, 1  ;;  %v600_v30 = vor.u32 %v599_v41, %v9463_v10  ;;  %v636_v38 = vor.u32 %v635_v61, %v631_v31  ;;  %v366_v31 = vld [vmem:[#allocation2 + $0x178] sm:$0x3]  ;;  %v742_v61 = vrot.slane %v7325_v19, 1 }
  0xc6   : > { %v664_v23 = vrot.slane %v662_v45, 1  ;;  %v743_v16 = vrot.slane %v7327_v20, 1  ;;  %v745_v20 = vrot.slane %v7338_v57, 1  ;;  %v748_v10 = vrot.slane %v7378_v26, 1 }
  0xc7   : > { %v7576_v18 = vsel %vm461_vm0, %v600_v30, %v604_v40  ;;  %v624_v40 = vor.u32 %v623_v46, %v619_v35  ;;  %v7603_v35 = vor.u32 %v647_v5, %v643_v48  ;;  %v337_v46 = vld [vmem:[#allocation2 + $0x1a7] sm:$0x1]  ;;  %v6771_v5 = vld [vmem:[#allocation6 + $0x1c8] sm:$0xff]   ;;  %v749_v30 = vrot.slane %v7389_v36, 1 }
  0xc8   : > { %1585 = vmatmul.mubr.bf16.gmra.mrb[20].mxu1 %v7378_v26  ;;  %355 = vst [vmem:[#allocation2 + $0x1a9] sm:$0x1] %v337_v46  ;;  %369 = vst [vmem:[#allocation2 + $0x1a0] sm:$0xff] %v7525_v27  ;;  %v7636_v48 = vsel %vm732_vm1, %v742_v61, %v743_v16  ;;  %v6775_v46 = vld [vmem:[#allocation6 + $0x1d8] sm:$0xff]   ;;  %v751_v36 = vrot.slane %v7415_v24, 1  ;;  %v6777_v61 = vld [vmem:[#allocation6 + $0x1e0] sm:$0xff]  }
  0xc9   : > { %1592 = vmatprep.mubr.bf16.mxu1 %v7470_v25  ;;  %1127 = vmatmul.mubr.bf16.gmra.mrb[24].mxu0 %v7437_v63  ;;  %v640_v25 = vrot.slane %v638_v44, 1  ;;  %v652_v44 = vrot.slane %v650_v13, 1  ;;  %v7583_v13 = vsel %vm461_vm0, %v612_v55, %v616_v58  ;;  %v7590_v41 = vsel %vm461_vm0, %v624_v40, %v628_v62  ;;  %370 = vst [vmem:[#allocation2 + $0x1a8] sm:$0x3] %v366_v31  ;;  %v6773_v55 = vld [vmem:[#allocation6 + $0x1d0] sm:$0xff]  }
  0xca   : > { %1134 = vmatprep.mubr.bf16.mxu0 %v7520_v56  ;;  %v7648_v40 = vsel %vm732_vm1, %v745_v20, %v746_v22  ;;  %v752_v31 = vrot.slane %v7432_v1, 1  ;;  %v6781_v1 = vld [vmem:[#allocation6 + $0x1e8] sm:$0xff]   ;;  %v760_v20 = vrot.slane %v7463_v6, 1  ;;  %v761_v22 = vrot.slane %v7467_v4, 1 }
  0xcb   : > { %v7597_v39 = vsel %vm461_vm0, %v636_v38, %v640_v25  ;;  %v7607_v62 = vsel %vm461_vm0, %v7603_v35, %v652_v44  ;;  %v6772_v44 = vld [vmem:[#allocation6 + $0x188] sm:$0xff]   ;;  %v6774_v38 = vld [vmem:[#allocation6 + $0x190] sm:$0xff]  }
  0xcc   : > { %v7663_v16 = vsel %vm732_vm1, %v751_v36, %v752_v31  ;;  %v6788_v4 = vld [vmem:[#allocation6 + $0x228] sm:$0xff]   ;;  %v6791_v36 = vld [vmem:[#allocation6 + $0x1b8] sm:$0xff]   ;;  %v766_v31 = vrot.slane %v7485_v52, 1 }
  0xd0   : > { %1593 = vmatmul.mubr.bf16.gmra.mrb[24].mxu1 %v7415_v24 }
  0xd1   : > { %1600 = vmatprep.mubr.bf16.mxu1 %v7495_v49  ;;  %1135 = vmatmul.mubr.bf16.gmra.mrb[28].mxu0 %v7454_v47  ;;  %v655_v49 = vshrl.u32 %v7545_v33, 16 }
  0xd2   : > { %1142 = vmatprep.mubr.bf16.mxu0 %v7552_v21 }
  0xd3   : > { %v660_v25 = vor.u32 %v659_v17, %v655_v49  ;;  %v734_v17 = vrot.slane %v7343_v59, 1  ;;  %v740_v49 = vrot.slane %v7321_v14, 1  ;;  %v7639_v59 = vld [vmem:[#allocation2 + $0x1a8] sm:$0x3]  ;;  %v2675_v14 = vld [vmem:[#allocation2 + $0x1a7] sm:$0x1] }
  0xd4   : > { %2693 = vst [vmem:[#allocation2 + $0x1a9] sm:$0x1] %v2675_v14  ;;  %v6783_v14 = vld [vmem:[#allocation6 + $0x1a8] sm:$0xff]  }
  0xd5   : > { %v7614_v58 = vsel %vm461_vm0, %v660_v25, %v664_v23  ;;  %v733_v23 = vrot.slane %v7316_v8, 1  ;;  %v7651_v25 = vsel %vm732_vm1, %v748_v10, %v749_v30  ;;  %v6786_v10 = vld [vmem:[#allocation6 + $0x220] sm:$0xff]  }
  0xd7   : > { %v735_v27 = vsel %vm732_vm1, %v733_v23, %v734_v17  ;;  %v7633_v45 = vsel %vm732_vm1, %v733_v23, %v740_v49  ;;  %v6776_v23 = vld [vmem:[#allocation6 + $0x198] sm:$0xff]   ;;  %v754_v17 = vrot.slane %v7437_v63, 1  ;;  %v755_v49 = vrot.slane %v7448_v0, 1 }
  0xd8   : > { %1601 = vmatmul.mubr.bf16.gmra.mrb[28].mxu1 %v7437_v63  ;;  %v6784_v0 = vld [vmem:[#allocation6 + $0x218] sm:$0xff]  }
  0xd9   : > { %1608 = vmatprep.mubr.bf16.mxu1 %v7520_v56  ;;  %1143 = vmatmul.mubr.bf16.gmra.mrb[32].mxu0 %v7463_v6 }
  0xda   : > { %1150 = vmatprep.mubr.bf16.mxu0 %v7566_v54 }
  0xe0   : > { %1609 = vmatmul.mubr.bf16.gmra.mrb[32].mxu1 %v7454_v47 }
  0xe1   : > { %1616 = vmatprep.mubr.bf16.mxu1 %v7552_v21  ;;  %1151 = vmatmul.mubr.bf16.gmra.mrb[36].mxu0 %v7480_v15 }
  0xe2   : > { %1158 = vmatprep.mubr.bf16.mxu0 %v7576_v18 }
  0xe8   : > { %1617 = vmatmul.mubr.bf16.gmra.mrb[36].mxu1 %v7463_v6 }
  0xe9   : > { %1624 = vmatprep.mubr.bf16.mxu1 %v7566_v54  ;;  %1159 = vmatmul.mubr.bf16.gmra.mrb[40].mxu0 %v7485_v52 }
  0xea   : > { %1166 = vmatprep.mubr.bf16.mxu0 %v7583_v13 }
  0xf0   : > { %1625 = vmatmul.mubr.bf16.gmra.mrb[40].mxu1 %v7480_v15 }
  0xf1   : > { %1632 = vmatprep.mubr.bf16.mxu1 %v7576_v18  ;;  %1167 = vmatmul.mubr.bf16.gmra.mrb[44].mxu0 %v7492_v53 }
  0xf2   : > { %1174 = vmatprep.mubr.bf16.mxu0 %v7590_v41 }
  0xf8   : > { %1633 = vmatmul.mubr.bf16.gmra.mrb[44].mxu1 %v7485_v52 }
  0xf9   : > { %1640 = vmatprep.mubr.bf16.mxu1 %v7583_v13  ;;  %1175 = vmatmul.mubr.bf16.gmra.mrb[48].mxu0 %v7510_v28 }
  0xfa   : > { %1182 = vmatprep.mubr.bf16.mxu0 %v7597_v39 }
 0x100   : > { %1641 = vmatmul.mubr.bf16.gmra.mrb[48].mxu1 %v7492_v53 }
 0x101   : > { %1648 = vmatprep.mubr.bf16.mxu1 %v7590_v41  ;;  %1183 = vmatmul.mubr.bf16.gmra.mrb[52].mxu0 %v7528_v50 }
 0x102   : > { %1190 = vmatprep.mubr.bf16.mxu0 %v7607_v62 }
 0x108   : > { %1649 = vmatmul.mubr.bf16.gmra.mrb[52].mxu1 %v7510_v28 }
 0x109   : > { %1656 = vmatprep.mubr.bf16.mxu1 %v7597_v39  ;;  %1191 = vmatmul.mubr.bf16.gmra.mrb[56].mxu0 %v7541_v3 }
 0x10a   : > { %1198 = vmatprep.mubr.bf16.mxu0 %v7614_v58 }
 0x110   : > { %1657 = vmatmul.mubr.bf16.gmra.mrb[56].mxu1 %v7528_v50 }
 0x111   : > { %1664 = vmatprep.mubr.bf16.mxu1 %v7607_v62  ;;  %1199 = vmatmul.mubr.bf16.gmra.mrb[60].mxu0 %v7545_v33 }
 0x112   : > { %6056 = vmatprep.mubr.bf16.mxu0 %v7421_v51 }
 0x118   : > { %1665 = vmatmul.mubr.bf16.gmra.mrb[60].mxu1 %v7541_v3 }
 0x119   : > { %6104 = vmatprep.mubr.bf16.mxu1 %v735_v27  ;;  %6057 = vmatmul.mubr.bf16.vlgmr.msra.gmra.mrb[64].mxu0 %v7633_v45  ;;  %v6779_v27 = vld [vmem:[#allocation6 + $0x1a0] sm:$0xff]  }
 0x11a   : > { %5497 = vmatpush3.bf16.msra.mxu0 %v6770_v29  ;;  %6060 = vmatprep.mubr.bf16.mxu0 %v7636_v48  ;;  %v7666_v29 = vsel %vm732_vm1, %v754_v17, %v755_v49  ;;  %v6790_v17 = vld [vmem:[#allocation6 + $0x230] sm:$0xff]  }
 0x11b   : > { %5498 = vmatprep.subr.bf16.mxu0 %v6771_v5  ;;  %v758_v5 = vrot.slane %v7461_v11, 1  ;;  %v6789_v11 = vld [vmem:[#allocation6 + $0x1f8] sm:$0xff]  }
 0x11e   : > { %5499 = vmatpush3.bf16.msra.mxu0 %v6772_v44  ;;  %v6785_v44 = vld [vmem:[#allocation6 + $0x1f0] sm:$0xff]  }
 0x11f   : > { %5500 = vmatprep.subr.bf16.mxu0 %v6773_v55  ;;  %v6787_v55 = vld [vmem:[#allocation6 + $0x1b0] sm:$0xff]  }
 0x120   : > { %6105 = vmatmul.mubr.bf16.vlgmr.msra.gmra.mrb[64].mxu1 %v7421_v51  ;;  %v6782_v51 = vld [vmem:[#allocation6 + $0x210] sm:$0xff]  }
 0x121   : > { %6108 = vmatprep.mubr.bf16.mxu1 %v7633_v45  ;;  %6061 = vmatmul.mubr.bf16.gmra.mrb[68].mxu0 %v7648_v40 }
 0x122   : > { %6064 = vmatprep.mubr.bf16.mxu0 %v7651_v25  ;;  %5501 = vmatpush3.bf16.msra.mxu0 %v6774_v38  ;;  %v7680_v38 = vsel %vm732_vm1, %v760_v20, %v761_v22 }
 0x123   : > { %5502 = vmatprep.subr.bf16.mxu0 %v6775_v46  ;;  %6137 = vmatpush3.bf16.msra.mxu1 %v7513_v43  ;;  %v757_v43 = vrot.slane %v7454_v47, 1  ;;  %v763_v46 = vrot.slane %v7480_v15, 1 }
 0x124   : > { %6138 = vmatprep.subr.bf16.mxu1 %v6780_v9 }
 0x125   : > { %v7677_v30 = vsel %vm732_vm1, %v757_v43, %v758_v5  ;;  %v778_v5 = vrot.slane %v7541_v3, 1 }
 0x126   : > { %5503 = vmatpush3.bf16.msra.mxu0 %v6776_v23  ;;  %v767_v23 = vrot.slane %v7490_v7, 1  ;;  %v769_v7 = vrot.slane %v7492_v53, 1 }
 0x127   : > { %5504 = vmatprep.subr.bf16.mxu0 %v6777_v61  ;;  %6139 = vmatpush3.bf16.msra.mxu1 %v6780_v9  ;;  %v764_v9 = vrot.slane %v7482_v37, 1  ;;  %v6792_v37 = vld [vmem:[#allocation6 + $0x238] sm:$0xff]  }
 0x128   : > { %6109 = vmatmul.mubr.bf16.gmra.mrb[68].mxu1 %v7636_v48  ;;  %6140 = vmatprep.subr.bf16.mxu1 %v6782_v51  ;;  %v7694_v61 = vsel %vm732_vm1, %v766_v31, %v767_v23 }
 0x129   : > { %6112 = vmatprep.mubr.bf16.mxu1 %v7648_v40  ;;  %6065 = vmatmul.mubr.bf16.gmra.mrb[72].mxu0 %v7663_v16  ;;  %v7691_v49 = vsel %vm732_vm1, %v763_v46, %v764_v9 }
 0x12a   : > { %6068 = vmatprep.mubr.bf16.mxu0 %v7666_v29  ;;  %5505 = vmatpush3.bf16.msra.mxu0 %v6779_v27  ;;  %v772_v27 = vrot.slane %v7510_v28, 1 }
 0x12b   : > { %5506 = vmatprep.subr.bf16.mxu0 %v6781_v1  ;;  %6141 = vmatpush3.bf16.msra.mxu1 %v6782_v51  ;;  %v770_v51 = vrot.slane %v7503_v12, 1  ;;  %v773_v1 = vrot.slane %v7515_v42, 1  ;;  %v775_v12 = vrot.slane %v7528_v50, 1  ;;  %v776_v42 = vrot.slane %v7530_v2, 1 }
 0x12c   : > { %6142 = vmatprep.subr.bf16.mxu1 %v6784_v0  ;;  %v781_v2 = vrot.slane %v7545_v33, 1 }
 0x12d   : > { %v7708_v43 = vsel %vm732_vm1, %v772_v27, %v773_v1  ;;  %v7719_v20 = vsel %vm732_vm1, %v775_v12, %v776_v42 }
 0x12e   : > { %5507 = vmatpush3.bf16.msra.mxu0 %v6783_v14  ;;  %v779_v14 = vrot.slane %v7543_v34, 1  ;;  %v782_v34 = vrot.slane %v7547_v32, 1  ;;  %v9465_v32 = vld [vmem:[#allocation42_spill] sm:$0xff] }
 0x12f   : > { %6143 = vmatpush3.bf16.msra.mxu1 %v6784_v0  ;;  %5508 = vmatprep.subr.bf16.mxu0 %v6785_v44  ;;  %v7705_v0 = vsel %vm732_vm1, %v769_v7, %v770_v51 }
 0x130   : > { %6113 = vmatmul.mubr.bf16.gmra.mrb[72].mxu1 %v7651_v25  ;;  %6144 = vmatprep.subr.bf16.mxu1 %v6786_v10  ;;  %v7724_v22 = vsel %vm732_vm1, %v778_v5, %v779_v14  ;;  %v7733_v44 = vsel %vm732_vm1, %v781_v2, %v782_v34 }
 0x131   : > { %6116 = vmatprep.mubr.bf16.mxu1 %v7663_v16  ;;  %6069 = vmatmul.mubr.bf16.gmra.mrb[76].mxu0 %v7677_v30 }
 0x132   : > { %6072 = vmatprep.mubr.bf16.mxu0 %v7680_v38  ;;  %5509 = vmatpush3.bf16.msra.mxu0 %v6787_v55 }
 0x133   : > { %6145 = vmatpush3.bf16.msra.mxu1 %v6786_v10  ;;  %5510 = vmatprep.subr.bf16.mxu0 %v6789_v11  ;;  %v9464_v10 = vld [vmem:[#allocation35_spill] sm:$0xff] }
 0x134   : > { %6146 = vmatprep.subr.bf16.mxu1 %v6788_v4 }
 0x136   : > { %5511 = vmatpush3.bf16.msra.mxu0 %v6791_v36 }
 0x137   : > { %6147 = vmatpush3.bf16.msra.mxu1 %v6788_v4 }
 0x138   : > { %6117 = vmatmul.mubr.bf16.gmra.mrb[76].mxu1 %v7666_v29  ;;  %6148 = vmatprep.subr.bf16.mxu1 %v6790_v17 }
 0x139   : > { %6120 = vmatprep.mubr.bf16.mxu1 %v7677_v30  ;;  %6073 = vmatmul.mubr.bf16.gmra.mrb[80].mxu0 %v7691_v49 }
 0x13a   : > { %6076 = vmatprep.mubr.bf16.mxu0 %v7694_v61 }
 0x13b   : > { %6149 = vmatpush3.bf16.msra.mxu1 %v6790_v17 }
 0x13c   : > { %6150 = vmatprep.subr.bf16.mxu1 %v6792_v37 }
 0x13f   : > { %6151 = vmatpush3.bf16.msra.mxu1 %v6792_v37 }
 0x140   : > { %6121 = vmatmul.mubr.bf16.gmra.mrb[80].mxu1 %v7680_v38 }
 0x141   : > { %6124 = vmatprep.mubr.bf16.mxu1 %v7691_v49  ;;  %6077 = vmatmul.mubr.bf16.gmra.mrb[84].mxu0 %v7705_v0 }
 0x142   : > { %6080 = vmatprep.mubr.bf16.mxu0 %v7708_v43 }
 0x148   : > { %6125 = vmatmul.mubr.bf16.gmra.mrb[84].mxu1 %v7694_v61 }
 0x149   : > { %6128 = vmatprep.mubr.bf16.mxu1 %v7705_v0  ;;  %6081 = vmatmul.mubr.bf16.gmra.mrb[88].mxu0 %v7719_v20 }
 0x14a   : > { %6084 = vmatprep.mubr.bf16.mxu0 %v7724_v22 }
 0x150   : > { %6129 = vmatmul.mubr.bf16.gmra.mrb[88].mxu1 %v7708_v43 }
 0x151   : > { %6132 = vmatprep.mubr.bf16.mxu1 %v7719_v20  ;;  %6085 = vmatmul.mubr.bf16.gmra.mrb[92].mxu0 %v7733_v44 }
 0x152   : > { %2059 = vmatprep.mubr.bf16.mxu0 %v7346_v60  ;;  %v9466_v60 = vld [vmem:[#allocation45_spill] sm:$0xff] }
 0x158   : > { %6133 = vmatmul.mubr.bf16.gmra.mrb[92].mxu1 %v7724_v22 }
 0x159   : > { %6152 = vmatprep.mubr.bf16.mxu1 %v7633_v45  ;;  %2060 = vmatmul.mubr.bf16.vlgmr.msra.gmra.mrb[96].mxu0 %v7316_v8 }
 0x15a   : > { %2067 = vmatprep.mubr.bf16.mxu0 %v9464_v10 }
 0x160   : > { %6153 = vmatmul.mubr.bf16.vlgmr.msra.gmra.mrb[64].mxu1 %v7636_v48 }
 0x161   : > { %6156 = vmatprep.mubr.bf16.mxu1 %v7648_v40  ;;  %2068 = vmatmul.mubr.bf16.gmra.mrb[100].mxu0 %v7325_v19  ;;  %v9467_v19 = vld [vmem:[#allocation48_spill] sm:$0xff] }
 0x162   : > { %2075 = vmatprep.mubr.bf16.mxu0 %v9465_v32 }
 0x168   : > { %6157 = vmatmul.mubr.bf16.gmra.mrb[68].mxu1 %v7651_v25 }
 0x169   : > { %6160 = vmatprep.mubr.bf16.mxu1 %v7663_v16  ;;  %2076 = vmatmul.mubr.bf16.gmra.mrb[104].mxu0 %v7338_v57 }
 0x16a   : > { %2083 = vmatprep.mubr.bf16.mxu0 %v9466_v60 }
 0x16c   : > { %v5240_v45 = vpop.f32.mrb[0].mxu0 }
 0x16d   : > { %v5241_v8 = vpop.f32.mrb[1].mxu0 }
 0x16e   : > { %v5243_v55 = vpop.f32.mrb[2].mxu0  ;;  %v7751_v11 = vadd.f32 %v5241_v8, %v5240_v45 }
 0x16f   : > { %v5244_v48 = vpop.f32.mrb[3].mxu0 }
 0x170   : > { %6161 = vmatmul.mubr.bf16.gmra.mrb[72].mxu1 %v7666_v29  ;;  %v7754_v40 = vadd.f32 %v5244_v48, %v5243_v55 }
 0x171   : > { %6164 = vmatprep.mubr.bf16.mxu1 %v7677_v30  ;;  %2084 = vmatmul.mubr.bf16.gmra.mrb[108].mxu0 %v7378_v26  ;;  %v9468_v26 = vld [vmem:[#allocation49_spill] sm:$0xff] }
 0x172   : > { %2091 = vmatprep.mubr.bf16.mxu0 %v9467_v19 }
 0x173   : > { %v5376_v25 = vpop.f32.mrb[0].mxu1 }
 0x174   : > { %v5246_v57 = vpop.f32.mrb[4].mxu0  ;;  %v5377_v16 = vpop.f32.mrb[1].mxu1 }
 0x175   : > { %v5247_v4 = vpop.f32.mrb[5].mxu0  ;;  %v7759_v46 = vadd.f32 %v5377_v16, %v5376_v25  ;;  %v5379_v9 = vpop.f32.mrb[2].mxu1 }
 0x176   : > { %v5249_v36 = vpop.f32.mrb[6].mxu0  ;;  %v5380_v31 = vpop.f32.mrb[3].mxu1  ;;  %v7761_v23 = vadd.f32 %v5247_v4, %v5246_v57  ;;  %v7797_v4 = vpack.c.bf16 %v7639_v59, %v7639_v59 }
 0x177   : > { %v5250_v29 = vpop.f32.mrb[7].mxu0  ;;  %v7763_v17 = vadd.f32 %v5380_v31, %v5379_v9 }
 0x178   : > { %6165 = vmatmul.mubr.bf16.gmra.mrb[76].mxu1 %v7680_v38  ;;  %v7766_v30 = vadd.f32 %v5250_v29, %v5249_v36 }
 0x179   : > { %6168 = vmatprep.mubr.bf16.mxu1 %v7691_v49  ;;  %2092 = vmatmul.mubr.bf16.gmra.mrb[112].mxu0 %v7415_v24 }
 0x17a   : > { %2099 = vmatprep.mubr.bf16.mxu0 %v9468_v26 }
 0x17b   : > { %v5382_v37 = vpop.f32.mrb[4].mxu1 }
 0x17c   : > { %v5252_v7 = vpop.f32.mrb[8].mxu0  ;;  %v5383_v51 = vpop.f32.mrb[5].mxu1 }
 0x17d   : > { %v5253_v27 = vpop.f32.mrb[9].mxu0  ;;  %v7771_v1 = vadd.f32 %v5383_v51, %v5382_v37  ;;  %v5385_v12 = vpop.f32.mrb[6].mxu1 }
 0x17e   : > { %v5255_v42 = vpop.f32.mrb[10].mxu0  ;;  %v5386_v14 = vpop.f32.mrb[7].mxu1  ;;  %v7773_v2 = vadd.f32 %v5253_v27, %v5252_v7 }
 0x17f   : > { %v5256_v38 = vpop.f32.mrb[11].mxu0  ;;  %v7775_v34 = vadd.f32 %v5386_v14, %v5385_v12 }
 0x180   : > { %6169 = vmatmul.mubr.bf16.gmra.mrb[80].mxu1 %v7694_v61  ;;  %v7778_v49 = vadd.f32 %v5256_v38, %v5255_v42 }
 0x181   : > { %6172 = vmatprep.mubr.bf16.mxu1 %v7705_v0  ;;  %2100 = vmatmul.mubr.bf16.gmra.mrb[116].mxu0 %v7437_v63 }
 0x182   : > { %2107 = vmatprep.mubr.bf16.mxu0 %v7520_v56 }
 0x183   : > { %v5388_v24 = vpop.f32.mrb[8].mxu1 }
 0x184   : > { %v5258_v10 = vpop.f32.mrb[12].mxu0  ;;  %v5389_v32 = vpop.f32.mrb[9].mxu1 }
 0x185   : > { %v5259_v60 = vpop.f32.mrb[13].mxu0  ;;  %v7783_v45 = vadd.f32 %v5389_v32, %v5388_v24  ;;  %v5391_v8 = vpop.f32.mrb[10].mxu1 }
 0x186   : > { %v5261_v55 = vpop.f32.mrb[14].mxu0  ;;  %v5392_v48 = vpop.f32.mrb[11].mxu1  ;;  %v7785_v19 = vadd.f32 %v5259_v60, %v5258_v10 }
 0x187   : > { %v5262_v61 = vpop.f32.mrb[15].mxu0  ;;  %v7787_v25 = vadd.f32 %v5392_v48, %v5391_v8 }
 0x188   : > { %6173 = vmatmul.mubr.bf16.gmra.mrb[84].mxu1 %v7708_v43  ;;  %v7790_v0 = vadd.f32 %v5262_v61, %v5261_v55 }
 0x189   : > { %6176 = vmatprep.mubr.bf16.mxu1 %v7719_v20  ;;  %2108 = vmatmul.mubr.bf16.gmra.mrb[120].mxu0 %v7454_v47 }
 0x18a   : > { %2115 = vmatprep.mubr.bf16.mxu0 %v7552_v21  ;;  %v785_v21 = vrot.slane %v7797_v4, 1 }
 0x18b   : > { %v5394_v63 = vpop.f32.mrb[12].mxu1 }
 0x18c   : > { %v5264_v56 = vpop.f32.mrb[16].mxu0  ;;  %v5395_v57 = vpop.f32.mrb[13].mxu1  ;;  %v786_v51 = vsel %vm732_vm1, %v778_v5, %v785_v21 }
 0x18d   : > { %v5265_v16 = vpop.f32.mrb[17].mxu0  ;;  %v7799_v9 = vadd.f32 %v5395_v57, %v5394_v63  ;;  %v5397_v36 = vpop.f32.mrb[14].mxu1 }
 0x18e   : > { %v5267_v43 = vpop.f32.mrb[18].mxu0  ;;  %v5398_v31 = vpop.f32.mrb[15].mxu1  ;;  %v7801_v29 = vadd.f32 %v5265_v16, %v5264_v56 }
 0x18f   : > { %v5268_v20 = vpop.f32.mrb[19].mxu0  ;;  %v7803_v26 = vadd.f32 %v5398_v31, %v5397_v36 }
 0x190   : > { %6177 = vmatmul.mubr.bf16.gmra.mrb[88].mxu1 %v7724_v22  ;;  %v7806_v47 = vadd.f32 %v5268_v20, %v5267_v43 }
 0x191   : > { %6180 = vmatprep.mubr.bf16.mxu1 %v7733_v44  ;;  %2116 = vmatmul.mubr.bf16.gmra.mrb[124].mxu0 %v7463_v6 }
 0x192   : > { %2123 = vmatprep.mubr.bf16.mxu0 %v7566_v54 }
 0x193   : > { %v5400_v59 = vpop.f32.mrb[16].mxu1 }
 0x194   : > { %v5270_v37 = vpop.f32.mrb[20].mxu0  ;;  %v5401_v7 = vpop.f32.mrb[17].mxu1 }
 0x195   : > { %v5271_v27 = vpop.f32.mrb[21].mxu0  ;;  %v7815_v12 = vadd.f32 %v5401_v7, %v5400_v59  ;;  %v5403_v22 = vpop.f32.mrb[18].mxu1 }
 0x196   : > { %v5273_v42 = vpop.f32.mrb[22].mxu0  ;;  %v5404_v14 = vpop.f32.mrb[19].mxu1  ;;  %v7817_v44 = vadd.f32 %v5271_v27, %v5270_v37 }
 0x197   : > { %v5274_v6 = vpop.f32.mrb[23].mxu0  ;;  %v7819_v38 = vadd.f32 %v5404_v14, %v5403_v22 }
 0x198   : > { %6181 = vmatmul.mubr.bf16.gmra.mrb[92].mxu1 %v786_v51  ;;  %v7821_v54 = vadd.f32 %v5274_v6, %v5273_v42 }
 0x199   : > { %2124 = vmatmul.mubr.bf16.gmra.mrb[128].mxu0 %v7480_v15 }
 0x19a   : > { %2131 = vmatprep.mubr.bf16.mxu0 %v7576_v18 }
 0x19b   : > { %v5406_v24 = vpop.f32.mrb[20].mxu1 }
 0x19c   : > { %v5276_v5 = vpop.f32.mrb[24].mxu0  ;;  %v5407_v10 = vpop.f32.mrb[21].mxu1 }
 0x19d   : > { %v5277_v32 = vpop.f32.mrb[25].mxu0  ;;  %v7825_v60 = vadd.f32 %v5407_v10, %v5406_v24  ;;  %v5409_v8 = vpop.f32.mrb[22].mxu1 }
 0x19e   : > { %v5279_v55 = vpop.f32.mrb[26].mxu0  ;;  %v5410_v48 = vpop.f32.mrb[23].mxu1  ;;  %v7827_v61 = vadd.f32 %v5277_v32, %v5276_v5 }
 0x19f   : > { %v5280_v63 = vpop.f32.mrb[27].mxu0  ;;  %v7829_v56 = vadd.f32 %v5410_v48, %v5409_v8 }
 0x1a0   : > { %v7831_v57 = vadd.f32 %v5280_v63, %v5279_v55 }
 0x1a1   : > { %2132 = vmatmul.mubr.bf16.gmra.mrb[132].mxu0 %v7485_v52 }
 0x1a2   : > { %2139 = vmatprep.mubr.bf16.mxu0 %v7583_v13 }
 0x1a3   : > { %v5412_v15 = vpop.f32.mrb[24].mxu1 }
 0x1a4   : > { %v5282_v18 = vpop.f32.mrb[28].mxu0  ;;  %v5413_v16 = vpop.f32.mrb[25].mxu1 }
 0x1a5   : > { %v5283_v36 = vpop.f32.mrb[29].mxu0  ;;  %v7835_v43 = vadd.f32 %v5413_v16, %v5412_v15  ;;  %v5415_v31 = vpop.f32.mrb[26].mxu1 }
 0x1a6   : > { %v5285_v20 = vpop.f32.mrb[30].mxu0  ;;  %v5416_v21 = vpop.f32.mrb[27].mxu1  ;;  %v7837_v59 = vadd.f32 %v5283_v36, %v5282_v18 }
 0x1a7   : > { %v5286_v37 = vpop.f32.mrb[31].mxu0  ;;  %v7839_v7 = vadd.f32 %v5416_v21, %v5415_v31 }
 0x1a8   : > { %v7841_v51 = vadd.f32 %v5286_v37, %v5285_v20 }
 0x1a9   : > { %2140 = vmatmul.mubr.bf16.gmra.mrb[136].mxu0 %v7492_v53 }
 0x1aa   : > { %2147 = vmatprep.mubr.bf16.mxu0 %v7590_v41 }
 0x1ab   : > { %v5418_v52 = vpop.f32.mrb[28].mxu1 }
 0x1ac   : > { %v5288_v13 = vpop.f32.mrb[32].mxu0  ;;  %v5419_v27 = vpop.f32.mrb[29].mxu1 }
 0x1ad   : > { %v5289_v22 = vpop.f32.mrb[33].mxu0  ;;  %v7845_v42 = vadd.f32 %v5419_v27, %v5418_v52  ;;  %v5421_v14 = vpop.f32.mrb[30].mxu1 }
 0x1ae   : > { %v7847_v6 = vadd.f32 %v5289_v22, %v5288_v13  ;;  %v5291_v24 = vpop.f32.mrb[34].mxu0  ;;  %v5422_v5 = vpop.f32.mrb[31].mxu1 }
 0x1af   : > { %v5292_v10 = vpop.f32.mrb[35].mxu0  ;;  %v7849_v32 = vadd.f32 %v5422_v5, %v5421_v14 }
 0x1b0   : > { %v7851_v8 = vadd.f32 %v5292_v10, %v5291_v24  ;;  %v674_v10 = vshll.u32 %v7797_v4, 16 }
 0x1b1   : > { %2148 = vmatmul.mubr.bf16.gmra.mrb[140].mxu0 %v7510_v28 }
 0x1b2   : > { %2155 = vmatprep.mubr.bf16.mxu0 %v7597_v39 }
 0x1b3   : > { %v5424_v53 = vpop.f32.mrb[32].mxu1 }
 0x1b4   : > { %v5294_v41 = vpop.f32.mrb[36].mxu0  ;;  %v5425_v55 = vpop.f32.mrb[33].mxu1 }
 0x1b5   : > { %v5295_v48 = vpop.f32.mrb[37].mxu0  ;;  %v7855_v63 = vadd.f32 %v5425_v55, %v5424_v53  ;;  %v5427_v15 = vpop.f32.mrb[34].mxu1 }
 0x1b6   : > { %v7857_v18 = vadd.f32 %v5295_v48, %v5294_v41  ;;  %v5297_v16 = vpop.f32.mrb[38].mxu0  ;;  %v5428_v36 = vpop.f32.mrb[35].mxu1 }
 0x1b7   : > { %v5298_v31 = vpop.f32.mrb[39].mxu0  ;;  %v7859_v20 = vadd.f32 %v5428_v36, %v5427_v15 }
 0x1b8   : > { %v7861_v21 = vadd.f32 %v5298_v31, %v5297_v16 }
 0x1b9   : > { %2156 = vmatmul.mubr.bf16.gmra.mrb[144].mxu0 %v7528_v50  ;;  %v676_v50 = vrot.slane %v674_v10, 1 }
 0x1ba   : > { %2163 = vmatprep.mubr.bf16.mxu0 %v7607_v62 }
 0x1bb   : > { %v5430_v28 = vpop.f32.mrb[36].mxu1 }
 0x1bc   : > { %v5300_v39 = vpop.f32.mrb[40].mxu0  ;;  %v5431_v37 = vpop.f32.mrb[37].mxu1 }
 0x1bd   : > { %v5301_v52 = vpop.f32.mrb[41].mxu0  ;;  %v7865_v13 = vadd.f32 %v5431_v37, %v5430_v28  ;;  %v5433_v27 = vpop.f32.mrb[38].mxu1  ;;  %v677_v37 = vsel %vm461_vm0, %v7603_v35, %v676_v50 }
 0x1be   : > { %v7867_v22 = vadd.f32 %v5301_v52, %v5300_v39  ;;  %v5303_v14 = vpop.f32.mrb[42].mxu0  ;;  %v5434_v24 = vpop.f32.mrb[39].mxu1 }
 0x1bf   : > { %v5304_v5 = vpop.f32.mrb[43].mxu0  ;;  %v7870_v53 = vadd.f32 %v5434_v24, %v5433_v27 }
 0x1c0   : > { %v7872_v41 = vadd.f32 %v5304_v5, %v5303_v14 }
 0x1c1   : > { %2164 = vmatmul.mubr.bf16.gmra.mrb[148].mxu0 %v7541_v3 }
 0x1c2   : > { %9469 = vst [vmem:[#allocation35_spill] sm:$0xff] %v7872_v41  ;;  %2171 = vmatprep.mubr.bf16.mxu0 %v7614_v58 }
 0x1c3   : > { %v5436_v62 = vpop.f32.mrb[40].mxu1 }
 0x1c4   : > { %v5306_v55 = vpop.f32.mrb[44].mxu0  ;;  %v5437_v48 = vpop.f32.mrb[41].mxu1 }
 0x1c5   : > { %v5307_v15 = vpop.f32.mrb[45].mxu0  ;;  %v7876_v16 = vadd.f32 %v5437_v48, %v5436_v62  ;;  %v5439_v36 = vpop.f32.mrb[42].mxu1 }
 0x1c6   : > { %v7878_v31 = vadd.f32 %v5307_v15, %v5306_v55  ;;  %v5309_v28 = vpop.f32.mrb[46].mxu0  ;;  %v5440_v4 = vpop.f32.mrb[43].mxu1 }
 0x1c7   : > { %v5310_v39 = vpop.f32.mrb[47].mxu0  ;;  %v7882_v52 = vadd.f32 %v5440_v4, %v5439_v36 }
 0x1c8   : > { %v7884_v27 = vadd.f32 %v5310_v39, %v5309_v28 }
 0x1c9   : > { %9470 = vst [vmem:[#allocation42_spill] sm:$0xff] %v7882_v52  ;;  %2172 = vmatmul.mubr.bf16.gmra.mrb[152].mxu0 %v7545_v33 }
 0x1ca   : > { %2179 = vmatprep.mubr.bf16.mxu0 %v677_v37 }
 0x1cb   : > { %v5442_v58 = vpop.f32.mrb[44].mxu1 }
 0x1cc   : > { %v5312_v14 = vpop.f32.mrb[48].mxu0  ;;  %v5443_v24 = vpop.f32.mrb[45].mxu1 }
 0x1cd   : > { %v5313_v5 = vpop.f32.mrb[49].mxu0  ;;  %v7887_v10 = vadd.f32 %v5443_v24, %v5442_v58  ;;  %v5445_v62 = vpop.f32.mrb[46].mxu1 }
 0x1ce   : > { %v7889_v55 = vadd.f32 %v5313_v5, %v5312_v14  ;;  %v5315_v48 = vpop.f32.mrb[50].mxu0  ;;  %v5446_v15 = vpop.f32.mrb[47].mxu1 }
 0x1cf   : > { %v5316_v41 = vpop.f32.mrb[51].mxu0  ;;  %v7891_v35 = vadd.f32 %v5446_v15, %v5445_v62 }
 0x1d0   : > { %9471 = vst [vmem:[#allocation45_spill] sm:$0xff] %v7889_v55  ;;  %v7893_v50 = vadd.f32 %v5316_v41, %v5315_v48 }
 0x1d1   : > { %9472 = vst [vmem:[#allocation48_spill] sm:$0xff] %v7891_v35  ;;  %2180 = vmatmul.mubr.bf16.gmra.mrb[156].mxu0 %v7541_v3 }
 0x1d2   : > { %9473 = vst [vmem:[#allocation49_spill] sm:$0xff] %v7893_v50 }
 0x1d3   : > { %v5448_v33 = vpop.f32.mrb[48].mxu1 }
 0x1d4   : > { %v5318_v36 = vpop.f32.mrb[52].mxu0  ;;  %v5449_v28 = vpop.f32.mrb[49].mxu1 }
 0x1d5   : > { %v5319_v4 = vpop.f32.mrb[53].mxu0  ;;  %v7896_v39 = vadd.f32 %v5449_v28, %v5448_v33  ;;  %v5451_v37 = vpop.f32.mrb[50].mxu1 }
 0x1d6   : > { %v7898_v58 = vadd.f32 %v5319_v4, %v5318_v36  ;;  %v5321_v14 = vpop.f32.mrb[54].mxu0  ;;  %v5452_v24 = vpop.f32.mrb[51].mxu1 }
 0x1d7   : > { %9474 = vst [vmem:[#allocation50_spill] sm:$0xff] %v7896_v39  ;;  %v5322_v5 = vpop.f32.mrb[55].mxu0  ;;  %v7900_v55 = vadd.f32 %v5452_v24, %v5451_v37 }
 0x1d8   : > { %9475 = vst [vmem:[#allocation51_spill] sm:$0xff] %v7898_v58  ;;  %v7902_v62 = vadd.f32 %v5322_v5, %v5321_v14 }
 0x1d9   : > { %9476 = vst [vmem:[#allocation52_spill] sm:$0xff] %v7900_v55 }
 0x1da   : > { %9477 = vst [vmem:[#allocation53_spill] sm:$0xff] %v7902_v62 }
 0x1db   : > { %v5454_v41 = vpop.f32.mrb[52].mxu1 }
 0x1dc   : > { %v5324_v48 = vpop.f32.mrb[56].mxu0  ;;  %v5455_v15 = vpop.f32.mrb[53].mxu1 }
 0x1dd   : > { %v5325_v3 = vpop.f32.mrb[57].mxu0  ;;  %v7904_v50 = vadd.f32 %v5455_v15, %v5454_v41  ;;  %v5457_v52 = vpop.f32.mrb[54].mxu1 }
 0x1de   : > { %v7906_v35 = vadd.f32 %v5325_v3, %v5324_v48  ;;  %v5327_v33 = vpop.f32.mrb[58].mxu0  ;;  %v5458_v28 = vpop.f32.mrb[55].mxu1 }
 0x1df   : > { %v5328_v36 = vpop.f32.mrb[59].mxu0  ;;  %v7908_v4 = vadd.f32 %v5458_v28, %v5457_v52 }
 0x1e0   : > { %9478 = vst [vmem:[#allocation54_spill] sm:$0xff] %v7906_v35  ;;  %v7910_v39 = vadd.f32 %v5328_v36, %v5327_v33 }
 0x1e1   : > { %9479 = vst [vmem:[#allocation55_spill] sm:$0xff] %v7908_v4 }
 0x1e2   : > { %9480 = vst [vmem:[#allocation56_spill] sm:$0xff] %v7910_v39 }
 0x1e3   : > { %v5460_v37 = vpop.f32.mrb[56].mxu1 }
 0x1e4   : > { %v5330_v24 = vpop.f32.mrb[60].mxu0  ;;  %v5461_v14 = vpop.f32.mrb[57].mxu1 }
 0x1e5   : > { %v5331_v5 = vpop.f32.mrb[61].mxu0  ;;  %v7912_v55 = vadd.f32 %v5461_v14, %v5460_v37  ;;  %v5463_v62 = vpop.f32.mrb[58].mxu1 }
 0x1e6   : > { %v7914_v58 = vadd.f32 %v5331_v5, %v5330_v24  ;;  %v5333_v41 = vpop.f32.mrb[62].mxu0  ;;  %v5464_v15 = vpop.f32.mrb[59].mxu1 }
 0x1e7   : > { %9481 = vst [vmem:[#allocation57_spill] sm:$0xff] %v7912_v55  ;;  %v5334_v48 = vpop.f32.mrb[63].mxu0  ;;  %v7916_v3 = vadd.f32 %v5464_v15, %v5463_v62 }
 0x1e8   : > { %v7918_v35 = vadd.f32 %v5334_v48, %v5333_v41 }
 0x1eb   : > { %v5466_v52 = vpop.f32.mrb[60].mxu1 }
 0x1ec   : > { %v6058_v28 = vpop.f32.mrb[64].mxu0  ;;  %v5467_v33 = vpop.f32.mrb[61].mxu1 }
 0x1ed   : > { %v1250_v36 = vadd.f32 %v6058_v28, %v7761_v23  ;;  %v1241_v39 = vpop.f32.mrb[65].mxu0  ;;  %v7921_v4 = vadd.f32 %v5467_v33, %v5466_v52  ;;  %v5469_v37 = vpop.f32.mrb[62].mxu1 }
 0x1ee   : > { %v1242_v14 = vadd.f32 %v7751_v11, %v1241_v39  ;;  %v6059_v24 = vpop.f32.mrb[66].mxu0  ;;  %v5470_v5 = vpop.f32.mrb[63].mxu1 }
 0x1ef   : > { %v7925_v55 = vadd.f32 %v7771_v1, %v1250_v36  ;;  %v1253_v62 = vadd.f32 %v6059_v24, %v7766_v30  ;;  %v1244_v41 = vpop.f32.mrb[67].mxu0  ;;  %v7928_v15 = vadd.f32 %v5470_v5, %v5469_v37 }
 0x1f0   : > { %v7931_v48 = vadd.f32 %v7759_v46, %v1242_v14  ;;  %v1245_v23 = vadd.f32 %v7754_v40, %v1244_v41 }
 0x1f1   : > { %v7935_v52 = vadd.f32 %v7775_v34, %v1253_v62 }
 0x1f2   : > { %v7938_v11 = vadd.f32 %v7763_v17, %v1245_v23 }
 0x1f4   : > { %v6062_v39 = vpop.f32.mrb[68].mxu0 }
 0x1f5   : > { %v1266_v1 = vadd.f32 %v6062_v39, %v7785_v19  ;;  %v1257_v28 = vpop.f32.mrb[69].mxu0 }
 0x1f6   : > { %v1258_v30 = vadd.f32 %v7773_v2, %v1257_v28  ;;  %v6063_v33 = vpop.f32.mrb[70].mxu0 }
 0x1f7   : > { %v7943_v36 = vadd.f32 %v7799_v9, %v1266_v1  ;;  %v1269_v46 = vadd.f32 %v6063_v33, %v7790_v0  ;;  %v1260_v37 = vpop.f32.mrb[71].mxu0 }
 0x1f8   : > { %v7947_v40 = vadd.f32 %v7783_v45, %v1258_v30  ;;  %v1261_v34 = vadd.f32 %v7778_v49, %v1260_v37 }
 0x1f9   : > { %v7951_v17 = vadd.f32 %v7803_v26, %v1269_v46 }
 0x1fa   : > { %v7954_v19 = vadd.f32 %v7787_v25, %v1261_v34 }
 0x1fc   : > { %v6066_v14 = vpop.f32.mrb[72].mxu0 }
 0x1fd   : > { %v1282_v2 = vadd.f32 %v6066_v14, %v7817_v44  ;;  %v1273_v24 = vpop.f32.mrb[73].mxu0 }
 0x1fe   : > { %v1274_v9 = vadd.f32 %v7801_v29, %v1273_v24  ;;  %v6067_v5 = vpop.f32.mrb[74].mxu0 }
 0x1ff   : > { %v7959_v0 = vadd.f32 %v7825_v60, %v1282_v2  ;;  %v1285_v45 = vadd.f32 %v6067_v5, %v7821_v54  ;;  %v1276_v62 = vpop.f32.mrb[75].mxu0  ;;  %v9484_v5 = vld [vmem:[#allocation42_spill] sm:$0xff] }
 0x200   : > { %v7963_v49 = vadd.f32 %v7815_v12, %v1274_v9  ;;  %v1277_v26 = vadd.f32 %v7806_v47, %v1276_v62 }
 0x201   : > { %v7967_v25 = vadd.f32 %v7829_v56, %v1285_v45 }
 0x202   : > { %v7970_v44 = vadd.f32 %v7819_v38, %v1277_v26 }
 0x204   : > { %v6070_v41 = vpop.f32.mrb[76].mxu0 }
 0x205   : > { %v1298_v29 = vadd.f32 %v6070_v41, %v7837_v59  ;;  %v1289_v23 = vpop.f32.mrb[77].mxu0 }
 0x206   : > { %v1290_v60 = vadd.f32 %v7827_v61, %v1289_v23  ;;  %v6071_v39 = vpop.f32.mrb[78].mxu0 }
 0x207   : > { %v7975_v54 = vadd.f32 %v7845_v42, %v1298_v29  ;;  %v1301_v12 = vadd.f32 %v6071_v39, %v7841_v51  ;;  %v1292_v1 = vpop.f32.mrb[79].mxu0  ;;  %v9488_v39 = vld [vmem:[#allocation50_spill] sm:$0xff] }
 0x208   : > { %v7979_v47 = vadd.f32 %v7835_v43, %v1290_v60  ;;  %v1293_v56 = vadd.f32 %v7831_v57, %v1292_v1  ;;  %v9489_v1 = vld [vmem:[#allocation49_spill] sm:$0xff] }
 0x209   : > { %v7983_v38 = vadd.f32 %v7849_v32, %v1301_v12 }
 0x20a   : > { %v7986_v59 = vadd.f32 %v7839_v7, %v1293_v56 }
 0x20c   : > { %v6074_v28 = vpop.f32.mrb[80].mxu0 }
 0x20d   : > { %v1314_v61 = vadd.f32 %v6074_v28, %v7857_v18  ;;  %v1305_v30 = vpop.f32.mrb[81].mxu0  ;;  %v9490_v28 = vld [vmem:[#allocation55_spill] sm:$0xff] }
 0x20e   : > { %v1306_v42 = vadd.f32 %v7847_v6, %v1305_v30  ;;  %v6075_v33 = vpop.f32.mrb[82].mxu0  ;;  %v9491_v30 = vld [vmem:[#allocation52_spill] sm:$0xff] }
 0x20f   : > { %v7991_v51 = vadd.f32 %v7865_v13, %v1314_v61  ;;  %v1317_v43 = vadd.f32 %v6075_v33, %v7861_v21  ;;  %v1308_v46 = vpop.f32.mrb[83].mxu0 }
 0x210   : > { %v7995_v57 = vadd.f32 %v7855_v63, %v1306_v42  ;;  %v1309_v32 = vadd.f32 %v7851_v8, %v1308_v46 }
 0x211   : > { %v7999_v7 = vadd.f32 %v7870_v53, %v1317_v43  ;;  %v9482_v53 = vld [vmem:[#allocation35_spill] sm:$0xff] }
 0x212   : > { %v8002_v18 = vadd.f32 %v7859_v20, %v1309_v32  ;;  %v9483_v20 = vld [vmem:[#allocation48_spill] sm:$0xff] }
 0x214   : > { %v6078_v37 = vpop.f32.mrb[84].mxu0 }
 0x215   : > { %v1330_v6 = vadd.f32 %v6078_v37, %v7878_v31  ;;  %v1321_v34 = vpop.f32.mrb[85].mxu0 }
 0x216   : > { %v1322_v13 = vadd.f32 %v7867_v22, %v1321_v34  ;;  %v6079_v14 = vpop.f32.mrb[86].mxu0  ;;  %v9485_v22 = vld [vmem:[#allocation51_spill] sm:$0xff] }
 0x217   : > { %v8007_v21 = vadd.f32 %v7887_v10, %v1330_v6  ;;  %v1333_v63 = vadd.f32 %v6079_v14, %v7884_v27  ;;  %v1324_v2 = vpop.f32.mrb[87].mxu0  ;;  %v9486_v10 = vld [vmem:[#allocation45_spill] sm:$0xff] }
 0x218   : > { %v8011_v8 = vadd.f32 %v7876_v16, %v1322_v13  ;;  %v1325_v24 = vadd.f32 %v9482_v53, %v1324_v2  ;;  %v9487_v16 = vld [vmem:[#allocation53_spill] sm:$0xff]  ;;  %v9494_v2 = vld [vmem:[#allocation56_spill] sm:$0xff] }
 0x219   : > { %v8015_v9 = vadd.f32 %v9483_v20, %v1333_v63  ;;  %v9493_v14 = vld [vmem:[#allocation57_spill] sm:$0xff] }
 0x21a   : > { %v8018_v31 = vadd.f32 %v9484_v5, %v1325_v24 }
 0x21c   : > { %v6082_v45 = vpop.f32.mrb[88].mxu0 }
 0x21d   : > { %v1346_v62 = vadd.f32 %v6082_v45, %v9485_v22  ;;  %v1337_v26 = vpop.f32.mrb[89].mxu0 }
 0x21e   : > { %v1338_v41 = vadd.f32 %v9486_v10, %v1337_v26  ;;  %v6083_v29 = vpop.f32.mrb[90].mxu0 }
 0x21f   : > { %v8023_v27 = vadd.f32 %v7904_v50, %v1346_v62  ;;  %v1349_v23 = vadd.f32 %v6083_v29, %v9487_v16  ;;  %v1340_v60 = vpop.f32.mrb[91].mxu0  ;;  %v9492_v50 = vld [vmem:[#allocation54_spill] sm:$0xff] }
 0x220   : > { %v8027_v12 = vadd.f32 %v9488_v39, %v1338_v41  ;;  %v1341_v56 = vadd.f32 %v9489_v1, %v1340_v60 }
 0x221   : > { %v8031_v61 = vadd.f32 %v9490_v28, %v1349_v23 }
 0x222   : > { %v8034_v42 = vadd.f32 %v9491_v30, %v1341_v56 }
 0x224   : > { %v6086_v33 = vpop.f32.mrb[92].mxu0 }
 0x225   : > { %v1362_v43 = vadd.f32 %v6086_v33, %v7914_v58  ;;  %v1353_v46 = vpop.f32.mrb[93].mxu0 }
 0x226   : > { %v1354_v32 = vadd.f32 %v9492_v50, %v1353_v46  ;;  %v6087_v37 = vpop.f32.mrb[94].mxu0 }
 0x227   : > { %v8039_v6 = vadd.f32 %v7921_v4, %v1362_v43  ;;  %v1365_v34 = vadd.f32 %v6087_v37, %v7918_v35  ;;  %v1356_v13 = vpop.f32.mrb[95].mxu0 }
 0x228   : > { %v8043_v63 = vadd.f32 %v9493_v14, %v1354_v32  ;;  %v1357_v53 = vadd.f32 %v9494_v2, %v1356_v13 }
 0x229   : > { %v8047_v24 = vadd.f32 %v7928_v15, %v1365_v34 }
 0x22a   : > { %v8050_v58 = vadd.f32 %v7916_v3, %v1357_v53 }
 0x22c   : > { %v5512_v20 = vpop.f32.mrb[96].mxu0 }
 0x22d   : > { %v5513_v5 = vpop.f32.mrb[97].mxu0 }
 0x22e   : > { %v5514_v45 = vadd.f32 %v5513_v5, %v5512_v20  ;;  %v5515_v22 = vpop.f32.mrb[98].mxu0 }
 0x22f   : > { %v5516_v4 = vpop.f32.mrb[99].mxu0 }
 0x230   : > { %v6334_v62 = vadd.f32 %v5514_v45, %v7931_v48  ;;  %v5517_v35 = vadd.f32 %v5516_v4, %v5515_v22 }
 0x232   : > { %v6342_v26 = vadd.f32 %v5517_v35, %v7938_v11 }
 0x233   : > { %v6154_v10 = vpop.f32.mrb[64].mxu1 }
 0x234   : > { %v2222_v41 = vpop.f32.mrb[65].mxu1  ;;  %v5518_v29 = vpop.f32.mrb[100].mxu0 }
 0x235   : > { %v8054_v16 = vadd.f32 %v6334_v62, %v2222_v41  ;;  %v6155_v15 = vpop.f32.mrb[66].mxu1  ;;  %v5519_v23 = vpop.f32.mrb[101].mxu0 }
 0x236   : > { %v2225_v60 = vpop.f32.mrb[67].mxu1  ;;  %v5520_v3 = vadd.f32 %v5519_v23, %v5518_v29  ;;  %v5521_v39 = vpop.f32.mrb[102].mxu0 }
 0x237   : > { %v8056_v1 = vadd.f32 %v6342_v26, %v2225_v60  ;;  %v5522_v56 = vpop.f32.mrb[103].mxu0 }
 0x238   : > { %v6330_v28 = vadd.f32 %v5520_v3, %v7925_v55  ;;  %v5523_v30 = vadd.f32 %v5522_v56, %v5521_v39  ;;  %v2420_v3 = vmul.f32 %v8054_v16, %v8054_v16 }
 0x239   : > { %v2421_v23 = vmul.f32 %v8056_v1, %v8056_v1  ;;  %v2381_v39 = vadd.f32 %v8056_v1, %v8054_v16 }
 0x23a   : > { %v8059_v48 = vadd.f32 %v6330_v28, %v6154_v10  ;;  %v6338_v11 = vadd.f32 %v5523_v30, %v7935_v52 }
 0x23b   : > { %v6158_v33 = vpop.f32.mrb[68].mxu1 }
 0x23c   : > { %v2238_v43 = vpop.f32.mrb[69].mxu1  ;;  %v8062_v46 = vadd.f32 %v6338_v11, %v6155_v15  ;;  %v5524_v50 = vpop.f32.mrb[104].mxu0  ;;  %v2422_v56 = vmul.f32 %v8059_v48, %v8059_v48 }
 0x23d   : > { %v6159_v32 = vpop.f32.mrb[70].mxu1  ;;  %v5525_v37 = vpop.f32.mrb[105].mxu0 }
 0x23e   : > { %v2241_v34 = vpop.f32.mrb[71].mxu1  ;;  %v5526_v13 = vadd.f32 %v5525_v37, %v5524_v50  ;;  %v5527_v14 = vpop.f32.mrb[106].mxu0 }
 0x23f   : > { %v5528_v2 = vpop.f32.mrb[107].mxu0 }
 0x240   : > { %v6350_v53 = vadd.f32 %v5526_v13, %v7947_v40  ;;  %v5529_v20 = vadd.f32 %v5528_v2, %v5527_v14  ;;  %v2423_v2 = vmul.f32 %v8062_v46, %v8062_v46 }
 0x242   : > { %v8065_v55 = vadd.f32 %v6350_v53, %v2238_v43  ;;  %v6358_v5 = vadd.f32 %v5529_v20, %v7954_v19  ;;  %v2382_v43 = vadd.f32 %v8059_v48, %v2381_v39 }
 0x243   : > { %v8068_v45 = vpop.f32.mrb[72].mxu1 }
 0x244   : > { %v2254_v52 = vpop.f32.mrb[73].mxu1  ;;  %v8070_v22 = vadd.f32 %v6358_v5, %v2241_v34  ;;  %v5530_v4 = vpop.f32.mrb[108].mxu0  ;;  %v2383_v5 = vadd.f32 %v8062_v46, %v2382_v43 }
 0x245   : > { %v8072_v62 = vpop.f32.mrb[74].mxu1  ;;  %v5531_v35 = vpop.f32.mrb[109].mxu0 }
 0x246   : > { %v2257_v26 = vpop.f32.mrb[75].mxu1  ;;  %v5532_v10 = vadd.f32 %v5531_v35, %v5530_v4  ;;  %v5533_v41 = vpop.f32.mrb[110].mxu0  ;;  %v2424_v4 = vmul.f32 %v8065_v55, %v8065_v55  ;;  %v2425_v39 = vmul.f32 %v8070_v22, %v8070_v22 }
 0x247   : > { %v5534_v29 = vpop.f32.mrb[111].mxu0 }
 0x248   : > { %v6346_v40 = vadd.f32 %v5532_v10, %v7943_v36  ;;  %v5535_v15 = vadd.f32 %v5534_v29, %v5533_v41  ;;  %v2384_v29 = vadd.f32 %v8065_v55, %v2383_v5 }
 0x24a   : > { %v8077_v19 = vadd.f32 %v6346_v40, %v6158_v33  ;;  %v6354_v60 = vadd.f32 %v5535_v15, %v7951_v17  ;;  %v2452_v33 = vadd.f32 %v2421_v23, %v2420_v3  ;;  %v2385_v43 = vadd.f32 %v8070_v22, %v2384_v29 }
 0x24b   : > { %v8086_v28 = vpop.f32.mrb[76].mxu1 }
 0x24c   : > { %v8088_v36 = vpop.f32.mrb[77].mxu1  ;;  %v8090_v30 = vadd.f32 %v6354_v60, %v6159_v32  ;;  %v5536_v11 = vpop.f32.mrb[112].mxu0  ;;  %v2453_v14 = vadd.f32 %v2452_v33, %v2422_v56  ;;  %v6795_v60 = vld [vmem:[#allocation8 + $0x140] sm:$0xff]  }
 0x24d   : > { %v8093_v17 = vpop.f32.mrb[78].mxu1  ;;  %v5537_v50 = vpop.f32.mrb[113].mxu0  ;;  %6184 = vmatprep.subr.bf16.mxu1 %v6795_v60 }
 0x24e   : > { %9495 = vst [vmem:[#allocation35_spill] sm:$0xff] %v8090_v30  ;;  %v8095_v37 = vpop.f32.mrb[79].mxu1  ;;  %v5538_v34 = vadd.f32 %v5537_v50, %v5536_v11  ;;  %v5539_v13 = vpop.f32.mrb[114].mxu0  ;;  %v2454_v41 = vadd.f32 %v2453_v14, %v2423_v2  ;;  %6185 = vmatpush3.bf16.msra.mxu1 %v6795_v60  ;;  %v6793_v14 = vld [vmem:[#allocation8 + $0x100] sm:$0xff]   ;;  %v6796_v2 = vld [vmem:[#allocation8 + $0x148] sm:$0xff]  }
 0x24f   : > { %v5540_v53 = vpop.f32.mrb[115].mxu0  ;;  %5632 = vmatprep.subr.bf16.mxu0 %v6793_v14  ;;  %6186 = vmatprep.subr.bf16.mxu1 %v6796_v2 }
 0x250   : > { %v6366_v20 = vadd.f32 %v5538_v34, %v7963_v49  ;;  %v5541_v32 = vadd.f32 %v5540_v53, %v5539_v13  ;;  %v2455_v3 = vadd.f32 %v2454_v41, %v2424_v4  ;;  %v2427_v41 = vmul.f32 %v8090_v30, %v8090_v30 }
 0x252   : > { %v8103_v35 = vadd.f32 %v6366_v20, %v2254_v52  ;;  %v6374_v10 = vadd.f32 %v5541_v32, %v7970_v44  ;;  %v2456_v53 = vadd.f32 %v2455_v3, %v2425_v39  ;;  %v2386_v20 = vadd.f32 %v8077_v19, %v2385_v43  ;;  %v6794_v32 = vld [vmem:[#allocation8 + $0xc0] sm:$0xff]   ;;  %6187 = vmatpush3.bf16.msra.mxu1 %v6796_v2  ;;  %v6799_v3 = vld [vmem:[#allocation8 + $0x150] sm:$0xff]  }
 0x253   : > { %v8107_v40 = vpop.f32.mrb[80].mxu1  ;;  %5633 = vmatpush3.bf16.msra.mxu0 %v6794_v32  ;;  %6188 = vmatprep.subr.bf16.mxu1 %v6799_v3  ;;  %v6802_v32 = vld [vmem:[#allocation8 + $0xd0] sm:$0xff]  }
 0x254   : > { %v8109_v15 = vpop.f32.mrb[81].mxu1  ;;  %v8111_v23 = vadd.f32 %v6374_v10, %v2257_v26  ;;  %v5542_v49 = vpop.f32.mrb[116].mxu0  ;;  %v2426_v26 = vmul.f32 %v8077_v19, %v8077_v19  ;;  %v2428_v39 = vmul.f32 %v8103_v35, %v8103_v35 }
 0x255   : > { %v8115_v56 = vpop.f32.mrb[82].mxu1  ;;  %v5543_v52 = vpop.f32.mrb[117].mxu0 }
 0x256   : > { %9496 = vst [vmem:[#allocation48_spill] sm:$0xff] %v8111_v23  ;;  %v8117_v11 = vpop.f32.mrb[83].mxu1  ;;  %v5544_v44 = vadd.f32 %v5543_v52, %v5542_v49  ;;  %v5545_v33 = vpop.f32.mrb[118].mxu0  ;;  %v2457_v10 = vadd.f32 %v2456_v53, %v2426_v26  ;;  %6189 = vmatpush3.bf16.msra.mxu1 %v6799_v3  ;;  %v6800_v53 = vld [vmem:[#allocation8 + $0x158] sm:$0xff]  }
 0x257   : > { %v5546_v50 = vpop.f32.mrb[119].mxu0  ;;  %6190 = vmatprep.subr.bf16.mxu1 %v6800_v53 }
 0x258   : > { %v6362_v34 = vadd.f32 %v5544_v44, %v7959_v0  ;;  %v5547_v13 = vadd.f32 %v5546_v50, %v5545_v33  ;;  %v6798_v33 = vld [vmem:[#allocation8 + $0xc8] sm:$0xff]  }
 0x25a   : > { %v8125_v5 = vadd.f32 %v6362_v34, %v8068_v45  ;;  %v6370_v4 = vadd.f32 %v5547_v13, %v7967_v25  ;;  %v6797_v45 = vld [vmem:[#allocation8 + $0x108] sm:$0xff]   ;;  %v2387_v25 = vadd.f32 %v8090_v30, %v2386_v20  ;;  %v2458_v34 = vadd.f32 %v2457_v10, %v2427_v41  ;;  %v6801_v20 = vld [vmem:[#allocation8 + $0x110] sm:$0xff]   ;;  %6191 = vmatpush3.bf16.msra.mxu1 %v6800_v53 }
 0x25b   : > { %v8130_v29 = vpop.f32.mrb[84].mxu1  ;;  %5634 = vmatprep.subr.bf16.mxu0 %v6797_v45  ;;  %v2429_v30 = vmul.f32 %v8111_v23, %v8111_v23 }
 0x25c   : > { %v8132_v0 = vpop.f32.mrb[85].mxu1  ;;  %v8135_v49 = vadd.f32 %v6370_v4, %v8072_v62  ;;  %v5548_v60 = vpop.f32.mrb[120].mxu0  ;;  %v2388_v62 = vadd.f32 %v8103_v35, %v2387_v25  ;;  %5635 = vmatpush3.bf16.msra.mxu0 %v6798_v33  ;;  %v2459_v4 = vadd.f32 %v2458_v34, %v2428_v39  ;;  %v2430_v45 = vmul.f32 %v8125_v5, %v8125_v5  ;;  %v6806_v25 = vld [vmem:[#allocation8 + $0xd8] sm:$0xff]  }
 0x25d   : > { %v8140_v52 = vpop.f32.mrb[86].mxu1  ;;  %v5549_v44 = vpop.f32.mrb[121].mxu0  ;;  %5636 = vmatprep.subr.bf16.mxu0 %v6801_v20 }
 0x25e   : > { %9497 = vst [vmem:[#allocation42_spill] sm:$0xff] %v8135_v49  ;;  %v8142_v43 = vpop.f32.mrb[87].mxu1  ;;  %v5550_v26 = vadd.f32 %v5549_v44, %v5548_v60  ;;  %v5551_v50 = vpop.f32.mrb[122].mxu0  ;;  %v6803_v60 = vld [vmem:[#allocation8 + $0x160] sm:$0xff]   ;;  %v6805_v44 = vld [vmem:[#allocation8 + $0x118] sm:$0xff]   ;;  %v2431_v53 = vmul.f32 %v8135_v49, %v8135_v49 }
 0x25f   : > { %v5552_v13 = vpop.f32.mrb[123].mxu0  ;;  %6192 = vmatprep.subr.bf16.mxu1 %v6803_v60 }
 0x260   : > { %v6382_v14 = vadd.f32 %v5550_v26, %v7979_v47  ;;  %v5553_v2 = vadd.f32 %v5552_v13, %v5551_v50  ;;  %v2389_v47 = vadd.f32 %v8111_v23, %v2388_v62  ;;  %5637 = vmatpush3.bf16.msra.mxu0 %v6802_v32  ;;  %v2460_v26 = vadd.f32 %v2459_v4, %v2429_v30  ;;  %v6804_v13 = vld [vmem:[#allocation8 + $0x168] sm:$0xff]  }
 0x261   : > { %5638 = vmatprep.subr.bf16.mxu0 %v6805_v44  ;;  %6193 = vmatpush3.bf16.msra.mxu1 %v6803_v60  ;;  %v6810_v44 = vld [vmem:[#allocation8 + $0x128] sm:$0xff]  }
 0x262   : > { %v8149_v10 = vadd.f32 %v6382_v14, %v8088_v36  ;;  %v6390_v41 = vadd.f32 %v5553_v2, %v7986_v59  ;;  %v6808_v59 = vld [vmem:[#allocation8 + $0x120] sm:$0xff]   ;;  %v2390_v50 = vadd.f32 %v8125_v5, %v2389_v47  ;;  %v2461_v32 = vadd.f32 %v2460_v26, %v2430_v45  ;;  %6194 = vmatprep.subr.bf16.mxu1 %v6804_v13  ;;  %v6807_v47 = vld [vmem:[#allocation8 + $0x170] sm:$0xff]  }
 0x263   : > { %v8155_v3 = vpop.f32.mrb[88].mxu1 }
 0x264   : > { %9498 = vst [vmem:[#allocation51_spill] sm:$0xff] %v8149_v10  ;;  %v8157_v39 = vpop.f32.mrb[89].mxu1  ;;  %v8160_v33 = vadd.f32 %v6390_v41, %v8095_v37  ;;  %v5554_v36 = vpop.f32.mrb[124].mxu0  ;;  %5639 = vmatpush3.bf16.msra.mxu0 %v6806_v25  ;;  %v6809_v37 = vld [vmem:[#allocation8 + $0xe0] sm:$0xff]   ;;  %v2391_v41 = vadd.f32 %v8135_v49, %v2390_v50 }
 0x265   : > { %v8163_v34 = vpop.f32.mrb[90].mxu1  ;;  %v5555_v62 = vpop.f32.mrb[125].mxu0  ;;  %5640 = vmatprep.subr.bf16.mxu0 %v6808_v59  ;;  %6195 = vmatpush3.bf16.msra.mxu1 %v6804_v13  ;;  %v6814_v13 = vld [vmem:[#allocation8 + $0xf0] sm:$0xff]  }
 0x266   : > { %9499 = vst [vmem:[#allocation45_spill] sm:$0xff] %v8160_v33  ;;  %v8165_v14 = vpop.f32.mrb[91].mxu1  ;;  %v5556_v2 = vadd.f32 %v5555_v62, %v5554_v36  ;;  %v5557_v20 = vpop.f32.mrb[126].mxu0  ;;  %v2432_v36 = vmul.f32 %v8149_v10, %v8149_v10  ;;  %v2392_v26 = vadd.f32 %v8149_v10, %v2391_v41  ;;  %6196 = vmatprep.subr.bf16.mxu1 %v6807_v47 }
 0x267   : > { %v5558_v23 = vpop.f32.mrb[127].mxu0 }
 0x268   : > { %v6378_v30 = vadd.f32 %v5556_v2, %v7975_v54  ;;  %v5559_v4 = vadd.f32 %v5558_v23, %v5557_v20  ;;  %5641 = vmatpush3.bf16.msra.mxu0 %v6809_v37  ;;  %v6812_v54 = vld [vmem:[#allocation8 + $0xe8] sm:$0xff]   ;;  %v2462_v23 = vadd.f32 %v2461_v32, %v2431_v53  ;;  %v6813_v2 = vld [vmem:[#allocation8 + $0x130] sm:$0xff]   ;;  %v2433_v37 = vmul.f32 %v8160_v33, %v8160_v33 }
 0x269   : > { %5642 = vmatprep.subr.bf16.mxu0 %v6810_v44  ;;  %6197 = vmatpush3.bf16.msra.mxu1 %v6807_v47 }
 0x26a   : > { %v8174_v45 = vadd.f32 %v6378_v30, %v8086_v28  ;;  %v6386_v25 = vadd.f32 %v5559_v4, %v7983_v38  ;;  %v6811_v38 = vld [vmem:[#allocation8 + $0x178] sm:$0xff]   ;;  %v2463_v30 = vadd.f32 %v2462_v23, %v2432_v36  ;;  %v8195_v23 = vld [vmem:[#allocation8 + $0x80] sm:$0xff]  }
 0x26b   : > { %v8178_v62 = vpop.f32.mrb[92].mxu1  ;;  %v6815_v36 = vld [vmem:[#allocation8 + $0x138] sm:$0xff]   ;;  %6198 = vmatprep.subr.bf16.mxu1 %v6811_v38 }
 0x26c   : > { %v8180_v60 = vpop.f32.mrb[93].mxu1  ;;  %v8183_v59 = vadd.f32 %v6386_v25, %v8093_v17  ;;  %v5560_v50 = vpop.f32.mrb[128].mxu0  ;;  %v2393_v17 = vadd.f32 %v8160_v33, %v2392_v26  ;;  %5643 = vmatpush3.bf16.msra.mxu0 %v6812_v54  ;;  %v2434_v44 = vmul.f32 %v8174_v45, %v8174_v45  ;;  %v2464_v49 = vadd.f32 %v2463_v30, %v2433_v37 }
 0x26d   : > { %v8185_v28 = vpop.f32.mrb[94].mxu1  ;;  %v5561_v20 = vpop.f32.mrb[129].mxu0  ;;  %5644 = vmatprep.subr.bf16.mxu0 %v6813_v2  ;;  %6199 = vmatpush3.bf16.msra.mxu1 %v6811_v38 }
 0x26e   : > { %v8189_v4 = vpop.f32.mrb[95].mxu1  ;;  %v5562_v32 = vadd.f32 %v5561_v20, %v5560_v50  ;;  %v5563_v53 = vpop.f32.mrb[130].mxu0  ;;  %v2394_v50 = vadd.f32 %v8174_v45, %v2393_v17  ;;  %v6817_v20 = vld [vmem:[#allocation8 + $0xf8] sm:$0xff]   ;;  %v2465_v33 = vadd.f32 %v2464_v49, %v2434_v44  ;;  %6232 = vmatprep.subr.bf16.mxu1 %v8195_v23 }
 0x26f   : > { %v5564_v41 = vpop.f32.mrb[131].mxu0 }
 0x270   : > { %v6398_v25 = vadd.f32 %v5562_v32, %v7995_v57  ;;  %v5565_v10 = vadd.f32 %v5564_v41, %v5563_v53  ;;  %5645 = vmatpush3.bf16.msra.mxu0 %v6814_v13  ;;  %v2435_v57 = vmul.f32 %v8183_v59, %v8183_v59 }
 0x271   : > { %5646 = vmatprep.subr.bf16.mxu0 %v6815_v36 }
 0x272   : > { %v8199_v26 = vadd.f32 %v6398_v25, %v8109_v15  ;;  %v6406_v54 = vadd.f32 %v5565_v10, %v8002_v18  ;;  %v2395_v15 = vadd.f32 %v8183_v59, %v2394_v50  ;;  %v2466_v32 = vadd.f32 %v2465_v33, %v2435_v57 }
 0x274   : > { %v8205_v47 = vadd.f32 %v6406_v54, %v8117_v11  ;;  %v5566_v2 = vpop.f32.mrb[132].mxu0  ;;  %v2436_v18 = vmul.f32 %v8199_v26, %v8199_v26  ;;  %5647 = vmatpush3.bf16.msra.mxu0 %v6817_v20  ;;  %v2396_v53 = vadd.f32 %v8199_v26, %v2395_v15 }
 0x275   : > { %v5567_v30 = vpop.f32.mrb[133].mxu0 }
 0x276   : > { %v5568_v10 = vadd.f32 %v5567_v30, %v5566_v2  ;;  %v5569_v37 = vpop.f32.mrb[134].mxu0  ;;  %v2467_v38 = vadd.f32 %v2466_v32, %v2436_v18  ;;  %v2437_v41 = vmul.f32 %v8205_v47, %v8205_v47  ;;  %v2397_v25 = vadd.f32 %v8205_v47, %v2396_v53 }
 0x277   : > { %v5570_v49 = vpop.f32.mrb[135].mxu0 }
 0x278   : > { %v6394_v11 = vadd.f32 %v5568_v10, %v7991_v51  ;;  %v5571_v17 = vadd.f32 %v5570_v49, %v5569_v37  ;;  %v2468_v54 = vadd.f32 %v2467_v38, %v2437_v41 }
 0x27a   : > { %v8216_v13 = vadd.f32 %v6394_v11, %v8107_v40  ;;  %v6402_v44 = vadd.f32 %v5571_v17, %v7999_v7 }
 0x27c   : > { %v2438_v36 = vmul.f32 %v8216_v13, %v8216_v13  ;;  %v8223_v33 = vadd.f32 %v6402_v44, %v8115_v56  ;;  %v5572_v50 = vpop.f32.mrb[136].mxu0  ;;  %v2398_v20 = vadd.f32 %v8216_v13, %v2397_v25 }
 0x27d   : > { %v5573_v51 = vpop.f32.mrb[137].mxu0 }
 0x27e   : > { %v5574_v57 = vadd.f32 %v5573_v51, %v5572_v50  ;;  %v5575_v2 = vpop.f32.mrb[138].mxu0  ;;  %v2469_v40 = vadd.f32 %v2468_v54, %v2438_v36  ;;  %v2439_v7 = vmul.f32 %v8223_v33, %v8223_v33  ;;  %v2399_v10 = vadd.f32 %v8223_v33, %v2398_v20 }
 0x27f   : > { %v5576_v30 = vpop.f32.mrb[139].mxu0 }
 0x280   : > { %v6414_v15 = vadd.f32 %v5574_v57, %v8011_v8  ;;  %v5577_v18 = vadd.f32 %v5576_v30, %v5575_v2  ;;  %v2470_v49 = vadd.f32 %v2469_v40, %v2439_v7 }
 0x282   : > { %v8231_v56 = vadd.f32 %v6414_v15, %v8132_v0  ;;  %v6422_v37 = vadd.f32 %v5577_v18, %v8018_v31 }
 0x284   : > { %v2400_v32 = vadd.f32 %v8231_v56, %v2399_v10  ;;  %v2440_v53 = vmul.f32 %v8231_v56, %v8231_v56  ;;  %v8238_v11 = vadd.f32 %v6422_v37, %v8142_v43  ;;  %v5578_v17 = vpop.f32.mrb[140].mxu0 }
 0x285   : > { %v5579_v38 = vpop.f32.mrb[141].mxu0 }
 0x286   : > { %v2471_v8 = vadd.f32 %v2470_v49, %v2440_v53  ;;  %v2401_v41 = vadd.f32 %v8238_v11, %v2400_v32  ;;  %v2441_v0 = vmul.f32 %v8238_v11, %v8238_v11  ;;  %v5580_v44 = vadd.f32 %v5579_v38, %v5578_v17  ;;  %v5581_v25 = vpop.f32.mrb[142].mxu0 }
 0x287   : > { %v5582_v31 = vpop.f32.mrb[143].mxu0 }
 0x288   : > { %v2472_v36 = vadd.f32 %v2471_v8, %v2441_v0  ;;  %v6410_v50 = vadd.f32 %v5580_v44, %v8007_v21  ;;  %v5583_v51 = vadd.f32 %v5582_v31, %v5581_v25 }
 0x28a   : > { %v8245_v54 = vadd.f32 %v6410_v50, %v8130_v29  ;;  %v6418_v43 = vadd.f32 %v5583_v51, %v8015_v9 }
 0x28c   : > { %v2402_v20 = vadd.f32 %v8245_v54, %v2401_v41  ;;  %v2442_v57 = vmul.f32 %v8245_v54, %v8245_v54  ;;  %v8252_v2 = vadd.f32 %v6418_v43, %v8140_v52  ;;  %v5584_v30 = vpop.f32.mrb[144].mxu0 }
 0x28d   : > { %v5585_v40 = vpop.f32.mrb[145].mxu0 }
 0x28e   : > { %v2473_v7 = vadd.f32 %v2472_v36, %v2442_v57  ;;  %v2403_v15 = vadd.f32 %v8252_v2, %v2402_v20  ;;  %v2443_v21 = vmul.f32 %v8252_v2, %v8252_v2  ;;  %v5586_v29 = vadd.f32 %v5585_v40, %v5584_v30  ;;  %v5587_v18 = vpop.f32.mrb[146].mxu0 }
 0x28f   : > { %v5588_v10 = vpop.f32.mrb[147].mxu0 }
 0x290   : > { %v2474_v9 = vadd.f32 %v2473_v7, %v2443_v21  ;;  %v6430_v37 = vadd.f32 %v5586_v29, %v8027_v12  ;;  %v5589_v49 = vadd.f32 %v5588_v10, %v5587_v18 }
 0x292   : > { %v8259_v32 = vadd.f32 %v6430_v37, %v8157_v39  ;;  %v6438_v52 = vadd.f32 %v5589_v49, %v8034_v42 }
 0x294   : > { %v2404_v53 = vadd.f32 %v8259_v32, %v2403_v15  ;;  %v2444_v17 = vmul.f32 %v8259_v32, %v8259_v32  ;;  %v8266_v38 = vadd.f32 %v6438_v52, %v8165_v14  ;;  %v5590_v8 = vpop.f32.mrb[148].mxu0 }
 0x295   : > { %v5591_v41 = vpop.f32.mrb[149].mxu0 }
 0x296   : > { %v2475_v0 = vadd.f32 %v2474_v9, %v2444_v17  ;;  %v2405_v44 = vadd.f32 %v8266_v38, %v2404_v53  ;;  %v2445_v12 = vmul.f32 %v8266_v38, %v8266_v38  ;;  %v5592_v39 = vadd.f32 %v5591_v41, %v5590_v8  ;;  %v5593_v25 = vpop.f32.mrb[150].mxu0 }
 0x297   : > { %v5594_v31 = vpop.f32.mrb[151].mxu0 }
 0x298   : > { %v2476_v42 = vadd.f32 %v2475_v0, %v2445_v12  ;;  %v6426_v36 = vadd.f32 %v5592_v39, %v8023_v27  ;;  %v5595_v50 = vadd.f32 %v5594_v31, %v5593_v25 }
 0x29a   : > { %v8273_v51 = vadd.f32 %v6426_v36, %v8155_v3  ;;  %v6434_v14 = vadd.f32 %v5595_v50, %v8031_v61  ;;  %v6825_v50 = vld [vmem:[#allocation8 + $0x40] sm:$0xff]  }
 0x29b   : > { %5768 = vmatprep.subr.bf16.mxu0 %v6825_v50 }
 0x29c   : > { %v2406_v43 = vadd.f32 %v8273_v51, %v2405_v44  ;;  %v2446_v20 = vmul.f32 %v8273_v51, %v8273_v51  ;;  %v8280_v57 = vadd.f32 %v6434_v14, %v8163_v34  ;;  %v5596_v30 = vpop.f32.mrb[152].mxu0 }
 0x29d   : > { %v5597_v40 = vpop.f32.mrb[153].mxu0 }
 0x29e   : > { %v2477_v7 = vadd.f32 %v2476_v42, %v2446_v20  ;;  %v2407_v15 = vadd.f32 %v8280_v57, %v2406_v43  ;;  %v2447_v27 = vmul.f32 %v8280_v57, %v8280_v57  ;;  %v5598_v3 = vadd.f32 %v5597_v40, %v5596_v30  ;;  %v5599_v21 = vpop.f32.mrb[154].mxu0 }
 0x29f   : > { %v5600_v29 = vpop.f32.mrb[155].mxu0 }
 0x2a0   : > { %v2478_v61 = vadd.f32 %v2477_v7, %v2447_v27  ;;  %v6446_v18 = vadd.f32 %v5598_v3, %v8043_v63  ;;  %v5601_v10 = vadd.f32 %v5600_v29, %v5599_v21 }
 0x2a2   : > { %v8287_v9 = vadd.f32 %v6446_v18, %v8180_v60  ;;  %v6454_v34 = vadd.f32 %v5601_v10, %v8050_v58 }
 0x2a4   : > { %v2408_v37 = vadd.f32 %v8287_v9, %v2407_v15  ;;  %v2448_v49 = vmul.f32 %v8287_v9, %v8287_v9  ;;  %v8294_v52 = vadd.f32 %v6454_v34, %v8189_v4  ;;  %v5602_v53 = vpop.f32.mrb[156].mxu0 }
 0x2a5   : > { %v5603_v17 = vpop.f32.mrb[157].mxu0 }
 0x2a6   : > { %v2479_v8 = vadd.f32 %v2478_v61, %v2448_v49  ;;  %v2409_v41 = vadd.f32 %v8294_v52, %v2408_v37  ;;  %v2449_v63 = vmul.f32 %v8294_v52, %v8294_v52  ;;  %v5604_v60 = vadd.f32 %v5603_v17, %v5602_v53  ;;  %v5605_v0 = vpop.f32.mrb[158].mxu0 }
 0x2a7   : > { %v5606_v44 = vpop.f32.mrb[159].mxu0 }
 0x2a8   : > { %v2480_v58 = vadd.f32 %v2479_v8, %v2449_v63  ;;  %v6442_v12 = vadd.f32 %v5604_v60, %v8039_v6  ;;  %v5607_v39 = vadd.f32 %v5606_v44, %v5605_v0 }
 0x2aa   : > { %v8301_v25 = vadd.f32 %v6442_v12, %v8178_v62  ;;  %v6450_v4 = vadd.f32 %v5607_v39, %v8047_v24 }
 0x2ac   : > { %v2410_v31 = vadd.f32 %v8301_v25, %v2409_v41  ;;  %v2450_v42 = vmul.f32 %v8301_v25, %v8301_v25  ;;  %v6451_v36 = vadd.f32 %v6450_v4, %v8185_v28 }
 0x2ae   : > { %v2481_v14 = vadd.f32 %v2480_v58, %v2450_v42  ;;  %v2411_v43 = vadd.f32 %v6451_v36, %v2410_v31  ;;  %v2451_v20 = vmul.f32 %v6451_v36, %v6451_v36 }
 0x2b0   : > { %v2412_v30 = vrot.slane %v2411_v43, 4  ;;  %v2482_v6 = vadd.f32 %v2481_v14, %v2451_v20 }
 0x2b2   : > { %v2413_v40 = vadd.f32 %v2412_v30, %v2411_v43  ;;  %v2483_v7 = vrot.slane %v2482_v6, 4 }
 0x2b4   : > { %v2414_v62 = vrot.slane %v2413_v40, 2  ;;  %v2484_v15 = vadd.f32 %v2483_v7, %v2482_v6 }
 0x2b6   : > { %v2415_v27 = vadd.f32 %v2414_v62, %v2413_v40  ;;  %v2485_v24 = vrot.slane %v2484_v15, 2 }
 0x2b8   : > { %v2416_v3 = vrot.slane %v2415_v27, 1  ;;  %v2486_v21 = vadd.f32 %v2485_v24, %v2484_v15 }
 0x2ba   : > { %v2417_v29 = vadd.f32 %v2416_v3, %v2415_v27  ;;  %v2487_v61 = vrot.slane %v2486_v21, 1 }
 0x2bc   : > { %v8308_v18 = vmul.f32 0.00390625, %v2417_v29  ;;  %v2488_v28 = vadd.f32 %v2487_v61, %v2486_v21 }
 0x2be   : > { %v2489_v10 = vmul.f32 0.00390625, %v2488_v28  ;;  %v2490_v34 = vmul.f32 %v8308_v18, %v8308_v18  ;;  %v2523_v37 = vsub.f32 %v6451_v36, %v8308_v18  ;;  %v2512_v17 = vsub.f32 %v8231_v56, %v8308_v18 }
 0x2bf   : > { %v2513_v8 = vsub.f32 %v8238_v11, %v8308_v18  ;;  %v2514_v41 = vsub.f32 %v8245_v54, %v8308_v18  ;;  %v2515_v63 = vsub.f32 %v8252_v2, %v8308_v18  ;;  %v2516_v60 = vsub.f32 %v8259_v32, %v8308_v18 }
 0x2c0   : > { %v2491_v49 = vsub.f32 %v2489_v10, %v2490_v34  ;;  %v2517_v0 = vsub.f32 %v8266_v38, %v8308_v18  ;;  %v2518_v44 = vsub.f32 %v8273_v51, %v8308_v18  ;;  %v2519_v56 = vsub.f32 %v8280_v57, %v8308_v18 }
 0x2c1   : > { %v2520_v11 = vsub.f32 %v8287_v9, %v8308_v18  ;;  %v2521_v54 = vsub.f32 %v8294_v52, %v8308_v18  ;;  %v2522_v2 = vsub.f32 %v8301_v25, %v8308_v18  ;;  %v2492_v32 = vsub.f32 %v8054_v16, %v8308_v18  ;;  %v9500_v16 = vld [vmem:[#allocation35_spill] sm:$0xff] }
 0x2c2   : > { %v2524_v53 = vadd.f32 1e-05, %v2491_v49  ;;  %v2493_v38 = vsub.f32 %v8056_v1, %v8308_v18  ;;  %v2494_v51 = vsub.f32 %v8059_v48, %v8308_v18  ;;  %v2495_v57 = vsub.f32 %v8062_v46, %v8308_v18  ;;  %v9501_v48 = vld [vmem:[#allocation48_spill] sm:$0xff] }
 0x2c3   : > { %v2496_v9 = vsub.f32 %v8065_v55, %v8308_v18  ;;  %v2497_v52 = vsub.f32 %v8070_v22, %v8308_v18  ;;  %v2498_v58 = vsub.f32 %v8077_v19, %v8308_v18  ;;  %v2499_v12 = vsub.f32 %v9500_v16, %v8308_v18  ;;  %v9502_v55 = vld [vmem:[#allocation42_spill] sm:$0xff]  ;;  %v9503_v22 = vld [vmem:[#allocation51_spill] sm:$0xff]  ;;  %v9504_v19 = vld [vmem:[#allocation45_spill] sm:$0xff] }
 0x2c4   : > { %6865 = vrsqrt.f32 %v2524_v53  ;;  %v2500_v1 = vsub.f32 %v8103_v35, %v8308_v18  ;;  %v2501_v39 = vsub.f32 %v9501_v48, %v8308_v18  ;;  %v2502_v46 = vsub.f32 %v8125_v5, %v8308_v18 }
 0x2c5   : > { %v2503_v25 = vsub.f32 %v9502_v55, %v8308_v18  ;;  %v2504_v4 = vsub.f32 %v9503_v22, %v8308_v18  ;;  %v2505_v31 = vsub.f32 %v9504_v19, %v8308_v18  ;;  %v2506_v42 = vsub.f32 %v8174_v45, %v8308_v18 }
 0x2c6   : > { %v2507_v35 = vsub.f32 %v8183_v59, %v8308_v18  ;;  %v2508_v50 = vsub.f32 %v8199_v26, %v8308_v18  ;;  %v2509_v5 = vsub.f32 %v8205_v47, %v8308_v18  ;;  %v2510_v14 = vsub.f32 %v8216_v13, %v8308_v18 }
 0x2c7   : > { %v2511_v43 = vsub.f32 %v8223_v33, %v8308_v18 }
 0x2ce   : > { %v6866_v36 = vpop.eup %6865 }
 0x2cf   : > { %v2557_v20 = vmul.f32 %v6866_v36, %v2523_v37  ;;  %v2526_v30 = vmul.f32 %v6866_v36, %v2492_v32  ;;  %v2527_v6 = vmul.f32 %v6866_v36, %v2493_v38  ;;  %v2528_v45 = vmul.f32 %v6866_v36, %v2494_v51 }
 0x2d0   : > { %v2529_v40 = vmul.f32 %v6866_v36, %v2495_v57  ;;  %v2530_v7 = vmul.f32 %v6866_v36, %v2496_v9  ;;  %v2531_v59 = vmul.f32 %v6866_v36, %v2497_v52  ;;  %v2532_v62 = vmul.f32 %v6866_v36, %v2498_v58 }
 0x2d1   : > { %v2589_v15 = vmax.f32 %v2557_v20, 0.0  ;;  %v2533_v27 = vmul.f32 %v6866_v36, %v2499_v12  ;;  %v2534_v26 = vmul.f32 %v6866_v36, %v2500_v1  ;;  %v2535_v24 = vmul.f32 %v6866_v36, %v2501_v39 }
 0x2d2   : > { %v2536_v3 = vmul.f32 %v6866_v36, %v2502_v46  ;;  %v2537_v47 = vmul.f32 %v6866_v36, %v2503_v25  ;;  %v2538_v21 = vmul.f32 %v6866_v36, %v2504_v4  ;;  %v2539_v29 = vmul.f32 %v6866_v36, %v2505_v31 }
 0x2d3   : > { %2621 = vst [vmem:[#allocation2 + $0x189] sm:$0xff] %v2589_v15  ;;  %v2540_v13 = vmul.f32 %v6866_v36, %v2506_v42  ;;  %v2541_v61 = vmul.f32 %v6866_v36, %v2507_v35  ;;  %v2542_v33 = vmul.f32 %v6866_v36, %v2508_v50  ;;  %v2543_v18 = vmul.f32 %v6866_v36, %v2509_v5 }
 0x2d4   : > { %v2544_v28 = vmul.f32 %v6866_v36, %v2510_v14  ;;  %v8375_v10 = vmul.f32 %v6866_v36, %v2511_v43  ;;  %v8377_v34 = vmul.f32 %v6866_v36, %v2512_v17  ;;  %v8379_v37 = vmul.f32 %v6866_v36, %v2513_v8 }
 0x2d5   : > { %v8381_v49 = vmul.f32 %v6866_v36, %v2514_v41  ;;  %v8383_v53 = vmul.f32 %v6866_v36, %v2515_v63  ;;  %v8385_v32 = vmul.f32 %v6866_v36, %v2516_v60  ;;  %v8387_v38 = vmul.f32 %v6866_v36, %v2517_v0 }
 0x2d6   : > { %v8389_v51 = vmul.f32 %v6866_v36, %v2518_v44  ;;  %v8391_v57 = vmul.f32 %v6866_v36, %v2519_v56  ;;  %v8393_v9 = vmul.f32 %v6866_v36, %v2520_v11  ;;  %v8395_v52 = vmul.f32 %v6866_v36, %v2521_v54 }
 0x2d7   : > { %v8397_v17 = vmul.f32 %v6866_v36, %v2522_v2  ;;  %v2558_v8 = vmax.f32 %v2526_v30, 0.0  ;;  %v2559_v58 = vmax.f32 %v2527_v6, 0.0  ;;  %v2560_v41 = vmax.f32 %v2528_v45, 0.0 }
 0x2d8   : > { %v2561_v16 = vmax.f32 %v2529_v40, 0.0  ;;  %v2562_v63 = vmax.f32 %v2530_v7, 0.0  ;;  %v2563_v12 = vmax.f32 %v2531_v59, 0.0  ;;  %v2564_v60 = vmax.f32 %v2532_v62, 0.0 }
 0x2d9   : > { %v2565_v1 = vmax.f32 %v2533_v27, 0.0  ;;  %v2566_v0 = vmax.f32 %v2534_v26, 0.0  ;;  %v2567_v48 = vmax.f32 %v2535_v24, 0.0  ;;  %v2568_v44 = vmax.f32 %v2536_v3, 0.0  ;;  %2590 = vst [vmem:[#allocation2 + $0x19] sm:$0xff] %v2558_v8  ;;  %2591 = vst [vmem:[#allocation2 + $0x21] sm:$0xff] %v2559_v58 }
 0x2da   : > { %2592 = vst [vmem:[#allocation2 + $0x31] sm:$0xff] %v2560_v41  ;;  %v2569_v56 = vmax.f32 %v2537_v47, 0.0  ;;  %v2570_v11 = vmax.f32 %v2538_v21, 0.0  ;;  %v2571_v54 = vmax.f32 %v2539_v29, 0.0  ;;  %v2572_v39 = vmax.f32 %v2540_v13, 0.0  ;;  %2593 = vst [vmem:[#allocation2 + $0x39] sm:$0xff] %v2561_v16 }
 0x2db   : > { %2594 = vst [vmem:[#allocation2 + $0x49] sm:$0xff] %v2562_v63  ;;  %2595 = vst [vmem:[#allocation2 + $0x51] sm:$0xff] %v2563_v12  ;;  %v2674_v2 = vld [vmem:[#allocation2 + $0x18f] sm:$0x1]  ;;  %v2573_v46 = vmax.f32 %v2541_v61, 0.0  ;;  %v2574_v55 = vmax.f32 %v2542_v33, 0.0 }
 0x2dc   : > { %2596 = vst [vmem:[#allocation2 + $0x61] sm:$0xff] %v2564_v60  ;;  %v2575_v25 = vmax.f32 %v2543_v18, 0.0  ;;  %v2576_v22 = vmax.f32 %v2544_v28, 0.0  ;;  %2597 = vst [vmem:[#allocation2 + $0x69] sm:$0xff] %v2565_v1  ;;  %v2577_v4 = vmax.f32 %v8375_v10, 0.0  ;;  %v2578_v19 = vmax.f32 %v8377_v34, 0.0 }
 0x2dd   : > { %2598 = vst [vmem:[#allocation2 + $0x79] sm:$0xff] %v2566_v0  ;;  %2599 = vst [vmem:[#allocation2 + $0x81] sm:$0xff] %v2567_v48  ;;  %v2579_v31 = vmax.f32 %v8379_v37, 0.0  ;;  %v2580_v42 = vmax.f32 %v8381_v49, 0.0  ;;  %v2581_v35 = vmax.f32 %v8383_v53, 0.0  ;;  %v2582_v36 = vmax.f32 %v8385_v32, 0.0 }
 0x2de   : > { %2600 = vst [vmem:[#allocation2 + $0x91] sm:$0xff] %v2568_v44  ;;  %2692 = vst [vmem:[#allocation2 + $0x191] sm:$0x1] %v2674_v2  ;;  %v2583_v50 = vmax.f32 %v8387_v38, 0.0  ;;  %v2584_v5 = vmax.f32 %v8389_v51, 0.0  ;;  %v2585_v14 = vmax.f32 %v8391_v57, 0.0 }
 0x2df   : > { %2601 = vst [vmem:[#allocation2 + $0x99] sm:$0xff] %v2569_v56  ;;  %2602 = vst [vmem:[#allocation2 + $0xa9] sm:$0xff] %v2570_v11  ;;  %v2586_v43 = vmax.f32 %v8393_v9, 0.0  ;;  %v2587_v20 = vmax.f32 %v8395_v52, 0.0  ;;  %v2588_v30 = vmax.f32 %v8397_v17, 0.0  ;;  %v6818_v48 = vld [vmem:[#allocation8 + $0x88] sm:$0xff]  }
 0x2e0   : > { %2603 = vst [vmem:[#allocation2 + $0xb1] sm:$0xff] %v2571_v54  ;;  %2604 = vst [vmem:[#allocation2 + $0xc1] sm:$0xff] %v2572_v39  ;;  %v2623_v6 = vld [vmem:[#allocation2 + $0x1a] sm:$0x1]  ;;  %v2659_v45 = vld [vmem:[#allocation2 + $0x27] sm:$0x1] }
 0x2e1   : > { %2605 = vst [vmem:[#allocation2 + $0xc9] sm:$0xff] %v2573_v46  ;;  %2606 = vst [vmem:[#allocation2 + $0xd9] sm:$0xff] %v2574_v55  ;;  %v2624_v40 = vld [vmem:[#allocation2 + $0x32] sm:$0x1]  ;;  %v2660_v7 = vld [vmem:[#allocation2 + $0x3f] sm:$0x1] }
 0x2e2   : > { %2607 = vst [vmem:[#allocation2 + $0xe1] sm:$0xff] %v2575_v25  ;;  %2608 = vst [vmem:[#allocation2 + $0xf1] sm:$0xff] %v2576_v22  ;;  %v2713_v59 = vld [vmem:[#allocation2 + $0x38] sm:$0xff]  ;;  %v2625_v62 = vld [vmem:[#allocation2 + $0x4a] sm:$0x1] }
 0x2e3   : > { %2609 = vst [vmem:[#allocation2 + $0xf9] sm:$0xff] %v2577_v4  ;;  %2610 = vst [vmem:[#allocation2 + $0x109] sm:$0xff] %v2578_v19  ;;  %v2661_v15 = vld [vmem:[#allocation2 + $0x57] sm:$0x1]  ;;  %v2626_v27 = vld [vmem:[#allocation2 + $0x62] sm:$0x1] }
 0x2e4   : > { %2611 = vst [vmem:[#allocation2 + $0x111] sm:$0xff] %v2579_v31  ;;  %2612 = vst [vmem:[#allocation2 + $0x121] sm:$0xff] %v2580_v42  ;;  %v2662_v26 = vld [vmem:[#allocation2 + $0x6f] sm:$0x1]  ;;  %v2627_v24 = vld [vmem:[#allocation2 + $0x7a] sm:$0x1] }
 0x2e5   : > { %2613 = vst [vmem:[#allocation2 + $0x129] sm:$0xff] %v2581_v35  ;;  %2614 = vst [vmem:[#allocation2 + $0x139] sm:$0xff] %v2582_v36  ;;  %v2663_v3 = vld [vmem:[#allocation2 + $0x87] sm:$0x1]  ;;  %v2628_v47 = vld [vmem:[#allocation2 + $0x92] sm:$0x1] }
 0x2e6   : > { %2615 = vst [vmem:[#allocation2 + $0x141] sm:$0xff] %v2583_v50  ;;  %2616 = vst [vmem:[#allocation2 + $0x151] sm:$0xff] %v2584_v5  ;;  %v2664_v21 = vld [vmem:[#allocation2 + $0x9f] sm:$0x1]  ;;  %v2629_v29 = vld [vmem:[#allocation2 + $0xaa] sm:$0x1] }
 0x2e7   : > { %2617 = vst [vmem:[#allocation2 + $0x159] sm:$0xff] %v2585_v14  ;;  %2618 = vst [vmem:[#allocation2 + $0x169] sm:$0xff] %v2586_v43  ;;  %v2665_v13 = vld [vmem:[#allocation2 + $0xb7] sm:$0x1]  ;;  %v2710_v61 = vld [vmem:[#allocation2 + $0x20] sm:$0xff] }
 0x2e8   : > { %2620 = vst [vmem:[#allocation2 + $0x181] sm:$0xff] %v2588_v30  ;;  %2619 = vst [vmem:[#allocation2 + $0x171] sm:$0xff] %v2587_v20  ;;  %v2630_v33 = vld [vmem:[#allocation2 + $0xc2] sm:$0x1]  ;;  %v2666_v18 = vld [vmem:[#allocation2 + $0xcf] sm:$0x1] }
 0x2e9   : > { %2641 = vst [vmem:[#allocation2 + $0x18] sm:$0x1] %v2623_v6  ;;  %2677 = vst [vmem:[#allocation2 + $0x29] sm:$0x1] %v2659_v45  ;;  %v2631_v34 = vld [vmem:[#allocation2 + $0xda] sm:$0x1] }
 0x2ea   : > { %2642 = vst [vmem:[#allocation2 + $0x30] sm:$0x1] %v2624_v40  ;;  %2678 = vst [vmem:[#allocation2 + $0x41] sm:$0x1] %v2660_v7  ;;  %v2667_v38 = vld [vmem:[#allocation2 + $0xe7] sm:$0x1] }
 0x2eb   : > { %2698 = vst [vmem:[#allocation2 + $0x8] sm:$0xff] %v2713_v59  ;;  %2643 = vst [vmem:[#allocation2 + $0x48] sm:$0x1] %v2625_v62  ;;  %v2716_v52 = vld [vmem:[#allocation2 + $0x50] sm:$0xff]  ;;  %v2719_v4 = vld [vmem:[#allocation2 + $0x68] sm:$0xff] }
 0x2ec   : > { %2679 = vst [vmem:[#allocation2 + $0x59] sm:$0x1] %v2661_v15  ;;  %2644 = vst [vmem:[#allocation2 + $0x60] sm:$0x1] %v2626_v27  ;;  %v2722_v50 = vld [vmem:[#allocation2 + $0x80] sm:$0xff]  ;;  %v6826_v45 = vld [vmem:[#allocation8] sm:$0xff]  }
 0x2ed   : > { %2680 = vst [vmem:[#allocation2 + $0x71] sm:$0x1] %v2662_v26  ;;  %2645 = vst [vmem:[#allocation2 + $0x78] sm:$0x1] %v2627_v24  ;;  %v8448_v30 = vld [vmem:[#allocation8 + $0x90] sm:$0xff]   ;;  %v6831_v15 = vld [vmem:[#allocation8 + $0x48] sm:$0xff]  }
 0x2ee   : > { %2681 = vst [vmem:[#allocation2 + $0x89] sm:$0x1] %v2663_v3  ;;  %2646 = vst [vmem:[#allocation2 + $0x90] sm:$0x1] %v2628_v47  ;;  %v2632_v6 = vld [vmem:[#allocation2 + $0xf2] sm:$0x1] }
 0x2ef   : > { %2682 = vst [vmem:[#allocation2 + $0xa1] sm:$0x1] %v2664_v21  ;;  %2647 = vst [vmem:[#allocation2 + $0xa8] sm:$0x1] %v2629_v29  ;;  %v2668_v47 = vld [vmem:[#allocation2 + $0xff] sm:$0x1] }
 0x2f0   : > { %2683 = vst [vmem:[#allocation2 + $0xb9] sm:$0x1] %v2665_v13  ;;  %v2709_v28 = vld [vmem:[#allocation2 + $0x18] sm:$0xff]  ;;  %v2711_v10 = vld [vmem:[#allocation2 + $0x28] sm:$0x3] }
 0x2f1   : > { %2648 = vst [vmem:[#allocation2 + $0xc0] sm:$0x1] %v2630_v33  ;;  %2684 = vst [vmem:[#allocation2 + $0xd1] sm:$0x1] %v2666_v18  ;;  %v8411_v37 = vpack.c.bf16 %v2710_v61, %v2709_v28  ;;  %v2763_v49 = vpack.c.bf16 %v2711_v10, %v2711_v10  ;;  %v2712_v53 = vld [vmem:[#allocation2 + $0x30] sm:$0xff]  ;;  %v8463_v18 = vld [vmem:[#allocation8 + $0x98] sm:$0xff]  }
 0x2f2   : > { %v2714_v32 = vld [vmem:[#allocation2 + $0x40] sm:$0x3]  ;;  %2649 = vst [vmem:[#allocation2 + $0xd8] sm:$0x1] %v2631_v34  ;;  %v8413_v51 = vpack.c.bf16 %v2713_v59, %v2712_v53  ;;  %v2715_v9 = vld [vmem:[#allocation2 + $0x48] sm:$0xff]  ;;  %2697 = vst [vmem:[#allocation2] sm:$0xff] %v2712_v53 }
 0x2f3   : > { %v2765_v57 = vpack.c.bf16 %v2714_v32, %v2714_v32  ;;  %v2717_v17 = vld [vmem:[#allocation2 + $0x58] sm:$0x3]  ;;  %2685 = vst [vmem:[#allocation2 + $0xe9] sm:$0x1] %v2667_v38  ;;  %v3069_v8 = vrot.slane %v8411_v37, 1  ;;  %v3070_v58 = vrot.slane %v2763_v49, 1  ;;  %v8416_v41 = vpack.c.bf16 %v2716_v52, %v2715_v9 }
 0x2f4   : > { %v8418_v16 = vpack.c.bf16 %v2717_v17, %v2717_v17  ;;  %v9414_v63 = vrot.slane %v8413_v51, 1  ;;  %v2809_v60 = vshrl.u32 %v8411_v37, 16  ;;  %v2811_v1 = vshll.u32 %v8411_v37, 16  ;;  %v2718_v0 = vld [vmem:[#allocation2 + $0x60] sm:$0xff]  ;;  %v2720_v39 = vld [vmem:[#allocation2 + $0x70] sm:$0x3] }
 0x2f5   : > { %v3073_v12 = vrot.slane %v2765_v57, 1  ;;  %v8424_v44 = vsel %vm732_vm1, %v3069_v8, %v3070_v58  ;;  %v3075_v56 = vrot.slane %v8416_v41, 1  ;;  %v2816_v54 = vshll.u32 %v2763_v49, 16  ;;  %v2721_v2 = vld [vmem:[#allocation2 + $0x78] sm:$0xff]  ;;  %v2723_v19 = vld [vmem:[#allocation2 + $0x88] sm:$0x3] }
 0x2f6   : > { %v3076_v11 = vrot.slane %v8418_v16, 1  ;;  %6200 = vmatprep.mubr.bf16.mxu1 %v8424_v44  ;;  %v2813_v55 = vrot.slane %v2811_v1, 1  ;;  %v2821_v25 = vshrl.u32 %v8413_v51, 16  ;;  %v2823_v22 = vshll.u32 %v8413_v51, 16  ;;  %v2724_v59 = vld [vmem:[#allocation2 + $0x90] sm:$0xff]  ;;  %v2727_v33 = vld [vmem:[#allocation2 + $0xa8] sm:$0xff] }
 0x2f7   : > { %v8432_v46 = vsel %vm732_vm1, %v9414_v63, %v3073_v12  ;;  %v2818_v42 = vrot.slane %v2816_v54, 1  ;;  %v2828_v35 = vshll.u32 %v2765_v57, 16  ;;  %v8440_v36 = vpack.c.bf16 %v2719_v4, %v2718_v0  ;;  %v2726_v62 = vld [vmem:[#allocation2 + $0xa0] sm:$0x3]  ;;  %2650 = vst [vmem:[#allocation2 + $0xf0] sm:$0x1] %v2632_v6 }
 0x2f8   : > { %6201 = vmatmul.mubr.bf16.vlgmr.msra.gmra.mrb[96].mxu1 %v8432_v46  ;;  %v8438_v31 = vsel %vm732_vm1, %v3075_v56, %v3076_v11  ;;  %v2814_v5 = vor.u32 %v2813_v55, %v2809_v60  ;;  %v2825_v14 = vrot.slane %v2823_v22, 1  ;;  %v8444_v43 = vpack.c.bf16 %v2720_v39, %v2720_v39  ;;  %v2729_v3 = vld [vmem:[#allocation2 + $0xb8] sm:$0x3]  ;;  %v2633_v21 = vld [vmem:[#allocation2 + $0x10a] sm:$0x1]  ;;  %v8470_v53 = vld [vmem:[#allocation2 + $0x170] sm:$0xff] }
 0x2f9   : > { %6204 = vmatprep.mubr.bf16.mxu1 %v8438_v31  ;;  %6233 = vmatpush3.bf16.msra.mxu1 %v8195_v23  ;;  %v8446_v20 = vpack.c.bf16 %v2722_v50, %v2721_v2  ;;  %v2830_v40 = vrot.slane %v2828_v35, 1  ;;  %v8450_v7 = vpack.c.bf16 %v2723_v19, %v2723_v19  ;;  %v3078_v26 = vrot.slane %v8440_v36, 1  ;;  %2686 = vst [vmem:[#allocation2 + $0x101] sm:$0x1] %v2668_v47  ;;  %v2669_v28 = vld [vmem:[#allocation2 + $0x117] sm:$0x1] }
 0x2fa   : > { %6234 = vmatprep.subr.bf16.mxu1 %v6818_v48  ;;  %v8453_v23 = vsel %vm461_vm0, %v2814_v5, %v2818_v42  ;;  %v8455_v27 = vor.u32 %v2825_v14, %v2821_v25  ;;  %v3079_v24 = vrot.slane %v8444_v43, 1  ;;  %v2835_v61 = vshll.u32 %v8416_v41, 16  ;;  %2651 = vst [vmem:[#allocation2 + $0x108] sm:$0x1] %v2633_v21  ;;  %2687 = vst [vmem:[#allocation2 + $0x119] sm:$0x1] %v2669_v28 }
 0x2fb   : > { %3411 = vmatprep.mubr.bf16.mxu0 %v8453_v23  ;;  %v3081_v29 = vrot.slane %v8446_v20, 1  ;;  %v3082_v13 = vrot.slane %v8450_v7, 1  ;;  %v2634_v34 = vld [vmem:[#allocation2 + $0x122] sm:$0x1]  ;;  %v2670_v49 = vld [vmem:[#allocation2 + $0x12f] sm:$0x1]  ;;  %v8482_v12 = vpack.c.bf16 %v2726_v62, %v2726_v62  ;;  %v8490_v11 = vpack.c.bf16 %v2729_v3, %v2729_v3 }
 0x2fc   : > { %3412 = vmatmul.mubr.bf16.vlgmr.msra.gmra.mrb[160].mxu0 %v8411_v37  ;;  %v8468_v10 = vsel %vm461_vm0, %v8455_v27, %v2830_v40  ;;  %v2833_v32 = vshrl.u32 %v8416_v41, 16  ;;  %v2837_v38 = vrot.slane %v2835_v61, 1  ;;  %v2725_v57 = vld [vmem:[#allocation2 + $0x98] sm:$0xff]  ;;  %2652 = vst [vmem:[#allocation2 + $0x120] sm:$0x1] %v2634_v34  ;;  %2704 = vst [vmem:[#allocation2 + $0x1a0] sm:$0xff] %v8470_v53  ;;  %v8477_v17 = vsel %vm732_vm1, %v3078_v26, %v3079_v24 }
 0x2fd   : > { %6235 = vmatpush3.bf16.msra.mxu1 %v6818_v48  ;;  %3419 = vmatprep.mubr.bf16.mxu0 %v8468_v10  ;;  %2688 = vst [vmem:[#allocation2 + $0x131] sm:$0x1] %v2670_v49  ;;  %v2635_v9 = vld [vmem:[#allocation2 + $0x13a] sm:$0x1]  ;;  %v2840_v8 = vshll.u32 %v8418_v16, 16  ;;  %v8480_v58 = vpack.c.bf16 %v2725_v57, %v2724_v59  ;;  %v2728_v60 = vld [vmem:[#allocation2 + $0xb0] sm:$0xff]  ;;  %v8486_v48 = vsel %vm732_vm1, %v3081_v29, %v3082_v13 }
 0x2fe   : > { %6236 = vmatprep.subr.bf16.mxu1 %v8448_v30  ;;  %v6832_v52 = vld [vmem:[#allocation8 + $0x8] sm:$0xff]   ;;  %2653 = vst [vmem:[#allocation2 + $0x138] sm:$0x1] %v2635_v9  ;;  %v2671_v1 = vld [vmem:[#allocation2 + $0x147] sm:$0x1]  ;;  %5769 = vmatpush3.bf16.msra.mxu0 %v6826_v45  ;;  %v8488_v56 = vpack.c.bf16 %v2728_v60, %v2727_v33  ;;  %v2838_v2 = vor.u32 %v2837_v38, %v2833_v32  ;;  %v2847_v55 = vshll.u32 %v8440_v36, 16 }
 0x2ff   : > { %v2636_v0 = vld [vmem:[#allocation2 + $0x152] sm:$0x1]  ;;  %2689 = vst [vmem:[#allocation2 + $0x149] sm:$0x1] %v2671_v1  ;;  %v2672_v16 = vld [vmem:[#allocation2 + $0x15f] sm:$0x1]  ;;  %5770 = vmatprep.subr.bf16.mxu0 %v6831_v15 }
 0x300   : > { %6205 = vmatmul.mubr.bf16.gmra.mrb[100].mxu1 %v8477_v17  ;;  %2654 = vst [vmem:[#allocation2 + $0x150] sm:$0x1] %v2636_v0  ;;  %v2637_v54 = vld [vmem:[#allocation2 + $0x16a] sm:$0x1]  ;;  %v6837_v39 = vld [vmem:[#allocation8 + $0x50] sm:$0xff]   ;;  %v6821_v22 = vld [vmem:[#allocation8 + $0xa0] sm:$0xff]  }
 0x301   : > { %6208 = vmatprep.mubr.bf16.mxu1 %v8486_v48  ;;  %6237 = vmatpush3.bf16.msra.mxu1 %v8448_v30  ;;  %2690 = vst [vmem:[#allocation2 + $0x161] sm:$0x1] %v2672_v16  ;;  %2655 = vst [vmem:[#allocation2 + $0x168] sm:$0x1] %v2637_v54  ;;  %v2673_v25 = vld [vmem:[#allocation2 + $0x177] sm:$0x1] }
 0x302   : > { %6238 = vmatprep.subr.bf16.mxu1 %v8463_v18  ;;  %2691 = vst [vmem:[#allocation2 + $0x179] sm:$0x1] %v2673_v25  ;;  %v2638_v4 = vld [vmem:[#allocation2 + $0x182] sm:$0x1]  ;;  %v2842_v42 = vrot.slane %v2840_v8, 1  ;;  %v3084_v35 = vrot.slane %v8480_v58, 1  ;;  %5771 = vmatpush3.bf16.msra.mxu0 %v6832_v52 }
 0x303   : > { %v6838_v19 = vld [vmem:[#allocation8 + $0x10] sm:$0xff]   ;;  %v3085_v50 = vrot.slane %v8482_v12, 1  ;;  %v2732_v14 = vld [vmem:[#allocation2 + $0xd0] sm:$0x3]  ;;  %2656 = vst [vmem:[#allocation2 + $0x180] sm:$0x1] %v2638_v4  ;;  %5772 = vmatprep.subr.bf16.mxu0 %v6837_v39 }
 0x304   : > { %v2730_v5 = vld [vmem:[#allocation2 + $0xc0] sm:$0xff]  ;;  %v3087_v30 = vrot.slane %v8488_v56, 1  ;;  %v3088_v6 = vrot.slane %v8490_v11, 1  ;;  %v6843_v45 = vld [vmem:[#allocation8 + $0x58] sm:$0xff]   ;;  %3420 = vmatmul.mubr.bf16.gmra.mrb[164].mxu0 %v8413_v51  ;;  %v8502_v40 = vsel %vm461_vm0, %v2838_v2, %v2842_v42  ;;  %v2849_v59 = vrot.slane %v2847_v55, 1  ;;  %v2733_v15 = vld [vmem:[#allocation2 + $0xd8] sm:$0xff] }
 0x305   : > { %v2731_v62 = vld [vmem:[#allocation2 + $0xc8] sm:$0xff]  ;;  %6239 = vmatpush3.bf16.msra.mxu1 %v8463_v18  ;;  %3427 = vmatprep.mubr.bf16.mxu0 %v8502_v40  ;;  %v8508_v3 = vpack.c.bf16 %v2732_v14, %v2732_v14  ;;  %v6822_v47 = vld [vmem:[#allocation8 + $0xa8] sm:$0xff]   ;;  %v2696_v21 = vld [vmem:[#allocation2 + $0x40] sm:$0x3]  ;;  %v8511_v29 = vsel %vm732_vm1, %v3084_v35, %v3085_v50  ;;  %v2845_v13 = vshrl.u32 %v8440_v36, 16  ;;  %v2852_v61 = vshll.u32 %v8444_v43, 16 }
 0x306   : > { %v2735_v26 = vld [vmem:[#allocation2 + $0xe8] sm:$0x3]  ;;  %v8506_v24 = vpack.c.bf16 %v2731_v62, %v2730_v5  ;;  %6240 = vmatprep.subr.bf16.mxu1 %v6821_v22  ;;  %v2734_v33 = vld [vmem:[#allocation2 + $0xe0] sm:$0xff]  ;;  %2699 = vst [vmem:[#allocation2 + $0x10] sm:$0x3] %v2696_v21  ;;  %5773 = vmatpush3.bf16.msra.mxu0 %v6838_v19  ;;  %v8517_v28 = vsel %vm732_vm1, %v3087_v30, %v3088_v6  ;;  %v6847_v38 = vld [vmem:[#allocation8 + $0x60] sm:$0xff]  }
 0x307   : > { %v6844_v18 = vld [vmem:[#allocation8 + $0x18] sm:$0xff]   ;;  %v8519_v34 = vpack.c.bf16 %v2734_v33, %v2733_v15  ;;  %v8521_v49 = vpack.c.bf16 %v2735_v26, %v2735_v26  ;;  %5774 = vmatprep.subr.bf16.mxu0 %v6843_v45  ;;  %v2850_v43 = vor.u32 %v2849_v59, %v2845_v13  ;;  %v2859_v57 = vshll.u32 %v8446_v20, 16  ;;  %v6823_v8 = vld [vmem:[#allocation8 + $0xb0] sm:$0xff]   ;;  %v6848_v0 = vld [vmem:[#allocation8 + $0x20] sm:$0xff]  }
 0x308   : > { %6209 = vmatmul.mubr.bf16.gmra.mrb[104].mxu1 %v8511_v29  ;;  %v8523_v32 = vld [vmem:[#allocation2 + $0x168] sm:$0xff]  ;;  %v3090_v9 = vrot.slane %v8506_v24, 1  ;;  %v3091_v52 = vrot.slane %v8508_v3, 1  ;;  %v2854_v60 = vrot.slane %v2852_v61, 1  ;;  %v2738_v1 = vld [vmem:[#allocation2 + $0x100] sm:$0x3] }
 0x309   : > { %6212 = vmatprep.mubr.bf16.mxu1 %v8517_v28  ;;  %6241 = vmatpush3.bf16.msra.mxu1 %v6821_v22  ;;  %2703 = vst [vmem:[#allocation2 + $0x198] sm:$0xff] %v8523_v32  ;;  %v3093_v16 = vrot.slane %v8519_v34, 1  ;;  %v3094_v54 = vrot.slane %v8521_v49, 1  ;;  %v2736_v39 = vld [vmem:[#allocation2 + $0xf0] sm:$0xff]  ;;  %v6849_v2 = vld [vmem:[#allocation8 + $0x68] sm:$0xff]   ;;  %v2861_v22 = vrot.slane %v2859_v57, 1  ;;  %v8544_v6 = vpack.c.bf16 %v2738_v1, %v2738_v1 }
 0x30a   : > { %6242 = vmatprep.subr.bf16.mxu1 %v6822_v47  ;;  %5775 = vmatpush3.bf16.msra.mxu0 %v6844_v18  ;;  %v2702_v55 = vld [vmem:[#allocation2 + $0x178] sm:$0x3]  ;;  %v8534_v25 = vsel %vm461_vm0, %v2850_v43, %v2854_v60  ;;  %v2739_v4 = vld [vmem:[#allocation2 + $0x108] sm:$0xff]  ;;  %v8538_v42 = vsel %vm732_vm1, %v3090_v9, %v3091_v52  ;;  %v2857_v5 = vshrl.u32 %v8446_v20, 16  ;;  %v2864_v14 = vshll.u32 %v8450_v7, 16  ;;  %v2740_v45 = vld [vmem:[#allocation2 + $0x110] sm:$0xff] }
 0x30b   : > { %5776 = vmatprep.subr.bf16.mxu0 %v6847_v38  ;;  %v2741_v19 = vld [vmem:[#allocation2 + $0x118] sm:$0x3]  ;;  %2705 = vst [vmem:[#allocation2 + $0x1a8] sm:$0x3] %v2702_v55  ;;  %v6824_v50 = vld [vmem:[#allocation8 + $0xb8] sm:$0xff]   ;;  %v8548_v62 = vsel %vm732_vm1, %v3093_v16, %v3094_v54  ;;  %v8550_v15 = vpack.c.bf16 %v2740_v45, %v2739_v4  ;;  %v2871_v21 = vshll.u32 %v8480_v58, 16 }
 0x30c   : > { %3428 = vmatmul.mubr.bf16.gmra.mrb[168].mxu0 %v8416_v41  ;;  %v2737_v35 = vld [vmem:[#allocation2 + $0xf8] sm:$0xff]  ;;  %v8552_v26 = vpack.c.bf16 %v2741_v19, %v2741_v19  ;;  %v2862_v7 = vor.u32 %v2861_v22, %v2857_v5  ;;  %v6827_v13 = vld [vmem:[#allocation8 + $0x1c0] sm:$0xff]   ;;  %v2866_v61 = vrot.slane %v2864_v14, 1  ;;  %v3097_v18 = vrot.slane %v8544_v6, 1  ;;  %v6854_v38 = vld [vmem:[#allocation8 + $0x30] sm:$0xff]  }
 0x30d   : > { %6243 = vmatpush3.bf16.msra.mxu1 %v6822_v47  ;;  %3435 = vmatprep.mubr.bf16.mxu0 %v8534_v25  ;;  %v8542_v30 = vpack.c.bf16 %v2737_v35, %v2736_v39  ;;  %v6851_v59 = vld [vmem:[#allocation8 + $0x28] sm:$0xff]   ;;  %v6853_v47 = vld [vmem:[#allocation8 + $0x70] sm:$0xff]   ;;  %v3099_v43 = vrot.slane %v8550_v15, 1  ;;  %v2744_v52 = vld [vmem:[#allocation2 + $0x130] sm:$0x3]  ;;  %v2873_v1 = vrot.slane %v2871_v21, 1 }
 0x30e   : > { %6244 = vmatprep.subr.bf16.mxu1 %v6823_v8  ;;  %5777 = vmatpush3.bf16.msra.mxu0 %v6848_v0  ;;  %v3100_v57 = vrot.slane %v8552_v26, 1  ;;  %v2742_v9 = vld [vmem:[#allocation2 + $0x120] sm:$0xff]  ;;  %v6855_v60 = vld [vmem:[#allocation8 + $0x78] sm:$0xff]   ;;  %v2745_v0 = vld [vmem:[#allocation2 + $0x138] sm:$0xff]  ;;  %v2869_v54 = vshrl.u32 %v8480_v58, 16  ;;  %v2876_v55 = vshll.u32 %v8482_v12, 16  ;;  %v8572_v4 = vpack.c.bf16 %v2744_v52, %v2744_v52 }
 0x30f   : > { %5778 = vmatprep.subr.bf16.mxu0 %v6849_v2  ;;  %v3096_v33 = vrot.slane %v8542_v30, 1  ;;  %v2747_v16 = vld [vmem:[#allocation2 + $0x148] sm:$0x3]  ;;  %v2746_v19 = vld [vmem:[#allocation2 + $0x140] sm:$0xff]  ;;  %v2883_v45 = vshll.u32 %v8488_v56, 16  ;;  %v2881_v52 = vshrl.u32 %v8488_v56, 16 }
 0x310   : > { %6213 = vmatmul.mubr.bf16.gmra.mrb[108].mxu1 %v8538_v42  ;;  %v2743_v39 = vld [vmem:[#allocation2 + $0x128] sm:$0xff]  ;;  %v8578_v5 = vpack.c.bf16 %v2746_v19, %v2745_v0  ;;  %v8580_v14 = vpack.c.bf16 %v2747_v16, %v2747_v16  ;;  %v2874_v12 = vor.u32 %v2873_v1, %v2869_v54  ;;  %v3103_v21 = vrot.slane %v8572_v4, 1 }
 0x311   : > { %6216 = vmatprep.mubr.bf16.mxu1 %v8548_v62  ;;  %6245 = vmatpush3.bf16.msra.mxu1 %v6823_v8  ;;  %v8562_v8 = vsel %vm461_vm0, %v2862_v7, %v2866_v61  ;;  %v8567_v2 = vsel %vm732_vm1, %v3096_v33, %v3097_v18  ;;  %v8570_v22 = vpack.c.bf16 %v2743_v39, %v2742_v9  ;;  %v6857_v35 = vld [vmem:[#allocation8 + $0x38] sm:$0xff]   ;;  %v2748_v33 = vld [vmem:[#allocation2 + $0x150] sm:$0xff]  ;;  %v2750_v18 = vld [vmem:[#allocation2 + $0x160] sm:$0x3]  ;;  %v2888_v0 = vshll.u32 %v8490_v11, 16 }
 0x312   : > { %6246 = vmatprep.subr.bf16.mxu1 %v6824_v50  ;;  %5779 = vmatpush3.bf16.msra.mxu0 %v6851_v59  ;;  %v2708_v59 = vld [vmem:[#allocation2 + $0x10] sm:$0x3]  ;;  %v3106_v61 = vrot.slane %v8580_v14, 1  ;;  %v8600_v54 = vpack.c.bf16 %v2750_v18, %v2750_v18  ;;  %v2759_v39 = vld [vmem:[#allocation2 + $0x1a8] sm:$0x3]  ;;  %v8608_v19 = vpack.c.bf16 %v8470_v53, %v8523_v32  ;;  %v2895_v11 = vshll.u32 %v8506_v24, 16 }
 0x313   : > { %5780 = vmatprep.subr.bf16.mxu0 %v6853_v47  ;;  %v2878_v47 = vrot.slane %v2876_v55, 1  ;;  %v3102_v7 = vrot.slane %v8570_v22, 1  ;;  %v2761_v9 = vpack.c.bf16 %v2708_v59, %v2708_v59  ;;  %v8614_v59 = vpack.c.bf16 %v2759_v39, %v2759_v39  ;;  %v2754_v32 = vld [vmem:[#allocation2 + $0x180] sm:$0xff] }
 0x314   : > { %3436 = vmatmul.mubr.bf16.gmra.mrb[172].mxu0 %v8440_v36  ;;  %v2900_v63 = vshll.u32 %v8508_v3, 16 }
 0x315   : > { %6247 = vmatpush3.bf16.msra.mxu1 %v6824_v50  ;;  %3443 = vmatprep.mubr.bf16.mxu0 %v8562_v8  ;;  %v8576_v50 = vsel %vm732_vm1, %v3099_v43, %v3100_v57  ;;  %v2885_v43 = vrot.slane %v2883_v45, 1  ;;  %v2753_v57 = vld [vmem:[#allocation2 + $0x178] sm:$0x3]  ;;  %v8595_v1 = vsel %vm732_vm1, %v3102_v7, %v3103_v21  ;;  %v2804_v45 = vshll.u32 %v2761_v9, 16 }
 0x316   : > { %5904 = vmatprep.subr.bf16.mxu1 %v6827_v13  ;;  %5781 = vmatpush3.bf16.msra.mxu0 %v6854_v38  ;;  %v3105_v13 = vrot.slane %v8578_v5, 1  ;;  %v8590_v38 = vsel %vm461_vm0, %v2874_v12, %v2878_v47  ;;  %v2890_v47 = vrot.slane %v2888_v0, 1  ;;  %v3109_v21 = vrot.slane %v8600_v54, 1  ;;  %v2755_v0 = vld [vmem:[#allocation2 + $0x188] sm:$0xff] }
 0x317   : > { %5782 = vmatprep.subr.bf16.mxu0 %v6855_v60  ;;  %v2749_v60 = vld [vmem:[#allocation2 + $0x158] sm:$0xff]  ;;  %v2886_v12 = vor.u32 %v2885_v43, %v2881_v52  ;;  %v3118_v18 = vrot.slane %v8614_v59, 1  ;;  %v3067_v3 = vrot.slane %v2761_v9, 1 }
 0x318   : > { %6217 = vmatmul.mubr.bf16.gmra.mrb[112].mxu1 %v8567_v2  ;;  %v8598_v16 = vpack.c.bf16 %v2749_v60, %v2748_v33  ;;  %v8604_v55 = vsel %vm732_vm1, %v3105_v13, %v3106_v61  ;;  %v2806_v13 = vrot.slane %v2804_v45, 1  ;;  %v3111_v61 = vrot.slane %v8608_v19, 1  ;;  %v2756_v33 = vld [vmem:[#allocation2 + $0x190] sm:$0x3] }
 0x319   : > { %6220 = vmatprep.mubr.bf16.mxu1 %v8576_v50  ;;  %v8623_v43 = vsel %vm461_vm0, %v2886_v12, %v2890_v47  ;;  %v2893_v60 = vshrl.u32 %v8506_v24, 16  ;;  %v8638_v12 = vpack.c.bf16 %v2755_v0, %v2754_v32  ;;  %v2919_v0 = vshll.u32 %v8542_v30, 16 }
 0x31a   : > { %5783 = vmatpush3.bf16.msra.mxu0 %v6857_v35  ;;  %v8610_v35 = vpack.c.bf16 %v2753_v57, %v2753_v57  ;;  %v3108_v7 = vrot.slane %v8598_v16, 1  ;;  %v2897_v57 = vrot.slane %v2895_v11, 1  ;;  %v8627_v52 = vsel %vm461_vm0, %v8455_v27, %v2806_v13 }
 0x31b   : > { %v8632_v39 = vsel %vm732_vm1, %v3111_v61, %v3118_v18  ;;  %v8640_v11 = vpack.c.bf16 %v2756_v33, %v2756_v33  ;;  %v2907_v13 = vshll.u32 %v8519_v34, 16  ;;  %v2902_v18 = vrot.slane %v2900_v63, 1 }
 0x31c   : > { %3444 = vmatmul.mubr.bf16.gmra.mrb[176].mxu0 %v8446_v20  ;;  %v3112_v53 = vrot.slane %v8610_v35, 1  ;;  %9505 = vst [vmem:[#allocation53_spill] sm:$0xff] %v8632_v39  ;;  %v8635_v45 = vsel %vm732_vm1, %v3108_v7, %v3109_v21  ;;  %v2898_v47 = vor.u32 %v2897_v57, %v2893_v60  ;;  %v3114_v7 = vrot.slane %v8638_v12, 1 }
 0x31d   : > { %3451 = vmatprep.mubr.bf16.mxu0 %v8590_v38  ;;  %v3115_v21 = vrot.slane %v8640_v11, 1  ;;  %v2909_v33 = vrot.slane %v2907_v13, 1  ;;  %v2912_v63 = vshll.u32 %v8521_v49, 16  ;;  %v9506_v57 = vrot.slane %v8413_v51, 1  ;;  %v6829_v49 = vld [vmem:[#allocation8 + $0x1c8] sm:$0xff]  }
 0x31e   : > { %v8644_v27 = vsel %vm732_vm1, %v3111_v61, %v3112_v53  ;;  %v8652_v32 = vsel %vm461_vm0, %v2898_v47, %v2902_v18  ;;  %v2905_v53 = vshrl.u32 %v8519_v34, 16  ;;  %v6828_v18 = vld [vmem:[#allocation8 + $0x180] sm:$0xff]   ;;  %v2924_v39 = vshll.u32 %v8544_v6, 16  ;;  %v6834_v6 = vld [vmem:[#allocation8 + $0x190] sm:$0xff]  }
 0x31f   : > { %v8656_v61 = vsel %vm732_vm1, %v3114_v7, %v3115_v21  ;;  %v3068_v9 = vsel %vm732_vm1, %v9506_v57, %v3067_v3  ;;  %v2914_v47 = vrot.slane %v2912_v63, 1  ;;  %v2921_v7 = vrot.slane %v2919_v0, 1  ;;  %v6833_v63 = vld [vmem:[#allocation8 + $0x1d0] sm:$0xff]  }
 0x320   : > { %6221 = vmatmul.mubr.bf16.gmra.mrb[116].mxu1 %v8595_v1  ;;  %v2910_v60 = vor.u32 %v2909_v33, %v2905_v53  ;;  %v2917_v21 = vshrl.u32 %v8542_v30, 16  ;;  %v6830_v33 = vld [vmem:[#allocation8 + $0x188] sm:$0xff]   ;;  %v2931_v53 = vshll.u32 %v8550_v15, 16  ;;  %v2926_v57 = vrot.slane %v2924_v39, 1 }
 0x321   : > { %6224 = vmatprep.mubr.bf16.mxu1 %v8604_v55  ;;  %v2929_v0 = vshrl.u32 %v8550_v15, 16 }
 0x322   : > { %v8667_v13 = vsel %vm461_vm0, %v2910_v60, %v2914_v47  ;;  %v2922_v3 = vor.u32 %v2921_v7, %v2917_v21  ;;  %v2933_v60 = vrot.slane %v2931_v53, 1  ;;  %v2936_v47 = vshll.u32 %v8552_v26, 16  ;;  %v6836_v7 = vld [vmem:[#allocation8 + $0x198] sm:$0xff]   ;;  %v6840_v26 = vld [vmem:[#allocation8 + $0x1a0] sm:$0xff]   ;;  %v6841_v53 = vld [vmem:[#allocation8 + $0x1e8] sm:$0xff]  }
 0x324   : > { %3452 = vmatmul.mubr.bf16.gmra.mrb[180].mxu0 %v8480_v58  ;;  %v2934_v39 = vor.u32 %v2933_v60, %v2929_v0  ;;  %v2938_v21 = vrot.slane %v2936_v47, 1  ;;  %v6845_v0 = vld [vmem:[#allocation8 + $0x1f0] sm:$0xff]  }
 0x325   : > { %3459 = vmatprep.mubr.bf16.mxu0 %v8623_v43 }
 0x328   : > { %6225 = vmatmul.mubr.bf16.gmra.mrb[120].mxu1 %v8635_v45 }
 0x329   : > { %6228 = vmatprep.mubr.bf16.mxu1 %v8644_v27 }
 0x32c   : > { %3460 = vmatmul.mubr.bf16.gmra.mrb[184].mxu0 %v8488_v56 }
 0x32d   : > { %3467 = vmatprep.mubr.bf16.mxu0 %v8652_v32 }
 0x330   : > { %6229 = vmatmul.mubr.bf16.gmra.mrb[124].mxu1 %v8656_v61 }
 0x331   : > { %6248 = vmatprep.mubr.bf16.mxu1 %v3068_v9  ;;  %v8677_v9 = vsel %vm461_vm0, %v2922_v3, %v2926_v57  ;;  %v8687_v3 = vsel %vm461_vm0, %v2934_v39, %v2938_v21  ;;  %v2948_v57 = vshll.u32 %v8572_v4, 16  ;;  %v6846_v4 = vld [vmem:[#allocation8 + $0x1b0] sm:$0xff]   ;;  %v2960_v21 = vshll.u32 %v8580_v14, 16 }
 0x332   : > { %v2965_v14 = vshrl.u32 %v8598_v16, 16 }
 0x333   : > { %v2950_v47 = vrot.slane %v2948_v57, 1  ;;  %v2962_v57 = vrot.slane %v2960_v21, 1 }
 0x334   : > { %3468 = vmatmul.mubr.bf16.gmra.mrb[188].mxu0 %v8506_v24 }
 0x335   : > { %3475 = vmatprep.mubr.bf16.mxu0 %v8667_v13 }
 0x338   : > { %6249 = vmatmul.mubr.bf16.vlgmr.msra.gmra.mrb[96].mxu1 %v8424_v44  ;;  %v6835_v44 = vld [vmem:[#allocation8 + $0x1d8] sm:$0xff]  }
 0x339   : > { %6252 = vmatprep.mubr.bf16.mxu1 %v8432_v46  ;;  %5905 = vmatpush3.bf16.msra.mxu1 %v6828_v18  ;;  %v2943_v18 = vshll.u32 %v8570_v22, 16 }
 0x33a   : > { %5906 = vmatprep.subr.bf16.mxu1 %v6829_v49  ;;  %v6839_v49 = vld [vmem:[#allocation8 + $0x1e0] sm:$0xff]  }
 0x33c   : > { %3476 = vmatmul.mubr.bf16.gmra.mrb[192].mxu0 %v8519_v34 }
 0x33d   : > { %5907 = vmatpush3.bf16.msra.mxu1 %v6830_v33  ;;  %3483 = vmatprep.mubr.bf16.mxu0 %v8677_v9  ;;  %v2945_v33 = vrot.slane %v2943_v18, 1 }
 0x33e   : > { %5908 = vmatprep.subr.bf16.mxu1 %v6833_v63  ;;  %v2941_v63 = vshrl.u32 %v8570_v22, 16 }
 0x340   : > { %6253 = vmatmul.mubr.bf16.gmra.mrb[100].mxu1 %v8438_v31  ;;  %v2946_v60 = vor.u32 %v2945_v33, %v2941_v63  ;;  %v6856_v63 = vld [vmem:[#allocation8 + $0x200] sm:$0xff]  }
 0x341   : > { %6256 = vmatprep.mubr.bf16.mxu1 %v8477_v17  ;;  %5909 = vmatpush3.bf16.msra.mxu1 %v6834_v6  ;;  %v2955_v6 = vshll.u32 %v8578_v5, 16 }
 0x342   : > { %5910 = vmatprep.subr.bf16.mxu1 %v6835_v44  ;;  %v6842_v44 = vld [vmem:[#allocation8 + $0x1a8] sm:$0xff]   ;;  %v8697_v39 = vsel %vm461_vm0, %v2946_v60, %v2950_v47  ;;  %v2979_v47 = vshll.u32 %v8608_v19, 16 }
 0x343   : > { %v2957_v18 = vrot.slane %v2955_v6, 1 }
 0x344   : > { %3484 = vmatmul.mubr.bf16.gmra.mrb[196].mxu0 %v8542_v30 }
 0x345   : > { %5911 = vmatpush3.bf16.msra.mxu1 %v6836_v7  ;;  %3491 = vmatprep.mubr.bf16.mxu0 %v8687_v3  ;;  %v6850_v7 = vld [vmem:[#allocation8 + $0x1f8] sm:$0xff]  }
 0x346   : > { %5912 = vmatprep.subr.bf16.mxu1 %v6839_v49  ;;  %v2953_v49 = vshrl.u32 %v8578_v5, 16 }
 0x348   : > { %6257 = vmatmul.mubr.bf16.gmra.mrb[104].mxu1 %v8486_v48  ;;  %v2958_v33 = vor.u32 %v2957_v18, %v2953_v49  ;;  %v2977_v49 = vshrl.u32 %v8608_v19, 16 }
 0x349   : > { %6260 = vmatprep.mubr.bf16.mxu1 %v8511_v29  ;;  %5913 = vmatpush3.bf16.msra.mxu1 %v6840_v26  ;;  %v2967_v26 = vshll.u32 %v8598_v16, 16 }
 0x34a   : > { %5914 = vmatprep.subr.bf16.mxu1 %v6841_v53  ;;  %v6852_v53 = vld [vmem:[#allocation8 + $0x1b8] sm:$0xff]   ;;  %v8707_v60 = vsel %vm461_vm0, %v2958_v33, %v2962_v57  ;;  %v2991_v33 = vshll.u32 %v8638_v12, 16 }
 0x34b   : > { %v2969_v6 = vrot.slane %v2967_v26, 1 }
 0x34c   : > { %3492 = vmatmul.mubr.bf16.gmra.mrb[200].mxu0 %v8550_v15  ;;  %v2993_v57 = vrot.slane %v2991_v33, 1 }
 0x34d   : > { %5915 = vmatpush3.bf16.msra.mxu1 %v6842_v44  ;;  %3499 = vmatprep.mubr.bf16.mxu0 %v8697_v39  ;;  %v2972_v44 = vshll.u32 %v8600_v54, 16  ;;  %v2984_v54 = vshll.u32 %v8610_v35, 16  ;;  %v2989_v35 = vshrl.u32 %v8638_v12, 16 }
 0x34e   : > { %5916 = vmatprep.subr.bf16.mxu1 %v6845_v0  ;;  %v2970_v0 = vor.u32 %v2969_v6, %v2965_v14  ;;  %v2996_v6 = vshll.u32 %v8640_v11, 16  ;;  %v6858_v11 = vld [vmem:[#allocation8 + $0x208] sm:$0xff]  }
 0x34f   : > { %v2974_v18 = vrot.slane %v2972_v44, 1  ;;  %v2986_v26 = vrot.slane %v2984_v54, 1  ;;  %v2994_v14 = vor.u32 %v2993_v57, %v2989_v35 }
 0x350   : > { %6261 = vmatmul.mubr.bf16.gmra.mrb[108].mxu1 %v8517_v28  ;;  %v2998_v44 = vrot.slane %v2996_v6, 1 }
 0x351   : > { %6264 = vmatprep.mubr.bf16.mxu1 %v8538_v42  ;;  %5917 = vmatpush3.bf16.msra.mxu1 %v6846_v4  ;;  %v8717_v4 = vsel %vm461_vm0, %v2970_v0, %v2974_v18  ;;  %v6860_v18 = vld [vmem:[#allocation8 + $0x218] sm:$0xff]  }
 0x352   : > { %5918 = vmatprep.subr.bf16.mxu1 %v6850_v7  ;;  %v2981_v7 = vrot.slane %v2979_v47, 1  ;;  %v8739_v0 = vsel %vm461_vm0, %v2994_v14, %v2998_v44  ;;  %v6859_v47 = vld [vmem:[#allocation8 + $0x210] sm:$0xff]  }
 0x354   : > { %3500 = vmatmul.mubr.bf16.gmra.mrb[204].mxu0 %v8570_v22  ;;  %v8724_v21 = vor.u32 %v2981_v7, %v2977_v49  ;;  %v6864_v7 = vld [vmem:[#allocation8 + $0x238] sm:$0xff]  }
 0x355   : > { %5919 = vmatpush3.bf16.msra.mxu1 %v6852_v53  ;;  %3507 = vmatprep.mubr.bf16.mxu0 %v8707_v60 }
 0x356   : > { %6280 = vmatprep.subr.bf16.mxu1 %v6856_v63  ;;  %v8730_v53 = vsel %vm461_vm0, %v8724_v21, %v2986_v26 }
 0x358   : > { %6265 = vmatmul.mubr.bf16.gmra.mrb[112].mxu1 %v8548_v62 }
 0x359   : > { %6268 = vmatprep.mubr.bf16.mxu1 %v8567_v2 }
 0x35c   : > { %3508 = vmatmul.mubr.bf16.gmra.mrb[208].mxu0 %v8578_v5 }
 0x35d   : > { %3515 = vmatprep.mubr.bf16.mxu0 %v8717_v4 }
 0x360   : > { %6269 = vmatmul.mubr.bf16.gmra.mrb[116].mxu1 %v8576_v50 }
 0x361   : > { %6272 = vmatprep.mubr.bf16.mxu1 %v8595_v1 }
 0x364   : > { %3516 = vmatmul.mubr.bf16.gmra.mrb[212].mxu0 %v8598_v16 }
 0x365   : > { %3523 = vmatprep.mubr.bf16.mxu0 %v8730_v53 }
 0x368   : > { %6273 = vmatmul.mubr.bf16.gmra.mrb[120].mxu1 %v8604_v55 }
 0x369   : > { %6276 = vmatprep.mubr.bf16.mxu1 %v8635_v45 }
 0x36c   : > { %3524 = vmatmul.mubr.bf16.gmra.mrb[216].mxu0 %v8608_v19 }
 0x36d   : > { %3531 = vmatprep.mubr.bf16.mxu0 %v8739_v0 }
 0x370   : > { %6277 = vmatmul.mubr.bf16.gmra.mrb[124].mxu1 %v8644_v27 }
 0x371   : > { %4392 = vmatprep.mubr.bf16.mxu1 %v8468_v10 }
 0x374   : > { %3532 = vmatmul.mubr.bf16.gmra.mrb[220].mxu0 %v8638_v12 }
 0x375   : > { %3877 = vmatprep.mubr.bf16.mxu0 %v8627_v52  ;;  %v6861_v52 = vld [vmem:[#allocation8 + $0x220] sm:$0xff]  }
 0x378   : > { %4393 = vmatmul.mubr.bf16.vlgmr.msra.gmra.mrb[128].mxu1 %v8413_v51 }
 0x379   : > { %4400 = vmatprep.mubr.bf16.mxu1 %v8502_v40  ;;  %6281 = vmatpush3.bf16.msra.mxu1 %v6856_v63  ;;  %v6862_v63 = vld [vmem:[#allocation8 + $0x228] sm:$0xff]  }
 0x37a   : > { %6282 = vmatprep.subr.bf16.mxu1 %v6858_v11 }
 0x37c   : > { %3878 = vmatmul.mubr.bf16.vlgmr.msra.gmra.mrb[224].mxu0 %v8413_v51 }
 0x37d   : > { %6283 = vmatpush3.bf16.msra.mxu1 %v6858_v11  ;;  %3885 = vmatprep.mubr.bf16.mxu0 %v8453_v23  ;;  %v6863_v23 = vld [vmem:[#allocation8 + $0x230] sm:$0xff]  }
 0x37e   : > { %6284 = vmatprep.subr.bf16.mxu1 %v6859_v47 }
 0x380   : > { %4401 = vmatmul.mubr.bf16.gmra.mrb[132].mxu1 %v8416_v41 }
 0x381   : > { %4408 = vmatprep.mubr.bf16.mxu1 %v8534_v25  ;;  %6285 = vmatpush3.bf16.msra.mxu1 %v6859_v47 }
 0x382   : > { %6286 = vmatprep.subr.bf16.mxu1 %v6860_v18 }
 0x384   : > { %3886 = vmatmul.mubr.bf16.gmra.mrb[228].mxu0 %v8411_v37 }
 0x385   : > { %6287 = vmatpush3.bf16.msra.mxu1 %v6860_v18  ;;  %3893 = vmatprep.mubr.bf16.mxu0 %v8468_v10 }
 0x386   : > { %6288 = vmatprep.subr.bf16.mxu1 %v6861_v52 }
 0x388   : > { %4409 = vmatmul.mubr.bf16.gmra.mrb[136].mxu1 %v8440_v36 }
 0x389   : > { %4416 = vmatprep.mubr.bf16.mxu1 %v8562_v8  ;;  %6289 = vmatpush3.bf16.msra.mxu1 %v6861_v52 }
 0x38a   : > { %6290 = vmatprep.subr.bf16.mxu1 %v6862_v63 }
 0x38c   : > { %3894 = vmatmul.mubr.bf16.gmra.mrb[232].mxu0 %v8413_v51 }
 0x38d   : > { %6291 = vmatpush3.bf16.msra.mxu1 %v6862_v63  ;;  %3901 = vmatprep.mubr.bf16.mxu0 %v8502_v40 }
 0x38e   : > { %6292 = vmatprep.subr.bf16.mxu1 %v6863_v23 }
 0x390   : > { %4417 = vmatmul.mubr.bf16.gmra.mrb[140].mxu1 %v8446_v20 }
 0x391   : > { %4424 = vmatprep.mubr.bf16.mxu1 %v8590_v38  ;;  %6293 = vmatpush3.bf16.msra.mxu1 %v6863_v23 }
 0x392   : > { %6294 = vmatprep.subr.bf16.mxu1 %v6864_v7 }
 0x394   : > { %3902 = vmatmul.mubr.bf16.gmra.mrb[236].mxu0 %v8416_v41 }
 0x395   : > { %6295 = vmatpush3.bf16.msra.mxu1 %v6864_v7  ;;  %3909 = vmatprep.mubr.bf16.mxu0 %v8534_v25 }
 0x398   : > { %4425 = vmatmul.mubr.bf16.gmra.mrb[144].mxu1 %v8480_v58 }
 0x399   : > { %4432 = vmatprep.mubr.bf16.mxu1 %v8623_v43 }
 0x39c   : > { %3910 = vmatmul.mubr.bf16.gmra.mrb[240].mxu0 %v8440_v36 }
 0x39d   : > { %3917 = vmatprep.mubr.bf16.mxu0 %v8562_v8 }
 0x3a0   : > { %4433 = vmatmul.mubr.bf16.gmra.mrb[148].mxu1 %v8488_v56 }
 0x3a1   : > { %4440 = vmatprep.mubr.bf16.mxu1 %v8652_v32 }
 0x3a4   : > { %3918 = vmatmul.mubr.bf16.gmra.mrb[244].mxu0 %v8446_v20 }
 0x3a5   : > { %3925 = vmatprep.mubr.bf16.mxu0 %v8590_v38 }
 0x3a8   : > { %4441 = vmatmul.mubr.bf16.gmra.mrb[152].mxu1 %v8506_v24 }
 0x3a9   : > { %4448 = vmatprep.mubr.bf16.mxu1 %v8667_v13 }
 0x3ac   : > { %3926 = vmatmul.mubr.bf16.gmra.mrb[248].mxu0 %v8480_v58 }
 0x3ad   : > { %3933 = vmatprep.mubr.bf16.mxu0 %v8623_v43 }
 0x3b0   : > { %4449 = vmatmul.mubr.bf16.gmra.mrb[156].mxu1 %v8519_v34 }
 0x3b1   : > { %4456 = vmatprep.mubr.bf16.mxu1 %v8677_v9 }
 0x3b4   : > { %3934 = vmatmul.mubr.bf16.gmra.mrb[252].mxu0 %v8488_v56 }
 0x3b5   : > { %3941 = vmatprep.mubr.bf16.mxu0 %v8652_v32 }
 0x3b8   : > { %4457 = vmatmul.mubr.bf16.gmra.mrb[160].mxu1 %v8542_v30 }
 0x3b9   : > { %4464 = vmatprep.mubr.bf16.mxu1 %v8687_v3 }
 0x3bc   : > { %3942 = vmatmul.mubr.bf16.gmra.mrb[0].mxu0 %v8506_v24 }
 0x3bd   : > { %3949 = vmatprep.mubr.bf16.mxu0 %v8667_v13 }
 0x3c0   : > { %4465 = vmatmul.mubr.bf16.gmra.mrb[164].mxu1 %v8550_v15 }
 0x3c1   : > { %4472 = vmatprep.mubr.bf16.mxu1 %v8697_v39 }
 0x3c4   : > { %3950 = vmatmul.mubr.bf16.gmra.mrb[4].mxu0 %v8519_v34 }
 0x3c5   : > { %3957 = vmatprep.mubr.bf16.mxu0 %v8677_v9 }
 0x3c8   : > { %4473 = vmatmul.mubr.bf16.gmra.mrb[168].mxu1 %v8570_v22 }
 0x3c9   : > { %4480 = vmatprep.mubr.bf16.mxu1 %v8707_v60 }
 0x3cc   : > { %3958 = vmatmul.mubr.bf16.gmra.mrb[8].mxu0 %v8542_v30 }
 0x3cd   : > { %3965 = vmatprep.mubr.bf16.mxu0 %v8687_v3 }
 0x3cf   : > { %v5648_v37 = vpop.f32.mrb[160].mxu0 }
 0x3d0   : > { %4481 = vmatmul.mubr.bf16.gmra.mrb[172].mxu1 %v8578_v5  ;;  %v5649_v51 = vpop.f32.mrb[161].mxu0 }
 0x3d1   : > { %4488 = vmatprep.mubr.bf16.mxu1 %v8717_v4  ;;  %v8792_v41 = vadd.f32 %v5649_v51, %v5648_v37  ;;  %v5651_v36 = vpop.f32.mrb[162].mxu0 }
 0x3d2   : > { %v5652_v20 = vpop.f32.mrb[163].mxu0 }
 0x3d3   : > { %v8794_v10 = vadd.f32 %v5652_v20, %v5651_v36 }
 0x3d4   : > { %3966 = vmatmul.mubr.bf16.gmra.mrb[12].mxu0 %v8550_v15  ;;  %v3008_v15 = vshll.u32 %v8614_v59, 16 }
 0x3d5   : > { %3973 = vmatprep.mubr.bf16.mxu0 %v8697_v39 }
 0x3d6   : > { %v3010_v9 = vrot.slane %v3008_v15, 1 }
 0x3d7   : > { %v5654_v58 = vpop.f32.mrb[164].mxu0 }
 0x3d8   : > { %4489 = vmatmul.mubr.bf16.gmra.mrb[176].mxu1 %v8598_v16  ;;  %v5655_v56 = vpop.f32.mrb[165].mxu0  ;;  %v3011_v59 = vsel %vm461_vm0, %v8724_v21, %v3010_v9 }
 0x3d9   : > { %4496 = vmatprep.mubr.bf16.mxu1 %v8730_v53  ;;  %v8800_v40 = vadd.f32 %v5655_v56, %v5654_v58  ;;  %v5657_v24 = vpop.f32.mrb[166].mxu0 }
 0x3da   : > { %v5658_v34 = vpop.f32.mrb[167].mxu0 }
 0x3db   : > { %v8802_v25 = vadd.f32 %v5658_v34, %v5657_v24 }
 0x3dc   : > { %3974 = vmatmul.mubr.bf16.gmra.mrb[16].mxu0 %v8570_v22 }
 0x3dd   : > { %3981 = vmatprep.mubr.bf16.mxu0 %v8707_v60 }
 0x3df   : > { %v5660_v30 = vpop.f32.mrb[168].mxu0 }
 0x3e0   : > { %4497 = vmatmul.mubr.bf16.gmra.mrb[180].mxu1 %v8608_v19  ;;  %v5661_v8 = vpop.f32.mrb[169].mxu0 }
 0x3e1   : > { %4504 = vmatprep.mubr.bf16.mxu1 %v8739_v0  ;;  %v8809_v38 = vadd.f32 %v5661_v8, %v5660_v30  ;;  %v5663_v43 = vpop.f32.mrb[170].mxu0 }
 0x3e2   : > { %v5664_v32 = vpop.f32.mrb[171].mxu0 }
 0x3e3   : > { %v8811_v13 = vadd.f32 %v5664_v32, %v5663_v43 }
 0x3e4   : > { %3982 = vmatmul.mubr.bf16.gmra.mrb[20].mxu0 %v8578_v5 }
 0x3e5   : > { %3989 = vmatprep.mubr.bf16.mxu0 %v8717_v4 }
 0x3e7   : > { %v5666_v22 = vpop.f32.mrb[172].mxu0 }
 0x3e8   : > { %4505 = vmatmul.mubr.bf16.gmra.mrb[184].mxu1 %v8638_v12  ;;  %v5667_v3 = vpop.f32.mrb[173].mxu0 }
 0x3e9   : > { %4512 = vmatprep.mubr.bf16.mxu1 %v3011_v59  ;;  %v8818_v39 = vadd.f32 %v5667_v3, %v5666_v22  ;;  %v5669_v60 = vpop.f32.mrb[174].mxu0 }
 0x3ea   : > { %v5670_v49 = vpop.f32.mrb[175].mxu0 }
 0x3eb   : > { %v8820_v54 = vadd.f32 %v5670_v49, %v5669_v60 }
 0x3ec   : > { %3990 = vmatmul.mubr.bf16.gmra.mrb[24].mxu0 %v8598_v16 }
 0x3ed   : > { %3997 = vmatprep.mubr.bf16.mxu0 %v8730_v53 }
 0x3ef   : > { %v5672_v5 = vpop.f32.mrb[176].mxu0 }
 0x3f0   : > { %4513 = vmatmul.mubr.bf16.gmra.mrb[188].mxu1 %v8608_v19  ;;  %v5673_v4 = vpop.f32.mrb[177].mxu0 }
 0x3f1   : > { %6296 = vmatprep.mubr.bf16.mxu1 %v8432_v46  ;;  %v8826_v12 = vadd.f32 %v5673_v4, %v5672_v5  ;;  %v5675_v21 = vpop.f32.mrb[178].mxu0 }
 0x3f2   : > { %v5676_v33 = vpop.f32.mrb[179].mxu0 }
 0x3f3   : > { %v8828_v26 = vadd.f32 %v5676_v33, %v5675_v21 }
 0x3f4   : > { %3998 = vmatmul.mubr.bf16.gmra.mrb[28].mxu0 %v8608_v19 }
 0x3f7   : > { %v5678_v57 = vpop.f32.mrb[180].mxu0 }
 0x3f8   : > { %6297 = vmatmul.mubr.bf16.vlgmr.msra.gmra.mrb[96].mxu1 %v8438_v31  ;;  %v5679_v16 = vpop.f32.mrb[181].mxu0 }
 0x3f9   : > { %6300 = vmatprep.mubr.bf16.mxu1 %v8477_v17  ;;  %v8833_v53 = vadd.f32 %v5679_v16, %v5678_v57  ;;  %v5681_v35 = vpop.f32.mrb[182].mxu0 }
 0x3fa   : > { %v5682_v6 = vpop.f32.mrb[183].mxu0 }
 0x3fb   : > { %v8835_v14 = vadd.f32 %v5682_v6, %v5681_v35 }
 0x3ff   : > { %v5684_v46 = vpop.f32.mrb[184].mxu0 }
 0x400   : > { %6301 = vmatmul.mubr.bf16.gmra.mrb[100].mxu1 %v8486_v48  ;;  %v5685_v44 = vpop.f32.mrb[185].mxu0 }
 0x401   : > { %6304 = vmatprep.mubr.bf16.mxu1 %v8511_v29  ;;  %v8839_v0 = vadd.f32 %v5685_v44, %v5684_v46  ;;  %v5687_v19 = vpop.f32.mrb[186].mxu0 }
 0x402   : > { %v5688_v11 = vpop.f32.mrb[187].mxu0 }
 0x403   : > { %v8841_v31 = vadd.f32 %v5688_v11, %v5687_v19 }
 0x407   : > { %v5690_v47 = vpop.f32.mrb[188].mxu0 }
 0x408   : > { %6305 = vmatmul.mubr.bf16.gmra.mrb[104].mxu1 %v8517_v28  ;;  %v5691_v17 = vpop.f32.mrb[189].mxu0 }
 0x409   : > { %6308 = vmatprep.mubr.bf16.mxu1 %v8538_v42  ;;  %v8845_v18 = vadd.f32 %v5691_v17, %v5690_v47  ;;  %v5693_v52 = vpop.f32.mrb[190].mxu0 }
 0x40a   : > { %v5694_v63 = vpop.f32.mrb[191].mxu0 }
 0x40b   : > { %v8847_v48 = vadd.f32 %v5694_v63, %v5693_v52 }
 0x40f   : > { %v5696_v23 = vpop.f32.mrb[192].mxu0 }
 0x410   : > { %6309 = vmatmul.mubr.bf16.gmra.mrb[108].mxu1 %v8548_v62  ;;  %v5697_v29 = vpop.f32.mrb[193].mxu0 }
 0x411   : > { %6312 = vmatprep.mubr.bf16.mxu1 %v8567_v2  ;;  %v8851_v7 = vadd.f32 %v5697_v29, %v5696_v23  ;;  %v5699_v37 = vpop.f32.mrb[194].mxu0 }
 0x412   : > { %v5700_v51 = vpop.f32.mrb[195].mxu0 }
 0x413   : > { %v8853_v28 = vadd.f32 %v5700_v51, %v5699_v37 }
 0x417   : > { %v5702_v36 = vpop.f32.mrb[196].mxu0 }
 0x418   : > { %6313 = vmatmul.mubr.bf16.gmra.mrb[112].mxu1 %v8576_v50  ;;  %v5703_v42 = vpop.f32.mrb[197].mxu0 }
 0x419   : > { %6316 = vmatprep.mubr.bf16.mxu1 %v8595_v1  ;;  %v8857_v20 = vadd.f32 %v5703_v42, %v5702_v36  ;;  %v5705_v58 = vpop.f32.mrb[198].mxu0 }
 0x41a   : > { %v5706_v56 = vpop.f32.mrb[199].mxu0 }
 0x41b   : > { %v8859_v62 = vadd.f32 %v5706_v56, %v5705_v58 }
 0x41f   : > { %v5708_v24 = vpop.f32.mrb[200].mxu0 }
 0x420   : > { %6317 = vmatmul.mubr.bf16.gmra.mrb[116].mxu1 %v8604_v55  ;;  %v5709_v2 = vpop.f32.mrb[201].mxu0 }
 0x421   : > { %6320 = vmatprep.mubr.bf16.mxu1 %v8635_v45  ;;  %v8863_v34 = vadd.f32 %v5709_v2, %v5708_v24  ;;  %v5711_v30 = vpop.f32.mrb[202].mxu0  ;;  %v9507_v45 = vld [vmem:[#allocation53_spill] sm:$0xff] }
 0x422   : > { %v5712_v15 = vpop.f32.mrb[203].mxu0 }
 0x423   : > { %v8865_v50 = vadd.f32 %v5712_v15, %v5711_v30 }
 0x427   : > { %v5714_v8 = vpop.f32.mrb[204].mxu0 }
 0x428   : > { %6321 = vmatmul.mubr.bf16.gmra.mrb[120].mxu1 %v8644_v27  ;;  %v5715_v1 = vpop.f32.mrb[205].mxu0 }
 0x429   : > { %6324 = vmatprep.mubr.bf16.mxu1 %v8656_v61  ;;  %v8869_v43 = vadd.f32 %v5715_v1, %v5714_v8  ;;  %v5717_v32 = vpop.f32.mrb[206].mxu0 }
 0x42a   : > { %v5718_v9 = vpop.f32.mrb[207].mxu0 }
 0x42b   : > { %v8871_v55 = vadd.f32 %v5718_v9, %v5717_v32 }
 0x42f   : > { %v5720_v22 = vpop.f32.mrb[208].mxu0 }
 0x430   : > { %6325 = vmatmul.mubr.bf16.gmra.mrb[124].mxu1 %v9507_v45  ;;  %v5721_v59 = vpop.f32.mrb[209].mxu0 }
 0x431   : > { %v8874_v3 = vadd.f32 %v5721_v59, %v5720_v22  ;;  %v5723_v60 = vpop.f32.mrb[210].mxu0 }
 0x432   : > { %v5724_v49 = vpop.f32.mrb[211].mxu0 }
 0x433   : > { %v8876_v5 = vadd.f32 %v5724_v49, %v5723_v60 }
 0x437   : > { %v5726_v27 = vpop.f32.mrb[212].mxu0 }
 0x438   : > { %v5727_v4 = vpop.f32.mrb[213].mxu0 }
 0x439   : > { %v8878_v21 = vadd.f32 %v5727_v4, %v5726_v27  ;;  %v5729_v61 = vpop.f32.mrb[214].mxu0 }
 0x43a   : > { %v5730_v33 = vpop.f32.mrb[215].mxu0 }
 0x43b   : > { %v8880_v57 = vadd.f32 %v5730_v33, %v5729_v61 }
 0x43f   : > { %v5732_v16 = vpop.f32.mrb[216].mxu0 }
 0x440   : > { %v5733_v35 = vpop.f32.mrb[217].mxu0 }
 0x441   : > { %v8882_v6 = vadd.f32 %v5733_v35, %v5732_v16  ;;  %v5735_v46 = vpop.f32.mrb[218].mxu0 }
 0x442   : > { %v5736_v44 = vpop.f32.mrb[219].mxu0 }
 0x443   : > { %v8884_v19 = vadd.f32 %v5736_v44, %v5735_v46 }
 0x447   : > { %v5738_v11 = vpop.f32.mrb[220].mxu0 }
 0x448   : > { %v5739_v47 = vpop.f32.mrb[221].mxu0 }
 0x449   : > { %v8886_v17 = vadd.f32 %v5739_v47, %v5738_v11  ;;  %v5741_v52 = vpop.f32.mrb[222].mxu0 }
 0x44a   : > { %v5742_v63 = vpop.f32.mrb[223].mxu0 }
 0x44b   : > { %v5920_v23 = vpop.f32.mrb[128].mxu1  ;;  %v8888_v29 = vadd.f32 %v5742_v63, %v5741_v52 }
 0x44c   : > { %v5921_v37 = vpop.f32.mrb[129].mxu1 }
 0x44d   : > { %v5922_v51 = vadd.f32 %v5921_v37, %v5920_v23  ;;  %v5923_v36 = vpop.f32.mrb[130].mxu1 }
 0x44e   : > { %v5924_v42 = vpop.f32.mrb[131].mxu1 }
 0x44f   : > { %v5925_v58 = vadd.f32 %v5924_v42, %v5923_v36  ;;  %v5784_v56 = vpop.f32.mrb[224].mxu0 }
 0x450   : > { %v5785_v24 = vpop.f32.mrb[225].mxu0 }
 0x451   : > { %v5786_v2 = vadd.f32 %v5785_v24, %v5784_v56  ;;  %v5787_v30 = vpop.f32.mrb[226].mxu0 }
 0x452   : > { %v5788_v15 = vpop.f32.mrb[227].mxu0 }
 0x453   : > { %v5926_v8 = vpop.f32.mrb[132].mxu1  ;;  %v6459_v1 = vadd.f32 %v5786_v2, %v8792_v41  ;;  %v5789_v32 = vadd.f32 %v5788_v15, %v5787_v30 }
 0x454   : > { %v5927_v9 = vpop.f32.mrb[133].mxu1 }
 0x455   : > { %v5928_v22 = vadd.f32 %v5927_v9, %v5926_v8  ;;  %v5929_v45 = vpop.f32.mrb[134].mxu1  ;;  %v6465_v59 = vadd.f32 %v5789_v32, %v8794_v10  ;;  %v8892_v49 = vadd.f32 %v6459_v1, %v5922_v51 }
 0x456   : > { %v5930_v60 = vpop.f32.mrb[135].mxu1 }
 0x457   : > { %v5931_v27 = vadd.f32 %v5930_v60, %v5929_v45  ;;  %v5790_v4 = vpop.f32.mrb[228].mxu0  ;;  %v8894_v61 = vadd.f32 %v6465_v59, %v5925_v58 }
 0x458   : > { %v5791_v33 = vpop.f32.mrb[229].mxu0 }
 0x459   : > { %v5792_v16 = vadd.f32 %v5791_v33, %v5790_v4  ;;  %v5793_v35 = vpop.f32.mrb[230].mxu0 }
 0x45a   : > { %v5794_v46 = vpop.f32.mrb[231].mxu0 }
 0x45b   : > { %v5932_v44 = vpop.f32.mrb[136].mxu1  ;;  %v6456_v41 = vadd.f32 %v5792_v16, %v8800_v40  ;;  %v5795_v11 = vadd.f32 %v5794_v46, %v5793_v35 }
 0x45c   : > { %v5933_v47 = vpop.f32.mrb[137].mxu1 }
 0x45d   : > { %v5934_v52 = vadd.f32 %v5933_v47, %v5932_v44  ;;  %v5935_v63 = vpop.f32.mrb[138].mxu1  ;;  %v6462_v10 = vadd.f32 %v5795_v11, %v8802_v25  ;;  %v8898_v37 = vadd.f32 %v6456_v41, %v5928_v22 }
 0x45e   : > { %v5936_v23 = vpop.f32.mrb[139].mxu1 }
 0x45f   : > { %v5937_v51 = vadd.f32 %v5936_v23, %v5935_v63  ;;  %v5796_v36 = vpop.f32.mrb[232].mxu0  ;;  %v8900_v42 = vadd.f32 %v6462_v10, %v5931_v27 }
 0x460   : > { %v5797_v58 = vpop.f32.mrb[233].mxu0 }
 0x461   : > { %v5798_v56 = vadd.f32 %v5797_v58, %v5796_v36  ;;  %v5799_v24 = vpop.f32.mrb[234].mxu0 }
 0x462   : > { %v5800_v2 = vpop.f32.mrb[235].mxu0 }
 0x463   : > { %v5938_v30 = vpop.f32.mrb[140].mxu1  ;;  %v6471_v40 = vadd.f32 %v5798_v56, %v8809_v38  ;;  %v5801_v15 = vadd.f32 %v5800_v2, %v5799_v24 }
 0x464   : > { %v5939_v8 = vpop.f32.mrb[141].mxu1 }
 0x465   : > { %v5940_v1 = vadd.f32 %v5939_v8, %v5938_v30  ;;  %v5941_v32 = vpop.f32.mrb[142].mxu1  ;;  %v6477_v25 = vadd.f32 %v5801_v15, %v8811_v13  ;;  %v8904_v22 = vadd.f32 %v6471_v40, %v5934_v52 }
 0x466   : > { %v5942_v9 = vpop.f32.mrb[143].mxu1 }
 0x467   : > { %v5943_v45 = vadd.f32 %v5942_v9, %v5941_v32  ;;  %v5802_v59 = vpop.f32.mrb[236].mxu0  ;;  %v8906_v60 = vadd.f32 %v6477_v25, %v5937_v51 }
 0x468   : > { %v5803_v27 = vpop.f32.mrb[237].mxu0 }
 0x469   : > { %v5804_v4 = vadd.f32 %v5803_v27, %v5802_v59  ;;  %v5805_v33 = vpop.f32.mrb[238].mxu0 }
 0x46a   : > { %v5806_v16 = vpop.f32.mrb[239].mxu0 }
 0x46b   : > { %v5944_v35 = vpop.f32.mrb[144].mxu1  ;;  %v6468_v38 = vadd.f32 %v5804_v4, %v8818_v39  ;;  %v5807_v46 = vadd.f32 %v5806_v16, %v5805_v33 }
 0x46c   : > { %v5945_v44 = vpop.f32.mrb[145].mxu1 }
 0x46d   : > { %v5946_v41 = vadd.f32 %v5945_v44, %v5944_v35  ;;  %v5947_v11 = vpop.f32.mrb[146].mxu1  ;;  %v6474_v13 = vadd.f32 %v5807_v46, %v8820_v54  ;;  %v8910_v52 = vadd.f32 %v6468_v38, %v5940_v1 }
 0x46e   : > { %v5948_v47 = vpop.f32.mrb[147].mxu1 }
 0x46f   : > { %v5949_v63 = vadd.f32 %v5948_v47, %v5947_v11  ;;  %v5808_v10 = vpop.f32.mrb[240].mxu0  ;;  %v8912_v23 = vadd.f32 %v6474_v13, %v5943_v45 }
 0x470   : > { %v5809_v51 = vpop.f32.mrb[241].mxu0 }
 0x471   : > { %v5810_v36 = vadd.f32 %v5809_v51, %v5808_v10  ;;  %v5811_v58 = vpop.f32.mrb[242].mxu0 }
 0x472   : > { %v5812_v56 = vpop.f32.mrb[243].mxu0 }
 0x473   : > { %v5950_v24 = vpop.f32.mrb[148].mxu1  ;;  %v6483_v39 = vadd.f32 %v5810_v36, %v8826_v12  ;;  %v5813_v2 = vadd.f32 %v5812_v56, %v5811_v58 }
 0x474   : > { %v5951_v30 = vpop.f32.mrb[149].mxu1 }
 0x475   : > { %v5952_v40 = vadd.f32 %v5951_v30, %v5950_v24  ;;  %v5953_v15 = vpop.f32.mrb[150].mxu1  ;;  %v6489_v54 = vadd.f32 %v5813_v2, %v8828_v26  ;;  %v8916_v1 = vadd.f32 %v6483_v39, %v5946_v41 }
 0x476   : > { %v5954_v8 = vpop.f32.mrb[151].mxu1 }
 0x477   : > { %v5955_v32 = vadd.f32 %v5954_v8, %v5953_v15  ;;  %v5814_v25 = vpop.f32.mrb[244].mxu0  ;;  %v8918_v9 = vadd.f32 %v6489_v54, %v5949_v63 }
 0x478   : > { %v5815_v45 = vpop.f32.mrb[245].mxu0 }
 0x479   : > { %v5816_v59 = vadd.f32 %v5815_v45, %v5814_v25  ;;  %v5817_v27 = vpop.f32.mrb[246].mxu0 }
 0x47a   : > { %v5818_v4 = vpop.f32.mrb[247].mxu0 }
 0x47b   : > { %v5956_v33 = vpop.f32.mrb[152].mxu1  ;;  %v6480_v12 = vadd.f32 %v5816_v59, %v8833_v53  ;;  %v5819_v16 = vadd.f32 %v5818_v4, %v5817_v27 }
 0x47c   : > { %v5957_v35 = vpop.f32.mrb[153].mxu1 }
 0x47d   : > { %v5958_v38 = vadd.f32 %v5957_v35, %v5956_v33  ;;  %v5959_v46 = vpop.f32.mrb[154].mxu1  ;;  %v6486_v26 = vadd.f32 %v5819_v16, %v8835_v14  ;;  %v8922_v41 = vadd.f32 %v6480_v12, %v5952_v40 }
 0x47e   : > { %v5960_v44 = vpop.f32.mrb[155].mxu1 }
 0x47f   : > { %v5961_v11 = vadd.f32 %v5960_v44, %v5959_v46  ;;  %v5820_v13 = vpop.f32.mrb[248].mxu0  ;;  %v8924_v47 = vadd.f32 %v6486_v26, %v5955_v32 }
 0x480   : > { %v5821_v63 = vpop.f32.mrb[249].mxu0 }
 0x481   : > { %v5822_v10 = vadd.f32 %v5821_v63, %v5820_v13  ;;  %v5823_v51 = vpop.f32.mrb[250].mxu0 }
 0x482   : > { %v5824_v36 = vpop.f32.mrb[251].mxu0 }
 0x483   : > { %v5962_v58 = vpop.f32.mrb[156].mxu1  ;;  %v6495_v53 = vadd.f32 %v5822_v10, %v8839_v0  ;;  %v5825_v56 = vadd.f32 %v5824_v36, %v5823_v51 }
 0x484   : > { %v5963_v24 = vpop.f32.mrb[157].mxu1 }
 0x485   : > { %v5964_v39 = vadd.f32 %v5963_v24, %v5962_v58  ;;  %v5965_v2 = vpop.f32.mrb[158].mxu1  ;;  %v6501_v14 = vadd.f32 %v5825_v56, %v8841_v31  ;;  %v8928_v40 = vadd.f32 %v6495_v53, %v5958_v38 }
 0x486   : > { %v5966_v30 = vpop.f32.mrb[159].mxu1 }
 0x487   : > { %v5967_v15 = vadd.f32 %v5966_v30, %v5965_v2  ;;  %v5826_v54 = vpop.f32.mrb[252].mxu0  ;;  %v8930_v8 = vadd.f32 %v6501_v14, %v5961_v11 }
 0x488   : > { %v5827_v32 = vpop.f32.mrb[253].mxu0 }
 0x489   : > { %v5828_v25 = vadd.f32 %v5827_v32, %v5826_v54  ;;  %v5829_v45 = vpop.f32.mrb[254].mxu0 }
 0x48a   : > { %v5830_v59 = vpop.f32.mrb[255].mxu0 }
 0x48b   : > { %v5968_v27 = vpop.f32.mrb[160].mxu1  ;;  %v6492_v0 = vadd.f32 %v5828_v25, %v8845_v18  ;;  %v5831_v4 = vadd.f32 %v5830_v59, %v5829_v45 }
 0x48c   : > { %v5969_v33 = vpop.f32.mrb[161].mxu1 }
 0x48d   : > { %v5970_v12 = vadd.f32 %v5969_v33, %v5968_v27  ;;  %v5971_v16 = vpop.f32.mrb[162].mxu1  ;;  %v6498_v31 = vadd.f32 %v5831_v4, %v8847_v48  ;;  %v8934_v38 = vadd.f32 %v6492_v0, %v5964_v39 }
 0x48e   : > { %v5972_v35 = vpop.f32.mrb[163].mxu1 }
 0x48f   : > { %v5973_v46 = vadd.f32 %v5972_v35, %v5971_v16  ;;  %v5832_v26 = vpop.f32.mrb[0].mxu0  ;;  %v8936_v44 = vadd.f32 %v6498_v31, %v5967_v15 }
 0x490   : > { %v5833_v11 = vpop.f32.mrb[1].mxu0 }
 0x491   : > { %v5834_v13 = vadd.f32 %v5833_v11, %v5832_v26  ;;  %v5835_v63 = vpop.f32.mrb[2].mxu0 }
 0x492   : > { %v5836_v10 = vpop.f32.mrb[3].mxu0 }
 0x493   : > { %v5974_v51 = vpop.f32.mrb[164].mxu1  ;;  %v6507_v18 = vadd.f32 %v5834_v13, %v8851_v7  ;;  %v5837_v36 = vadd.f32 %v5836_v10, %v5835_v63 }
 0x494   : > { %v5975_v58 = vpop.f32.mrb[165].mxu1 }
 0x495   : > { %v5976_v53 = vadd.f32 %v5975_v58, %v5974_v51  ;;  %v5977_v56 = vpop.f32.mrb[166].mxu1  ;;  %v6513_v48 = vadd.f32 %v5837_v36, %v8853_v28  ;;  %v8940_v39 = vadd.f32 %v6507_v18, %v5970_v12 }
 0x496   : > { %v5978_v24 = vpop.f32.mrb[167].mxu1 }
 0x497   : > { %v5979_v2 = vadd.f32 %v5978_v24, %v5977_v56  ;;  %v5838_v14 = vpop.f32.mrb[4].mxu0  ;;  %v8942_v30 = vadd.f32 %v6513_v48, %v5973_v46 }
 0x498   : > { %v5839_v15 = vpop.f32.mrb[5].mxu0 }
 0x499   : > { %v5840_v54 = vadd.f32 %v5839_v15, %v5838_v14  ;;  %v5841_v32 = vpop.f32.mrb[6].mxu0 }
 0x49a   : > { %v5842_v25 = vpop.f32.mrb[7].mxu0 }
 0x49b   : > { %v5980_v45 = vpop.f32.mrb[168].mxu1  ;;  %v6504_v7 = vadd.f32 %v5840_v54, %v8857_v20  ;;  %v5843_v59 = vadd.f32 %v5842_v25, %v5841_v32 }
 0x49c   : > { %v5981_v27 = vpop.f32.mrb[169].mxu1 }
 0x49d   : > { %v5982_v0 = vadd.f32 %v5981_v27, %v5980_v45  ;;  %v5983_v4 = vpop.f32.mrb[170].mxu1  ;;  %v6510_v28 = vadd.f32 %v5843_v59, %v8859_v62  ;;  %v8946_v12 = vadd.f32 %v6504_v7, %v5976_v53 }
 0x49e   : > { %v5984_v33 = vpop.f32.mrb[171].mxu1 }
 0x49f   : > { %v5985_v16 = vadd.f32 %v5984_v33, %v5983_v4  ;;  %v5844_v31 = vpop.f32.mrb[8].mxu0  ;;  %v8948_v35 = vadd.f32 %v6510_v28, %v5979_v2 }
 0x4a0   : > { %v5845_v46 = vpop.f32.mrb[9].mxu0 }
 0x4a1   : > { %v5846_v26 = vadd.f32 %v5845_v46, %v5844_v31  ;;  %v5847_v11 = vpop.f32.mrb[10].mxu0 }
 0x4a2   : > { %v5848_v13 = vpop.f32.mrb[11].mxu0 }
 0x4a3   : > { %v5986_v63 = vpop.f32.mrb[172].mxu1  ;;  %v6519_v20 = vadd.f32 %v5846_v26, %v8863_v34  ;;  %v5849_v10 = vadd.f32 %v5848_v13, %v5847_v11 }
 0x4a4   : > { %v5987_v51 = vpop.f32.mrb[173].mxu1 }
 0x4a5   : > { %v5988_v18 = vadd.f32 %v5987_v51, %v5986_v63  ;;  %v5989_v36 = vpop.f32.mrb[174].mxu1  ;;  %v6525_v62 = vadd.f32 %v5849_v10, %v8865_v50  ;;  %v8952_v53 = vadd.f32 %v6519_v20, %v5982_v0 }
 0x4a6   : > { %v5990_v58 = vpop.f32.mrb[175].mxu1 }
 0x4a7   : > { %v5991_v56 = vadd.f32 %v5990_v58, %v5989_v36  ;;  %v5850_v48 = vpop.f32.mrb[12].mxu0  ;;  %v8954_v24 = vadd.f32 %v6525_v62, %v5985_v16 }
 0x4a8   : > { %v5851_v2 = vpop.f32.mrb[13].mxu0 }
 0x4a9   : > { %v5852_v14 = vadd.f32 %v5851_v2, %v5850_v48  ;;  %v5853_v15 = vpop.f32.mrb[14].mxu0 }
 0x4aa   : > { %v5854_v54 = vpop.f32.mrb[15].mxu0 }
 0x4ab   : > { %v5992_v32 = vpop.f32.mrb[176].mxu1  ;;  %v6516_v34 = vadd.f32 %v5852_v14, %v8869_v43  ;;  %v5855_v25 = vadd.f32 %v5854_v54, %v5853_v15 }
 0x4ac   : > { %v5993_v45 = vpop.f32.mrb[177].mxu1 }
 0x4ad   : > { %v5994_v7 = vadd.f32 %v5993_v45, %v5992_v32  ;;  %v5995_v59 = vpop.f32.mrb[178].mxu1  ;;  %v6522_v50 = vadd.f32 %v5855_v25, %v8871_v55  ;;  %v8958_v0 = vadd.f32 %v6516_v34, %v5988_v18 }
 0x4ae   : > { %v5996_v27 = vpop.f32.mrb[179].mxu1 }
 0x4af   : > { %v5997_v4 = vadd.f32 %v5996_v27, %v5995_v59  ;;  %v5856_v28 = vpop.f32.mrb[16].mxu0  ;;  %v8960_v33 = vadd.f32 %v6522_v50, %v5991_v56 }
 0x4b0   : > { %v5857_v16 = vpop.f32.mrb[17].mxu0 }
 0x4b1   : > { %v5858_v31 = vadd.f32 %v5857_v16, %v5856_v28  ;;  %v5859_v46 = vpop.f32.mrb[18].mxu0 }
 0x4b2   : > { %v5860_v26 = vpop.f32.mrb[19].mxu0 }
 0x4b3   : > { %v5998_v11 = vpop.f32.mrb[180].mxu1  ;;  %v6531_v43 = vadd.f32 %v5858_v31, %v8874_v3  ;;  %v5861_v13 = vadd.f32 %v5860_v26, %v5859_v46 }
 0x4b4   : > { %v5999_v63 = vpop.f32.mrb[181].mxu1 }
 0x4b5   : > { %v6000_v20 = vadd.f32 %v5999_v63, %v5998_v11  ;;  %v6001_v10 = vpop.f32.mrb[182].mxu1  ;;  %v6537_v55 = vadd.f32 %v5861_v13, %v8876_v5  ;;  %v8964_v18 = vadd.f32 %v6531_v43, %v5994_v7 }
 0x4b6   : > { %v6002_v51 = vpop.f32.mrb[183].mxu1 }
 0x4b7   : > { %v6003_v36 = vadd.f32 %v6002_v51, %v6001_v10  ;;  %v5862_v62 = vpop.f32.mrb[20].mxu0  ;;  %v8966_v58 = vadd.f32 %v6537_v55, %v5997_v4 }
 0x4b8   : > { %v5863_v56 = vpop.f32.mrb[21].mxu0 }
 0x4b9   : > { %v5864_v48 = vadd.f32 %v5863_v56, %v5862_v62  ;;  %v5865_v2 = vpop.f32.mrb[22].mxu0 }
 0x4ba   : > { %v5866_v14 = vpop.f32.mrb[23].mxu0 }
 0x4bb   : > { %v6004_v15 = vpop.f32.mrb[184].mxu1  ;;  %v6528_v3 = vadd.f32 %v5864_v48, %v8878_v21  ;;  %v5867_v54 = vadd.f32 %v5866_v14, %v5865_v2 }
 0x4bc   : > { %v6005_v32 = vpop.f32.mrb[185].mxu1 }
 0x4bd   : > { %v6006_v34 = vadd.f32 %v6005_v32, %v6004_v15  ;;  %v6007_v25 = vpop.f32.mrb[186].mxu1  ;;  %v6534_v5 = vadd.f32 %v5867_v54, %v8880_v57  ;;  %v8970_v7 = vadd.f32 %v6528_v3, %v6000_v20 }
 0x4be   : > { %v6008_v45 = vpop.f32.mrb[187].mxu1 }
 0x4bf   : > { %v6009_v59 = vadd.f32 %v6008_v45, %v6007_v25  ;;  %v5868_v50 = vpop.f32.mrb[24].mxu0  ;;  %v8972_v27 = vadd.f32 %v6534_v5, %v6003_v36 }
 0x4c0   : > { %v5869_v4 = vpop.f32.mrb[25].mxu0 }
 0x4c1   : > { %v5870_v28 = vadd.f32 %v5869_v4, %v5868_v50  ;;  %v5871_v16 = vpop.f32.mrb[26].mxu0 }
 0x4c2   : > { %v5872_v31 = vpop.f32.mrb[27].mxu0 }
 0x4c3   : > { %v6010_v46 = vpop.f32.mrb[188].mxu1  ;;  %v6543_v21 = vadd.f32 %v5870_v28, %v8882_v6  ;;  %v5873_v26 = vadd.f32 %v5872_v31, %v5871_v16 }
 0x4c4   : > { %v6011_v11 = vpop.f32.mrb[189].mxu1 }
 0x4c5   : > { %v6012_v43 = vadd.f32 %v6011_v11, %v6010_v46  ;;  %v6013_v13 = vpop.f32.mrb[190].mxu1  ;;  %v6549_v57 = vadd.f32 %v5873_v26, %v8884_v19  ;;  %v8976_v20 = vadd.f32 %v6543_v21, %v6006_v34 }
 0x4c6   : > { %v6014_v63 = vpop.f32.mrb[191].mxu1 }
 0x4c7   : > { %v6015_v10 = vadd.f32 %v6014_v63, %v6013_v13  ;;  %v5874_v55 = vpop.f32.mrb[28].mxu0  ;;  %v8978_v51 = vadd.f32 %v6549_v57, %v6009_v59 }
 0x4c8   : > { %v5875_v36 = vpop.f32.mrb[29].mxu0 }
 0x4c9   : > { %v5876_v62 = vadd.f32 %v5875_v36, %v5874_v55  ;;  %v5877_v56 = vpop.f32.mrb[30].mxu0 }
 0x4ca   : > { %v5878_v48 = vpop.f32.mrb[31].mxu0 }
 0x4cb   : > { %v6298_v2 = vpop.f32.mrb[96].mxu1  ;;  %v6540_v6 = vadd.f32 %v5876_v62, %v8886_v17  ;;  %v5879_v14 = vadd.f32 %v5878_v48, %v5877_v56 }
 0x4cc   : > { %v8982_v15 = vadd.f32 %v8898_v37, %v6298_v2  ;;  %v4555_v3 = vpop.f32.mrb[97].mxu1 }
 0x4cd   : > { %v8985_v19 = vadd.f32 %v8892_v49, %v4555_v3  ;;  %v6299_v54 = vpop.f32.mrb[98].mxu1  ;;  %v6546_v32 = vadd.f32 %v5879_v14, %v8888_v29  ;;  %v8991_v5 = vadd.f32 %v6540_v6, %v6012_v43 }
 0x4ce   : > { %v8989_v34 = vadd.f32 %v8900_v42, %v6299_v54  ;;  %v4558_v25 = vpop.f32.mrb[99].mxu1  ;;  %v4754_v42 = vmul.f32 %v8982_v15, %v8982_v15 }
 0x4cf   : > { %v8994_v45 = vadd.f32 %v8894_v61, %v4558_v25  ;;  %v8996_v17 = vadd.f32 %v6546_v32, %v6015_v10  ;;  %v4752_v37 = vmul.f32 %v8985_v19, %v8985_v19 }
 0x4d0   : > { %v4755_v16 = vmul.f32 %v8989_v34, %v8989_v34 }
 0x4d1   : > { %v4714_v49 = vadd.f32 %v8994_v45, %v8985_v19  ;;  %v4753_v29 = vmul.f32 %v8994_v45, %v8994_v45 }
 0x4d3   : > { %v4715_v59 = vadd.f32 %v8982_v15, %v4714_v49  ;;  %v4784_v50 = vadd.f32 %v4753_v29, %v4752_v37  ;;  %v6302_v4 = vpop.f32.mrb[100].mxu1 }
 0x4d4   : > { %v9008_v61 = vadd.f32 %v8910_v52, %v6302_v4  ;;  %v4571_v28 = vpop.f32.mrb[101].mxu1 }
 0x4d5   : > { %v4785_v31 = vadd.f32 %v4784_v50, %v4754_v42  ;;  %v9013_v46 = vadd.f32 %v8904_v22, %v4571_v28  ;;  %v4716_v21 = vadd.f32 %v8989_v34, %v4715_v59  ;;  %v6303_v26 = vpop.f32.mrb[102].mxu1 }
 0x4d6   : > { %v9017_v11 = vadd.f32 %v8912_v23, %v6303_v26  ;;  %v4574_v43 = vpop.f32.mrb[103].mxu1  ;;  %v4758_v23 = vmul.f32 %v9008_v61, %v9008_v61 }
 0x4d7   : > { %v4717_v13 = vadd.f32 %v9013_v46, %v4716_v21  ;;  %v4756_v52 = vmul.f32 %v9013_v46, %v9013_v46  ;;  %v4786_v57 = vadd.f32 %v4785_v31, %v4755_v16  ;;  %v9023_v63 = vadd.f32 %v8906_v60, %v4574_v43 }
 0x4d8   : > { %v4759_v60 = vmul.f32 %v9017_v11, %v9017_v11 }
 0x4d9   : > { %v4787_v10 = vadd.f32 %v4786_v57, %v4756_v52  ;;  %v4718_v22 = vadd.f32 %v9023_v63, %v4717_v13  ;;  %v4757_v55 = vmul.f32 %v9023_v63, %v9023_v63 }
 0x4db   : > { %v4719_v36 = vadd.f32 %v9008_v61, %v4718_v22  ;;  %v4788_v62 = vadd.f32 %v4787_v10, %v4757_v55  ;;  %v6306_v56 = vpop.f32.mrb[104].mxu1 }
 0x4dc   : > { %v9032_v48 = vadd.f32 %v8922_v41, %v6306_v56  ;;  %v4587_v2 = vpop.f32.mrb[105].mxu1 }
 0x4dd   : > { %v4789_v6 = vadd.f32 %v4788_v62, %v4758_v23  ;;  %v9037_v14 = vadd.f32 %v8916_v1, %v4587_v2  ;;  %v4720_v3 = vadd.f32 %v9017_v11, %v4719_v36  ;;  %v6307_v54 = vpop.f32.mrb[106].mxu1 }
 0x4de   : > { %v9041_v32 = vadd.f32 %v8924_v47, %v6307_v54  ;;  %v4590_v25 = vpop.f32.mrb[107].mxu1  ;;  %v4762_v47 = vmul.f32 %v9032_v48, %v9032_v48 }
 0x4df   : > { %v4721_v37 = vadd.f32 %v9037_v14, %v4720_v3  ;;  %v4760_v41 = vmul.f32 %v9037_v14, %v9037_v14  ;;  %v4790_v49 = vadd.f32 %v4789_v6, %v4759_v60  ;;  %v9047_v29 = vadd.f32 %v8918_v9, %v4590_v25 }
 0x4e0   : > { %v4763_v9 = vmul.f32 %v9041_v32, %v9041_v32 }
 0x4e1   : > { %v4791_v42 = vadd.f32 %v4790_v49, %v4760_v41  ;;  %v4722_v1 = vadd.f32 %v9047_v29, %v4721_v37  ;;  %v4761_v59 = vmul.f32 %v9047_v29, %v9047_v29 }
 0x4e3   : > { %v4723_v50 = vadd.f32 %v9032_v48, %v4722_v1  ;;  %v4792_v4 = vadd.f32 %v4791_v42, %v4761_v59  ;;  %v6310_v28 = vpop.f32.mrb[108].mxu1 }
 0x4e4   : > { %v9056_v16 = vadd.f32 %v8934_v38, %v6310_v28  ;;  %v4603_v31 = vpop.f32.mrb[109].mxu1 }
 0x4e5   : > { %v4793_v21 = vadd.f32 %v4792_v4, %v4762_v47  ;;  %v9061_v26 = vadd.f32 %v8928_v40, %v4603_v31  ;;  %v4724_v43 = vadd.f32 %v9041_v32, %v4723_v50  ;;  %v6311_v13 = vpop.f32.mrb[110].mxu1 }
 0x4e6   : > { %v9065_v52 = vadd.f32 %v8936_v44, %v6311_v13  ;;  %v4606_v57 = vpop.f32.mrb[111].mxu1  ;;  %v4766_v44 = vmul.f32 %v9056_v16, %v9056_v16 }
 0x4e7   : > { %v4725_v10 = vadd.f32 %v9061_v26, %v4724_v43  ;;  %v4764_v38 = vmul.f32 %v9061_v26, %v9061_v26  ;;  %v4794_v22 = vadd.f32 %v4793_v21, %v4763_v9  ;;  %v9071_v55 = vadd.f32 %v8930_v8, %v4606_v57 }
 0x4e8   : > { %v4767_v8 = vmul.f32 %v9065_v52, %v9065_v52 }
 0x4e9   : > { %v4795_v23 = vadd.f32 %v4794_v22, %v4764_v38  ;;  %v4726_v40 = vadd.f32 %v9071_v55, %v4725_v10  ;;  %v4765_v36 = vmul.f32 %v9071_v55, %v9071_v55 }
 0x4eb   : > { %v4727_v62 = vadd.f32 %v9056_v16, %v4726_v40  ;;  %v4796_v56 = vadd.f32 %v4795_v23, %v4765_v36  ;;  %v6314_v2 = vpop.f32.mrb[112].mxu1 }
 0x4ec   : > { %v9080_v60 = vadd.f32 %v8946_v12, %v6314_v2  ;;  %v4619_v6 = vpop.f32.mrb[113].mxu1 }
 0x4ed   : > { %v4797_v3 = vadd.f32 %v4796_v56, %v4766_v44  ;;  %v9085_v54 = vadd.f32 %v8940_v39, %v4619_v6  ;;  %v4728_v25 = vadd.f32 %v9065_v52, %v4727_v62  ;;  %v6315_v37 = vpop.f32.mrb[114].mxu1 }
 0x4ee   : > { %v9089_v41 = vadd.f32 %v8948_v35, %v6315_v37  ;;  %v4622_v49 = vpop.f32.mrb[115].mxu1  ;;  %v4770_v35 = vmul.f32 %v9080_v60, %v9080_v60 }
 0x4ef   : > { %v4729_v42 = vadd.f32 %v9085_v54, %v4728_v25  ;;  %v4768_v12 = vmul.f32 %v9085_v54, %v9085_v54  ;;  %v4798_v1 = vadd.f32 %v4797_v3, %v4767_v8  ;;  %v9095_v59 = vadd.f32 %v8942_v30, %v4622_v49 }
 0x4f0   : > { %v4771_v30 = vmul.f32 %v9089_v41, %v9089_v41 }
 0x4f1   : > { %v4799_v47 = vadd.f32 %v4798_v1, %v4768_v12  ;;  %v4730_v39 = vadd.f32 %v9095_v59, %v4729_v42  ;;  %v4769_v50 = vmul.f32 %v9095_v59, %v9095_v59 }
 0x4f3   : > { %v4731_v4 = vadd.f32 %v9080_v60, %v4730_v39  ;;  %v4800_v28 = vadd.f32 %v4799_v47, %v4769_v50  ;;  %v6318_v31 = vpop.f32.mrb[116].mxu1 }
 0x4f4   : > { %v9104_v9 = vadd.f32 %v8958_v0, %v6318_v31  ;;  %v4635_v21 = vpop.f32.mrb[117].mxu1 }
 0x4f5   : > { %v4801_v43 = vadd.f32 %v4800_v28, %v4770_v35  ;;  %v9109_v13 = vadd.f32 %v8952_v53, %v4635_v21  ;;  %v4732_v57 = vadd.f32 %v9089_v41, %v4731_v4  ;;  %v6319_v10 = vpop.f32.mrb[118].mxu1 }
 0x4f6   : > { %v9113_v38 = vadd.f32 %v8960_v33, %v6319_v10  ;;  %v4638_v22 = vpop.f32.mrb[119].mxu1  ;;  %v4774_v33 = vmul.f32 %v9104_v9, %v9104_v9 }
 0x4f7   : > { %v4733_v23 = vadd.f32 %v9109_v13, %v4732_v57  ;;  %v4772_v0 = vmul.f32 %v9109_v13, %v9109_v13  ;;  %v4802_v40 = vadd.f32 %v4801_v43, %v4771_v30  ;;  %v9119_v36 = vadd.f32 %v8954_v24, %v4638_v22 }
 0x4f8   : > { %v4775_v24 = vmul.f32 %v9113_v38, %v9113_v38 }
 0x4f9   : > { %v4803_v44 = vadd.f32 %v4802_v40, %v4772_v0  ;;  %v4734_v53 = vadd.f32 %v9119_v36, %v4733_v23  ;;  %v4773_v62 = vmul.f32 %v9119_v36, %v9119_v36 }
 0x4fb   : > { %v4735_v56 = vadd.f32 %v9104_v9, %v4734_v53  ;;  %v4804_v2 = vadd.f32 %v4803_v44, %v4773_v62  ;;  %v6322_v6 = vpop.f32.mrb[120].mxu1 }
 0x4fc   : > { %v9128_v8 = vadd.f32 %v8970_v7, %v6322_v6  ;;  %v4651_v3 = vpop.f32.mrb[121].mxu1 }
 0x4fd   : > { %v4805_v25 = vadd.f32 %v4804_v2, %v4774_v33  ;;  %v9133_v37 = vadd.f32 %v8964_v18, %v4651_v3  ;;  %v4736_v49 = vadd.f32 %v9113_v38, %v4735_v56  ;;  %v6323_v42 = vpop.f32.mrb[122].mxu1 }
 0x4fe   : > { %v9137_v12 = vadd.f32 %v8972_v27, %v6323_v42  ;;  %v4654_v1 = vpop.f32.mrb[123].mxu1  ;;  %v4778_v27 = vmul.f32 %v9128_v8, %v9128_v8 }
 0x4ff   : > { %v4737_v47 = vadd.f32 %v9133_v37, %v4736_v49  ;;  %v4776_v7 = vmul.f32 %v9133_v37, %v9133_v37  ;;  %v4806_v39 = vadd.f32 %v4805_v25, %v4775_v24  ;;  %v9143_v50 = vadd.f32 %v8966_v58, %v4654_v1 }
 0x500   : > { %v4779_v58 = vmul.f32 %v9137_v12, %v9137_v12 }
 0x501   : > { %v4807_v35 = vadd.f32 %v4806_v39, %v4776_v7  ;;  %v4738_v18 = vadd.f32 %v9143_v50, %v4737_v47  ;;  %v4777_v4 = vmul.f32 %v9143_v50, %v9143_v50 }
 0x503   : > { %v4739_v28 = vadd.f32 %v9128_v8, %v4738_v18  ;;  %v4808_v31 = vadd.f32 %v4807_v35, %v4777_v4  ;;  %v6326_v21 = vpop.f32.mrb[124].mxu1 }
 0x504   : > { %v9152_v30 = vadd.f32 %v8991_v5, %v6326_v21  ;;  %v4667_v43 = vpop.f32.mrb[125].mxu1 }
 0x505   : > { %v4809_v57 = vadd.f32 %v4808_v31, %v4778_v27  ;;  %v9157_v10 = vadd.f32 %v8976_v20, %v4667_v43  ;;  %v4740_v22 = vadd.f32 %v9137_v12, %v4739_v28  ;;  %v6327_v23 = vpop.f32.mrb[126].mxu1 }
 0x506   : > { %v9161_v0 = vadd.f32 %v8996_v17, %v6327_v23  ;;  %v4670_v40 = vpop.f32.mrb[127].mxu1  ;;  %v4782_v17 = vmul.f32 %v9152_v30, %v9152_v30 }
 0x507   : > { %v4741_v44 = vadd.f32 %v9157_v10, %v4740_v22  ;;  %v4780_v5 = vmul.f32 %v9157_v10, %v9157_v10  ;;  %v4810_v53 = vadd.f32 %v4809_v57, %v4779_v58  ;;  %v9167_v62 = vadd.f32 %v8978_v51, %v4670_v40 }
 0x508   : > { %v4783_v3 = vmul.f32 %v9161_v0, %v9161_v0 }
 0x509   : > { %v4811_v33 = vadd.f32 %v4810_v53, %v4780_v5  ;;  %v4742_v20 = vadd.f32 %v9167_v62, %v4741_v44  ;;  %v4781_v56 = vmul.f32 %v9167_v62, %v9167_v62 }
 0x50b   : > { %v4743_v2 = vadd.f32 %v9152_v30, %v4742_v20  ;;  %v4812_v6 = vadd.f32 %v4811_v33, %v4781_v56 }
 0x50d   : > { %v4744_v24 = vadd.f32 %v9161_v0, %v4743_v2  ;;  %v4813_v25 = vadd.f32 %v4812_v6, %v4782_v17 }
 0x50f   : > { %v4745_v51 = vrot.slane %v4744_v24, 4  ;;  %v4814_v49 = vadd.f32 %v4813_v25, %v4783_v3  ;;  %v9508_v25 = vld [vmem:[#allocation44_spill] sm:$0xff] }
 0x511   : > { %v4746_v42 = vadd.f32 %v4745_v51, %v4744_v24  ;;  %v4815_v1 = vrot.slane %v4814_v49, 4 }
 0x513   : > { %v4747_v47 = vrot.slane %v4746_v42, 2  ;;  %v4816_v7 = vadd.f32 %v4815_v1, %v4814_v49 }
 0x515   : > { %v4748_v39 = vadd.f32 %v4747_v47, %v4746_v42  ;;  %v4817_v35 = vrot.slane %v4816_v7, 2 }
 0x517   : > { %v4749_v18 = vrot.slane %v4748_v39, 1  ;;  %v4818_v4 = vadd.f32 %v4817_v35, %v4816_v7 }
 0x519   : > { %v4750_v27 = vadd.f32 %v4749_v18, %v4748_v39  ;;  %v4819_v28 = vrot.slane %v4818_v4, 1 }
 0x51b   : > { %v9178_v31 = vmul.f32 0.00390625, %v4750_v27  ;;  %v4820_v21 = vadd.f32 %v4819_v28, %v4818_v4 }
 0x51d   : > { %v4821_v43 = vmul.f32 0.00390625, %v4820_v21  ;;  %v4822_v58 = vmul.f32 %v9178_v31, %v9178_v31  ;;  %v4853_v57 = vsub.f32 %v9167_v62, %v9178_v31  ;;  %v4833_v23 = vsub.f32 %v9047_v29, %v9178_v31 }
 0x51e   : > { %v4835_v40 = vsub.f32 %v9041_v32, %v9178_v31  ;;  %v4836_v5 = vsub.f32 %v9061_v26, %v9178_v31  ;;  %v4837_v53 = vsub.f32 %v9071_v55, %v9178_v31  ;;  %v4838_v33 = vsub.f32 %v9056_v16, %v9178_v31 }
 0x51f   : > { %v4823_v22 = vsub.f32 %v4821_v43, %v4822_v58  ;;  %v4839_v62 = vsub.f32 %v9065_v52, %v9178_v31  ;;  %v4840_v20 = vsub.f32 %v9085_v54, %v9178_v31  ;;  %v4841_v29 = vsub.f32 %v9095_v59, %v9178_v31 }
 0x520   : > { %v4842_v32 = vsub.f32 %v9080_v60, %v9178_v31  ;;  %v4843_v26 = vsub.f32 %v9089_v41, %v9178_v31  ;;  %v4844_v55 = vsub.f32 %v9109_v13, %v9178_v31  ;;  %v4845_v16 = vsub.f32 %v9119_v36, %v9178_v31 }
 0x521   : > { %v4856_v44 = vadd.f32 1e-05, %v4823_v22  ;;  %v4846_v52 = vsub.f32 %v9104_v9, %v9178_v31  ;;  %v4847_v54 = vsub.f32 %v9113_v38, %v9178_v31  ;;  %v4848_v59 = vsub.f32 %v9133_v37, %v9178_v31 }
 0x522   : > { %v4849_v60 = vsub.f32 %v9143_v50, %v9178_v31  ;;  %v4850_v41 = vsub.f32 %v9128_v8, %v9178_v31  ;;  %v4851_v13 = vsub.f32 %v9137_v12, %v9178_v31  ;;  %v4852_v36 = vsub.f32 %v9157_v10, %v9178_v31 }
 0x523   : > { %6867 = vrsqrt.f32 %v4856_v44  ;;  %v4854_v9 = vsub.f32 %v9152_v30, %v9178_v31  ;;  %v4855_v38 = vsub.f32 %v9161_v0, %v9178_v31  ;;  %v4824_v37 = vsub.f32 %v8985_v19, %v9178_v31 }
 0x524   : > { %v4825_v50 = vsub.f32 %v8994_v45, %v9178_v31  ;;  %v4826_v8 = vsub.f32 %v8982_v15, %v9178_v31  ;;  %v4827_v12 = vsub.f32 %v8989_v34, %v9178_v31  ;;  %v4828_v10 = vsub.f32 %v9013_v46, %v9178_v31 }
 0x525   : > { %v4829_v30 = vsub.f32 %v9023_v63, %v9178_v31  ;;  %v4830_v0 = vsub.f32 %v9008_v61, %v9178_v31  ;;  %v4831_v19 = vsub.f32 %v9017_v11, %v9178_v31  ;;  %v4832_v45 = vsub.f32 %v9037_v14, %v9178_v31 }
 0x526   : > { %v4834_v15 = vsub.f32 %v9032_v48, %v9178_v31 }
 0x52d   : > { %v6868_v56 = vpop.eup %6867 }
 0x52e   : > { %v4887_v34 = vmul.f32 %v6868_v56, %v4853_v57  ;;  %v4858_v17 = vmul.f32 %v6868_v56, %v4824_v37  ;;  %v4859_v46 = vmul.f32 %v6868_v56, %v4825_v50  ;;  %v4860_v2 = vmul.f32 %v6868_v56, %v4826_v8  ;;  %v9519_v50 = vld [vmem:[#allocation23_spill] sm:$0xff] }
 0x52f   : > { %v4861_v6 = vmul.f32 %v6868_v56, %v4827_v12  ;;  %v4862_v63 = vmul.f32 %v6868_v56, %v4828_v10  ;;  %v4863_v3 = vmul.f32 %v6868_v56, %v4829_v30  ;;  %v4864_v24 = vmul.f32 %v6868_v56, %v4830_v0  ;;  %v9520_v12 = vld [vmem:[#allocation24_spill] sm:$0xff]  ;;  %v9521_v30 = vld [vmem:[#allocation25_spill] sm:$0xff]  ;;  %v9522_v0 = vld [vmem:[#allocation26_spill] sm:$0xff] }
 0x530   : > { %v4919_v61 = vadd.f32 %v4887_v34, %v9508_v25  ;;  %v4865_v51 = vmul.f32 %v6868_v56, %v4831_v19  ;;  %v4866_v49 = vmul.f32 %v6868_v56, %v4832_v45  ;;  %v4867_v11 = vmul.f32 %v6868_v56, %v4833_v23  ;;  %v9523_v45 = vld [vmem:[#allocation27_spill] sm:$0xff]  ;;  %v9524_v34 = vld [vmem:[#allocation28_spill] sm:$0xff] }
 0x531   : > { %v4868_v42 = vmul.f32 %v6868_v56, %v4834_v15  ;;  %v4869_v1 = vmul.f32 %v6868_v56, %v4835_v40  ;;  %v4870_v14 = vmul.f32 %v6868_v56, %v4836_v5  ;;  %v4871_v47 = vmul.f32 %v6868_v56, %v4837_v53  ;;  %v9509_v5 = vld [vmem:[#allocation13_spill] sm:$0xff]  ;;  %v9528_v25 = vld [vmem:[#allocation32_spill] sm:$0xff] }
 0x532   : > { %4951 = vst [vmem:[%s9249_s18 + $0xe8] sm:$0xff] %v4919_v61  ;;  %v4872_v48 = vmul.f32 %v6868_v56, %v4838_v33  ;;  %v4873_v7 = vmul.f32 %v6868_v56, %v4839_v62  ;;  %v4874_v39 = vmul.f32 %v6868_v56, %v4840_v20  ;;  %v4875_v35 = vmul.f32 %v6868_v56, %v4841_v29  ;;  %v9510_v33 = vld [vmem:[#allocation14_spill] sm:$0xff]  ;;  %v9511_v20 = vld [vmem:[#allocation15_spill] sm:$0xff] }
 0x533   : > { %v4876_v18 = vmul.f32 %v6868_v56, %v4842_v32  ;;  %v4877_v4 = vmul.f32 %v6868_v56, %v4843_v26  ;;  %v4878_v27 = vmul.f32 %v6868_v56, %v4844_v55  ;;  %v4879_v28 = vmul.f32 %v6868_v56, %v4845_v16  ;;  %v9512_v32 = vld [vmem:[#allocation16_spill] sm:$0xff]  ;;  %v9513_v55 = vld [vmem:[#allocation17_spill] sm:$0xff] }
 0x534   : > { %v4880_v31 = vmul.f32 %v6868_v56, %v4846_v52  ;;  %v4881_v21 = vmul.f32 %v6868_v56, %v4847_v54  ;;  %v4882_v43 = vmul.f32 %v6868_v56, %v4848_v59  ;;  %v4883_v58 = vmul.f32 %v6868_v56, %v4849_v60  ;;  %v9514_v52 = vld [vmem:[#allocation18_spill] sm:$0xff]  ;;  %v9515_v59 = vld [vmem:[#allocation19_spill] sm:$0xff] }
 0x535   : > { %v4884_v57 = vmul.f32 %v6868_v56, %v4850_v41  ;;  %v4885_v22 = vmul.f32 %v6868_v56, %v4851_v13  ;;  %v4886_v23 = vmul.f32 %v6868_v56, %v4852_v36  ;;  %v4888_v40 = vmul.f32 %v6868_v56, %v4854_v9  ;;  %v9516_v41 = vld [vmem:[#allocation20_spill] sm:$0xff]  ;;  %v9517_v36 = vld [vmem:[#allocation21_spill] sm:$0xff] }
 0x536   : > { %v4889_v44 = vmul.f32 %v6868_v56, %v4855_v38  ;;  %v4890_v53 = vadd.f32 %v4858_v17, %v9509_v5  ;;  %v4891_v62 = vadd.f32 %v4859_v46, %v9510_v33  ;;  %v4892_v29 = vadd.f32 %v4860_v2, %v9511_v20  ;;  %v9518_v38 = vld [vmem:[#allocation22_spill] sm:$0xff]  ;;  %v9525_v46 = vld [vmem:[#allocation29_spill] sm:$0xff]  ;;  %v9539_v5 = vld [vmem:[#allocation47_spill] sm:$0xff] }
 0x537   : > { %v4893_v26 = vadd.f32 %v4861_v6, %v9512_v32  ;;  %v4894_v16 = vadd.f32 %v4862_v63, %v9513_v55  ;;  %v4895_v54 = vadd.f32 %v4863_v3, %v9514_v52  ;;  %v4896_v60 = vadd.f32 %v4864_v24, %v9515_v59  ;;  %v9526_v6 = vld [vmem:[#allocation30_spill] sm:$0xff]  ;;  %v9527_v3 = vld [vmem:[#allocation31_spill] sm:$0xff] }
 0x538   : > { %v4897_v13 = vadd.f32 %v4865_v51, %v9516_v41  ;;  %v4898_v9 = vadd.f32 %v4866_v49, %v9517_v36  ;;  %v4899_v37 = vadd.f32 %v4867_v11, %v9518_v38  ;;  %v4900_v8 = vadd.f32 %v4868_v42, %v9519_v50  ;;  %4922 = vst [vmem:[%s9249_s18] sm:$0xff] %v4890_v53  ;;  %v9529_v51 = vld [vmem:[#allocation33_spill] sm:$0xff]  ;;  %v9530_v11 = vld [vmem:[#allocation34_spill] sm:$0xff] }
 0x539   : > { %4923 = vst [vmem:[%s9249_s18 + $0x8] sm:$0xff] %v4891_v62  ;;  %4924 = vst [vmem:[%s9249_s18 + $0x10] sm:$0xff] %v4892_v29  ;;  %v4901_v10 = vadd.f32 %v4869_v1, %v9520_v12  ;;  %v4902_v56 = vadd.f32 %v4870_v14, %v9521_v30  ;;  %v4903_v19 = vadd.f32 %v4871_v47, %v9522_v0  ;;  %v9531_v1 = vld [vmem:[#allocation36_spill] sm:$0xff]  ;;  %v9532_v47 = vld [vmem:[#allocation37_spill] sm:$0xff] }
 0x53a   : > { %v4904_v15 = vadd.f32 %v4872_v48, %v9523_v45  ;;  %4925 = vst [vmem:[%s9249_s18 + $0x18] sm:$0xff] %v4893_v26  ;;  %4926 = vst [vmem:[%s9249_s18 + $0x20] sm:$0xff] %v4894_v16  ;;  %v4905_v17 = vadd.f32 %v4873_v7, %v9524_v34  ;;  %v4906_v2 = vadd.f32 %v4874_v39, %v9525_v46  ;;  %v9533_v7 = vld [vmem:[#allocation38_spill] sm:$0xff] }
 0x53b   : > { %4927 = vst [vmem:[%s9249_s18 + $0x28] sm:$0xff] %v4895_v54  ;;  %4928 = vst [vmem:[%s9249_s18 + $0x30] sm:$0xff] %v4896_v60  ;;  %v4907_v63 = vadd.f32 %v4875_v35, %v9526_v6  ;;  %v4908_v24 = vadd.f32 %v4876_v18, %v9527_v3  ;;  %v4909_v61 = vadd.f32 %v4877_v4, %v9528_v25  ;;  %v9534_v35 = vld [vmem:[#allocation39_spill] sm:$0xff]  ;;  %v9535_v4 = vld [vmem:[#allocation40_spill] sm:$0xff] }
 0x53c   : > { %4929 = vst [vmem:[%s9249_s18 + $0x38] sm:$0xff] %v4897_v13  ;;  %4930 = vst [vmem:[%s9249_s18 + $0x40] sm:$0xff] %v4898_v9  ;;  %v4910_v49 = vadd.f32 %v4878_v27, %v9529_v51  ;;  %v4911_v42 = vadd.f32 %v4879_v28, %v9530_v11  ;;  %v4912_v14 = vadd.f32 %v4880_v31, %v9531_v1  ;;  %v9536_v28 = vld [vmem:[#allocation41_spill] sm:$0xff] }
 0x53d   : > { %4931 = vst [vmem:[%s9249_s18 + $0x48] sm:$0xff] %v4899_v37  ;;  %4932 = vst [vmem:[%s9249_s18 + $0x50] sm:$0xff] %v4900_v8  ;;  %v4913_v48 = vadd.f32 %v4881_v21, %v9532_v47  ;;  %v4914_v39 = vadd.f32 %v4882_v43, %v9533_v7  ;;  %v4915_v18 = vadd.f32 %v4883_v58, %v9534_v35  ;;  %v9537_v21 = vld [vmem:[#allocation43_spill] sm:$0xff]  ;;  %v9538_v58 = vld [vmem:[#allocation46_spill] sm:$0xff] }
 0x53e   : > { %4933 = vst [vmem:[%s9249_s18 + $0x58] sm:$0xff] %v4901_v10  ;;  %4934 = vst [vmem:[%s9249_s18 + $0x60] sm:$0xff] %v4902_v56  ;;  %v4916_v27 = vadd.f32 %v4884_v57, %v9535_v4  ;;  %v4917_v31 = vadd.f32 %v4885_v22, %v9536_v28  ;;  %v4918_v43 = vadd.f32 %v4886_v23, %v9537_v21 }
 0x53f   : > { %4935 = vst [vmem:[%s9249_s18 + $0x68] sm:$0xff] %v4903_v19  ;;  %4936 = vst [vmem:[%s9249_s18 + $0x70] sm:$0xff] %v4904_v15  ;;  %v4920_v57 = vadd.f32 %v4888_v40, %v9538_v58  ;;  %v4921_v53 = vadd.f32 %v4889_v44, %v9539_v5 }
 0x540   : > { %4937 = vst [vmem:[%s9249_s18 + $0x78] sm:$0xff] %v4905_v17  ;;  %4938 = vst [vmem:[%s9249_s18 + $0x80] sm:$0xff] %v4906_v2 }
 0x541   : > { %4939 = vst [vmem:[%s9249_s18 + $0x88] sm:$0xff] %v4907_v63  ;;  %4940 = vst [vmem:[%s9249_s18 + $0x90] sm:$0xff] %v4908_v24 }
 0x542   : > { %4941 = vst [vmem:[%s9249_s18 + $0x98] sm:$0xff] %v4909_v61  ;;  %4942 = vst [vmem:[%s9249_s18 + $0xa0] sm:$0xff] %v4910_v49 }
 0x543   : > { %4943 = vst [vmem:[%s9249_s18 + $0xa8] sm:$0xff] %v4911_v42  ;;  %4944 = vst [vmem:[%s9249_s18 + $0xb0] sm:$0xff] %v4912_v14 }
 0x544   : > { %4945 = vst [vmem:[%s9249_s18 + $0xb8] sm:$0xff] %v4913_v48  ;;  %4946 = vst [vmem:[%s9249_s18 + $0xc0] sm:$0xff] %v4914_v39 }
 0x545   : > { %4947 = vst [vmem:[%s9249_s18 + $0xc8] sm:$0xff] %v4915_v18  ;;  %4948 = vst [vmem:[%s9249_s18 + $0xd0] sm:$0xff] %v4916_v27 }
 0x546   : > { %4949 = vst [vmem:[%s9249_s18 + $0xd8] sm:$0xff] %v4917_v31  ;;  %4950 = vst [vmem:[%s9249_s18 + $0xe0] sm:$0xff] %v4918_v43 }
 0x547   : > { %4952 = vst [vmem:[%s9249_s18 + $0xf0] sm:$0xff] %v4920_v57  ;;  %4953 = vst [vmem:[%s9249_s18 + $0xf8] sm:$0xff] %v4921_v53 }
 0x548   : > { %6968 = shalt.err (!%p6965_p2)
}
 0x549   : > { %s6969_s25 = scalar_lea.hbm %s9303_s26, 4096  ;;  %s6973_s21 = scalar_lea.hbm %s9368_s3, 8192 }
 0x54a   : > { %p6970_p13 = scmp.ne.s32.totalorder %s9303_s26, %s6969_s25  ;;  %p6974_p4 = scmp.lt.u32.totalorder %s9303_s26, %s9368_s3 }
 0x54b   : > { %p6975_p5 = scmp.lt.u32.totalorder %s6973_s21, %s6969_s25  ;;  %p6977_p11 = scmp.lt.u32.totalorder %s6969_s25, %s9303_s26 }
 0x54c   : > { %p6971_p6 = pnand %p6970_p13, %p9540_p0 }
 0x54d   : > { %p6976_p8 = por %p6975_p5, %p6974_p4 }
 0x54e   : > { %p6972_p10 = pneg %p6971_p6 }
 0x54f   : > { %p6978_p1 = por %p6977_p11, %p6976_p8 }
 0x551   : > { %p6979_p3 = pnand %p6978_p1, %p6972_p10 }
 0x553   : > { %6982 = shalt.err (!%p6979_p3)
}
 0x554   : > { %s7035_s30 = smov 128   ;;  %s7036_s18 = smov 8  }
 0x555   : > { %6658 = dma.vmem_to_hbm [thread:$0]  (%p9540_p0), %s9305_s17, 4096, %s9303_s26, %s4955_s27, %s7035_s30, %s7035_s30, %s7036_s18  }
 0x556 PF: > { %s4983_s20 = sand.u32 1, %s7013_s12   ;;  %p9541_p7 = scmp.ne.s32.totalorder %s9416_s19, 0 }
 0x557   : > { %p9542_p9 = scmp.ge.s32.totalorder %s7025_s15, 2  ;;  %s4984_s16 = scalar_lea.sflag [#allocation5], %s4983_s20 }
 0x559   : > { %p6672_p12 = pnand %p9542_p9, %p9541_p7 }
 0x55b   : > { %7008 = dma.done.wait (!%p6672_p12), %s4984_s16, 4096  }
 0x55c   : > { %7010 = vsyncadd (!%p6672_p12), %s4984_s16, 4294963200  ;;  %p17_p2 = scmp.ge.s32.totalorder %s7167_s4, 4   ;;  %s9543_s12 = smov %s7017_s13 }
 0x55d   : > { %s9544_s13 = smov %s7021_s14  ;;  %s9545_s14 = smov %s7183_s9 }
 0x55e   : > { %s9546_s15 = smov %s7167_s4  ;;  %19 = sbr.rel (!%p17_p2) target bundleno = 6 (0x6), region = 93 }
 0x565   :  { %4989 = vsyncpa [#allocation4], 1 }
 0x566   :  { %4991 = vsyncpa [#allocation4 + $0x1], 1 }
 0x567   :  { %4992 = vsyncpa [#allocation7], 1 }
 0x568   :  { %4993 = vsyncpa [#allocation5], 1 }
 0x569   :  { %4995 = vsyncpa [#allocation5 + $0x1], 1 }

</bundles_post_ra>
